<compile_context>
chip_gen: v5e
topology: v5e:2x2
jax: 0.10.0
libtpu: 0.0.40
codegen_flags: <defaults>
</compile_context>

<pallas_src>
import functools

import jax
import jax.numpy as jnp
from jax.experimental import pallas as pl
from jax.experimental.pallas import tpu as pltpu

LATENT_DIM = 2
_TM_MAX = 512          # M-tile rows; multiple of 16 -> valid for f32 and bf16


def _round_up(x, m):
    return (x + m - 1) // m * m


# ---------------------------------------------------------------------------
# Pallas kernels
# ---------------------------------------------------------------------------
def fused_matmul_kernel(x_ref, w_ref, b_ref, o_ref, *, activation):
    """o = act(x @ w + b). Accumulation, bias and activation in f32."""
    y = jnp.dot(x_ref[...], w_ref[...], preferred_element_type=jnp.float32)
    y = y + b_ref[...]
    if activation == "relu":
        y = jnp.maximum(y, 0.0)
    elif activation == "sigmoid":
        y = jax.nn.sigmoid(y)
    o_ref[...] = y.astype(o_ref.dtype)


def latent_kernel(h_ref, we_ref, be_ref, wmv_ref, bmv_ref, eps_ref,
                  wd_ref, bd_ref, d_ref, mu_ref, lv_ref, *, latent):
    """fc_enc -> (fc_mu|fc_var) -> reparameterize -> fc_dec, one launch."""
    h = jnp.dot(h_ref[...], we_ref[...], preferred_element_type=jnp.float32)
    h = jnp.maximum(h + be_ref[...], 0.0)                        # fc_enc + ReLU
    mv = jnp.dot(h, wmv_ref[...],
                 preferred_element_type=jnp.float32) + bmv_ref[...]
    mu = mv[:, :latent]
    lv = mv[:, latent:]
    z = mu + eps_ref[...] * jnp.exp(0.5 * lv)                    # reparam trick
    d = jnp.dot(z, wd_ref[...], preferred_element_type=jnp.float32)
    d_ref[...] = jnp.maximum(d + bd_ref[...], 0.0)               # fc_dec + ReLU
    mu_ref[...] = mu
    lv_ref[...] = lv


# ---------------------------------------------------------------------------
# Pallas wrappers
# ---------------------------------------------------------------------------
def fused_linear(x, w, b, activation="none", out_dtype=jnp.float32):
    """x: (M, K), w: (K, N) (same dtype as x), b: (N,) -> out_dtype (M, N)."""
    M, K = x.shape
    N = w.shape[1]

    if M <= _TM_MAX:
        # Single M block == full array dim -> no divisibility constraint,
        # no pad / slice round-trip.
        TM, Mp = M, M
    else:
        TM = _TM_MAX
        Mp = _round_up(M, TM)
        if Mp != M:
            x = jnp.pad(x, ((0, Mp - M), (0, 0)))
    grid = (Mp // TM,)

    b2 = b.astype(jnp.float32).reshape(1, N)
    itemsize = x.dtype.itemsize
    out_itemsize = jnp.dtype(out_dtype).itemsize
    cost = pl.CostEstimate(
        flops=2 * Mp * K * N,
        transcendentals=Mp * N if activation == "sigmoid" else 0,
        bytes_accessed=(Mp * K + K * N) * itemsize + Mp * N * out_itemsize + N * 4,
    )

    # VMEM budget per step (double-buffered x/out tiles + resident w/b) is
    # well under the default scoped limit on v5e/v6e/v7x for TM=512.
    out = pl.pallas_call(
        functools.partial(fused_matmul_kernel, activation=activation),
        out_shape=jax.ShapeDtypeStruct((Mp, N), out_dtype),
        grid=grid,
        in_specs=[
            pl.BlockSpec((TM, K), lambda i: (i, 0)),   # streamed over M
            pl.BlockSpec((K, N), lambda i: (0, 0)),    # weights resident
            pl.BlockSpec((1, N), lambda i: (0, 0)),    # bias resident
        ],
        out_specs=pl.BlockSpec((TM, N), lambda i: (i, 0)),
        compiler_params=pltpu.CompilerParams(
            dimension_semantics=("parallel",)),        # shard M across TCs (v7x)
        cost_estimate=cost,
    )(x, w, b2)
    return out[:M] if Mp != M else out


def latent_block(h, eps, prep):
    """Fused fc_enc + fc_mu/fc_var + reparameterize + fc_dec (f32 path)."""
    B, D = h.shape
    L = LATENT_DIM
    we = prep["fc_enc_w"]
    Hd = we.shape[1]
    be = prep["fc_enc_b"].reshape(1, Hd)
    wmv = prep["fc_mv_w"]
    bmv = prep["fc_mv_b"].reshape(1, 2 * L)
    wd = prep["fc_dec_w"]
    bd = prep["fc_dec_b"].reshape(1, D)

    full = lambda s: pl.BlockSpec(s, lambda i: (0, 0))
    d, mu, lv = pl.pallas_call(
        functools.partial(latent_kernel, latent=L),
        out_shape=(jax.ShapeDtypeStruct((B, D), jnp.float32),
                   jax.ShapeDtypeStruct((B, L), jnp.float32),
                   jax.ShapeDtypeStruct((B, L), jnp.float32)),
        grid=(1,),
        in_specs=[full((B, D)), full((D, Hd)), full((1, Hd)),
                  full((Hd, 2 * L)), full((1, 2 * L)), full((B, L)),
                  full((L, D)), full((1, D))],
        out_specs=(full((B, D)), full((B, L)), full((B, L))),
        compiler_params=pltpu.CompilerParams(
            dimension_semantics=("arbitrary",)),
    )(h, we, be, wmv, bmv, eps, wd, bd)
    return d, mu, lv


# ---------------------------------------------------------------------------
# Conv / ConvTranspose as NHWC im2col + Pallas matmul (layout glue only)
# ---------------------------------------------------------------------------
def _im2col_nhwc(x, k, stride, pad_hw):
    """x: (B,H,W,C) -> patches (B*OH*OW, k*k*C), column order (kh, kw, c)."""
    B, H, W, C = x.shape
    (pt, pb), (pl_, pr) = pad_hw
    xp = jnp.pad(x, ((0, 0), (pt, pb), (pl_, pr), (0, 0)))
    OH = (H + pt + pb - k) // stride + 1
    OW = (W + pl_ + pr - k) // stride + 1
    cols = []
    for kh in range(k):
        for kw in range(k):
            cols.append(xp[:, kh:kh + stride * OH:stride,
                           kw:kw + stride * OW:stride, :])
    patches = jnp.stack(cols, axis=3)            # (B, OH, OW, k*k, C) - no transpose
    return patches.reshape(B * OH * OW, k * k * C), OH, OW


def conv2d_nhwc(x, w_mat, b, k, stride, pad_hw, activation="none",
                compute_dtype=jnp.bfloat16, out_dtype=jnp.float32):
    """x: (B,H,W,C); w_mat: (k*k*C, outC) with rows in (kh, kw, c) order."""
    B = x.shape[0]
    patches, OH, OW = _im2col_nhwc(x.astype(compute_dtype), k, stride, pad_hw)
    y = fused_linear(patches, w_mat.astype(compute_dtype), b, activation,
                     out_dtype=out_dtype)
    return y.reshape(B, OH, OW, w_mat.shape[1])


def conv_transpose2d_nhwc(x, w_eq_mat, b_eq, activation="none",
                          out_dtype=jnp.float32):
    """Phase-decomposed ConvTranspose2d(k=3, stride=2, pad=1, out_pad=1).

    Equivalent dense 2x2 stride-1 conv over x padded by 1 (bottom/right),
    emitting outC*4 channels (one per output phase (r, s)), then a
    depth-to-space interleave. No zero-dilated input.
    """
    B, H, W, _ = x.shape
    outC = w_eq_mat.shape[1] // 4
    y = conv2d_nhwc(x, w_eq_mat, b_eq, k=2, stride=1,
                    pad_hw=((0, 1), (0, 1)), activation=activation,
                    out_dtype=out_dtype)
    y = y.reshape(B, H, W, outC, 2, 2)           # (b, h, w, oc, r, s)
    y = y.transpose(0, 1, 4, 2, 5, 3)            # (b, h, r, w, s, oc)
    return y.reshape(B, 2 * H, 2 * W, outC)


# ---------------------------------------------------------------------------
# Parameters (PyTorch layout) + one-time kernel-ready transform
# ---------------------------------------------------------------------------
def init_params(key):
    ks = jax.random.split(key, 16)
    n = lambda k, shape, s=0.05: s * jax.random.normal(k, shape, jnp.float32)
    return {
        "conv1_w": n(ks[0], (32, 1, 3, 3)),              # (outC, inC, k, k)
        "conv1_b": n(ks[1], (32,)),
        "conv2_w": n(ks[2], (64, 32, 3, 3)),
        "conv2_b": n(ks[3], (64,)),
        "fc_enc_w": n(ks[4], (7 * 7 * 64, 16), 0.02),    # (K, N), CHW-flat rows
        "fc_enc_b": n(ks[5], (16,)),
        "fc_mu_w": n(ks[6], (16, LATENT_DIM)),
        "fc_mu_b": n(ks[7], (LATENT_DIM,)),
        "fc_var_w": n(ks[8], (16, LATENT_DIM)),
        "fc_var_b": n(ks[9], (LATENT_DIM,)),
        "fc_dec_w": n(ks[10], (LATENT_DIM, 7 * 7 * 64)),
        "fc_dec_b": n(ks[11], (7 * 7 * 64,)),
        "deconv1_w": n(ks[12], (64, 32, 3, 3)),          # (inC, outC, k, k)
        "deconv1_b": n(ks[13], (32,)),
        "deconv2_w": n(ks[14], (32, 1, 3, 3)),
        "deconv2_b": n(ks[15], (1,)),
    }


def _deconv_to_conv_weight(w_t):
    """ConvTranspose(k=3,s=2,p=1,op=1) weight (inC,outC,3,3) -> (4*inC, outC*4)
    matrix for the phase-decomposed 2x2 conv.
    Row order (dh, dw, ic); column order (oc, r, s)."""
    inC, outC = w_t.shape[0], w_t.shape[1]
    w_eq = jnp.zeros((2, 2, inC, outC, 2, 2), w_t.dtype)
    for dh in range(2):
        for dw in range(2):
            for r in range(2):
                for s in range(2):
                    kh = r + 1 - 2 * dh
                    kw = s + 1 - 2 * dw
                    if 0 <= kh <= 2 and 0 <= kw <= 2:
                        w_eq = w_eq.at[dh, dw, :, :, r, s].set(w_t[:, :, kh, kw])
    return w_eq.reshape(4 * inC, outC * 4)


def prepare_params(p):
    """One-time transform into kernel-ready matrices (NHWC conv weights in bf16,
    fused mu/var head, phase-decomposed deconv weights). Run once, outside jit."""
    conv_w_mat = lambda w: (jnp.transpose(w, (2, 3, 1, 0))
                            .reshape(-1, w.shape[0]).astype(jnp.bfloat16))
    return {
        "conv1_w": conv_w_mat(p["conv1_w"]), "conv1_b": p["conv1_b"],
        "conv2_w": conv_w_mat(p["conv2_w"]), "conv2_b": p["conv2_b"],
        # fc_enc consumes an NHWC flatten -> permute rows CHW-flat -> HWC-flat
        "fc_enc_w": p["fc_enc_w"].reshape(64, 7, 7, 16)
                                 .transpose(1, 2, 0, 3).reshape(7 * 7 * 64, 16),
        "fc_enc_b": p["fc_enc_b"],
        # fused mu / log_var head: one (16, 2*L) matmul
        "fc_mv_w": jnp.concatenate([p["fc_mu_w"], p["fc_var_w"]], axis=1),
        "fc_mv_b": jnp.concatenate([p["fc_mu_b"], p["fc_var_b"]], axis=0),
        # fc_dec produces an NHWC (7,7,64) map -> permute cols CHW -> HWC
        "fc_dec_w": p["fc_dec_w"].reshape(LATENT_DIM, 64, 7, 7)
                                 .transpose(0, 2, 3, 1).reshape(LATENT_DIM, -1),
        "fc_dec_b": p["fc_dec_b"].reshape(64, 7, 7).transpose(1, 2, 0).reshape(-1),
        "deconv1_w": _deconv_to_conv_weight(p["deconv1_w"]).astype(jnp.bfloat16),
        "deconv1_b": jnp.repeat(p["deconv1_b"], 4),
        "deconv2_w": _deconv_to_conv_weight(p["deconv2_w"]).astype(jnp.bfloat16),
        "deconv2_b": jnp.repeat(p["deconv2_b"], 4),
    }


# ---------------------------------------------------------------------------
# VAE forward
# ---------------------------------------------------------------------------
def vae_forward(prep, x, eps):
    B = x.shape[0]
    # ----- encoder (NHWC) -----
    h = jnp.transpose(x, (0, 2, 3, 1))                           # (B,28,28,1)
    h = conv2d_nhwc(h, prep["conv1_w"], prep["conv1_b"], k=3, stride=2,
                    pad_hw=((1, 1), (1, 1)), activation="relu",
                    out_dtype=jnp.bfloat16)                      # (B,14,14,32)
    h = conv2d_nhwc(h, prep["conv2_w"], prep["conv2_b"], k=3, stride=2,
                    pad_hw=((1, 1), (1, 1)), activation="relu",
                    out_dtype=jnp.float32)                       # (B,7,7,64)
    h = h.reshape(B, 7 * 7 * 64)
    # ----- fc_enc + fc_mu/fc_var + reparameterize + fc_dec (one kernel) -----
    d, mu, log_var = latent_block(h, eps, prep)                  # d: (B,3136)
    # ----- decoder (NHWC) -----
    d = d.reshape(B, 7, 7, 64)
    d = conv_transpose2d_nhwc(d, prep["deconv1_w"], prep["deconv1_b"],
                              activation="relu",
                              out_dtype=jnp.bfloat16)            # (B,14,14,32)
    d = conv_transpose2d_nhwc(d, prep["deconv2_w"], prep["deconv2_b"],
                              activation="sigmoid",
                              out_dtype=jnp.float32)             # (B,28,28,1)
    recon = jnp.transpose(d, (0, 3, 1, 2))                       # (B,1,28,28)
    return recon, mu, log_var


if __name__ == "__main__":
    key = jax.random.PRNGKey(0)
    k_x, k_eps = jax.random.split(key)

    batch = 2
    # Architecture implies 28x28 single-channel input (7*7*64 after two /2 convs).
    x = jax.random.uniform(k_x, (batch, 1, 28, 28), jnp.float32)
    eps = jax.random.normal(k_eps, (batch, LATENT_DIM), jnp.float32)

    params = init_params(jax.random.PRNGKey(42))
    prep = prepare_params(params)

    fwd = jax.jit(vae_forward)
    recon, mu, log_var = fwd(prep, x, eps)
    jax.block_until_ready((recon, mu, log_var))

    assert recon.shape == (batch, 1, 28, 28)
    assert mu.shape == (batch, LATENT_DIM)
    assert log_var.shape == (batch, LATENT_DIM)
    assert bool(jnp.all((recon >= 0.0) & (recon <= 1.0)))
    assert bool(jnp.all(jnp.isfinite(recon)))
    print("KERNEL_OK")
</pallas_src>

<mosaic_0001>
module attributes {stable_mosaic.version = 11 : i64} {
  func.func @fused_matmul_kernel(%arg0: i32, %arg1: memref<392x9xbf16, #tpu.memory_space<vmem>>, %arg2: memref<9x32xbf16, #tpu.memory_space<vmem>>, %arg3: memref<1x32xf32, #tpu.memory_space<vmem>>, %arg4: memref<392x32xbf16, #tpu.memory_space<vmem>>) attributes {dimension_semantics = [#tpu.dimension_semantics<parallel>], iteration_bounds = array<i64: 1>, scalar_prefetch = 0 : i64, scratch_operands = 0 : i64, tpu.core_type = #tpu.core_type<tc>, window_params = [{transform_indices = @transform_0, window_bounds = array<i64: 392, 9>}, {pipeline_mode = #tpu.pipeline_mode<synchronous>, transform_indices = @transform_1, window_bounds = array<i64: 9, 32>}, {pipeline_mode = #tpu.pipeline_mode<synchronous>, transform_indices = @transform_2, window_bounds = array<i64: 1, 32>}, {transform_indices = @transform_3, window_bounds = array<i64: 392, 32>}]} {
    %c0 = arith.constant 0 : index
    %c0_0 = arith.constant 0 : index
    %0 = vector.load %arg1[%c0, %c0_0] : memref<392x9xbf16, #tpu.memory_space<vmem>>, vector<392x9xbf16>
    %c0_1 = arith.constant 0 : index
    %c0_2 = arith.constant 0 : index
    %1 = vector.load %arg2[%c0_1, %c0_2] : memref<9x32xbf16, #tpu.memory_space<vmem>>, vector<9x32xbf16>
    %cst = arith.constant dense<0.000000e+00> : vector<392x32xf32>
    %2 = tpu.matmul %0, %1, %cst {dimension_numbers = #tpu.dot_dimension_numbers<[1], [0], [0], [1], [0, 0, 1, 1], [], []>} : vector<392x9xbf16>, vector<9x32xbf16>, vector<392x32xf32> -> vector<392x32xf32>
    %c0_3 = arith.constant 0 : index
    %c0_4 = arith.constant 0 : index
    %3 = vector.load %arg3[%c0_3, %c0_4] : memref<1x32xf32, #tpu.memory_space<vmem>>, vector<1x32xf32>
    %4 = vector.broadcast %3 : vector<1x32xf32> to vector<392x32xf32>
    %5 = arith.addf %2, %4 : vector<392x32xf32>
    %cst_5 = arith.constant 0.000000e+00 : f32
    %6 = vector.broadcast %cst_5 : f32 to vector<392x32xf32>
    %7 = arith.maximumf %5, %6 : vector<392x32xf32>
    %8 = arith.truncf %7 : vector<392x32xf32> to vector<392x32xbf16>
    %c0_6 = arith.constant 0 : index
    %c0_7 = arith.constant 0 : index
    %9 = vector.load %arg4[%c0_6, %c0_7] : memref<392x32xbf16, #tpu.memory_space<vmem>>, vector<392x32xbf16>
    tpu.vector_store %arg4[%c0_6, %c0_7], %8 {strides = array<i32>} : memref<392x32xbf16, #tpu.memory_space<vmem>>, vector<392x32xbf16>,
    return
  }
  func.func @transform_0(%arg0: i32) -> (i32, i32) {
    %c0_i32 = arith.constant 0 : i32
    %c0_i32_0 = arith.constant 0 : i32
    return %arg0, %c0_i32 : i32, i32
  }
  func.func @transform_1(%arg0: i32) -> (i32, i32) {
    %c0_i32 = arith.constant 0 : i32
    %c0_i32_0 = arith.constant 0 : i32
    %c0_i32_1 = arith.constant 0 : i32
    return %c0_i32, %c0_i32_0 : i32, i32
  }
  func.func @transform_2(%arg0: i32) -> (i32, i32) {
    %c0_i32 = arith.constant 0 : i32
    %c0_i32_0 = arith.constant 0 : i32
    %c0_i32_1 = arith.constant 0 : i32
    return %c0_i32, %c0_i32_0 : i32, i32
  }
  func.func @transform_3(%arg0: i32) -> (i32, i32) {
    %c0_i32 = arith.constant 0 : i32
    %c0_i32_0 = arith.constant 0 : i32
    return %arg0, %c0_i32 : i32, i32
  }
}

module attributes {stable_mosaic.version = 11 : i64} {
  func.func @fused_matmul_kernel(%arg0: i32, %arg1: memref<98x288xbf16, #tpu.memory_space<vmem>>, %arg2: memref<288x64xbf16, #tpu.memory_space<vmem>>, %arg3: memref<1x64xf32, #tpu.memory_space<vmem>>, %arg4: memref<98x64xf32, #tpu.memory_space<vmem>>) attributes {dimension_semantics = [#tpu.dimension_semantics<parallel>], iteration_bounds = array<i64: 1>, scalar_prefetch = 0 : i64, scratch_operands = 0 : i64, tpu.core_type = #tpu.core_type<tc>, window_params = [{transform_indices = @transform_0, window_bounds = array<i64: 98, 288>}, {pipeline_mode = #tpu.pipeline_mode<synchronous>, transform_indices = @transform_1, window_bounds = array<i64: 288, 64>}, {pipeline_mode = #tpu.pipeline_mode<synchronous>, transform_indices = @transform_2, window_bounds = array<i64: 1, 64>}, {transform_indices = @transform_3, window_bounds = array<i64: 98, 64>}]} {
    %c0 = arith.constant 0 : index
    %c0_0 = arith.constant 0 : index
    %0 = vector.load %arg1[%c0, %c0_0] : memref<98x288xbf16, #tpu.memory_space<vmem>>, vector<98x288xbf16>
    %c0_1 = arith.constant 0 : index
    %c0_2 = arith.constant 0 : index
    %1 = vector.load %arg2[%c0_1, %c0_2] : memref<288x64xbf16, #tpu.memory_space<vmem>>, vector<288x64xbf16>
    %cst = arith.constant dense<0.000000e+00> : vector<98x64xf32>
    %2 = tpu.matmul %0, %1, %cst {dimension_numbers = #tpu.dot_dimension_numbers<[1], [0], [0], [1], [0, 0, 1, 1], [], []>} : vector<98x288xbf16>, vector<288x64xbf16>, vector<98x64xf32> -> vector<98x64xf32>
    %c0_3 = arith.constant 0 : index
    %c0_4 = arith.constant 0 : index
    %3 = vector.load %arg3[%c0_3, %c0_4] : memref<1x64xf32, #tpu.memory_space<vmem>>, vector<1x64xf32>
    %4 = vector.broadcast %3 : vector<1x64xf32> to vector<98x64xf32>
    %5 = arith.addf %2, %4 : vector<98x64xf32>
    %cst_5 = arith.constant 0.000000e+00 : f32
    %6 = vector.broadcast %cst_5 : f32 to vector<98x64xf32>
    %7 = arith.maximumf %5, %6 : vector<98x64xf32>
    %c0_6 = arith.constant 0 : index
    %c0_7 = arith.constant 0 : index
    %8 = vector.load %arg4[%c0_6, %c0_7] : memref<98x64xf32, #tpu.memory_space<vmem>>, vector<98x64xf32>
    tpu.vector_store %arg4[%c0_6, %c0_7], %7 {strides = array<i32>} : memref<98x64xf32, #tpu.memory_space<vmem>>, vector<98x64xf32>,
    return
  }
  func.func @transform_0(%arg0: i32) -> (i32, i32) {
    %c0_i32 = arith.constant 0 : i32
    %c0_i32_0 = arith.constant 0 : i32
    return %arg0, %c0_i32 : i32, i32
  }
  func.func @transform_1(%arg0: i32) -> (i32, i32) {
    %c0_i32 = arith.constant 0 : i32
    %c0_i32_0 = arith.constant 0 : i32
    %c0_i32_1 = arith.constant 0 : i32
    return %c0_i32, %c0_i32_0 : i32, i32
  }
  func.func @transform_2(%arg0: i32) -> (i32, i32) {
    %c0_i32 = arith.constant 0 : i32
    %c0_i32_0 = arith.constant 0 : i32
    %c0_i32_1 = arith.constant 0 : i32
    return %c0_i32, %c0_i32_0 : i32, i32
  }
  func.func @transform_3(%arg0: i32) -> (i32, i32) {
    %c0_i32 = arith.constant 0 : i32
    %c0_i32_0 = arith.constant 0 : i32
    return %arg0, %c0_i32 : i32, i32
  }
}

module attributes {stable_mosaic.version = 11 : i64} {
  func.func @latent_kernel(%arg0: i32, %arg1: memref<2x3136xf32, #tpu.memory_space<vmem>>, %arg2: memref<3136x16xf32, #tpu.memory_space<vmem>>, %arg3: memref<1x16xf32, #tpu.memory_space<vmem>>, %arg4: memref<16x4xf32, #tpu.memory_space<vmem>>, %arg5: memref<1x4xf32, #tpu.memory_space<vmem>>, %arg6: memref<2x2xf32, #tpu.memory_space<vmem>>, %arg7: memref<2x3136xf32, #tpu.memory_space<vmem>>, %arg8: memref<1x3136xf32, #tpu.memory_space<vmem>>, %arg9: memref<2x3136xf32, #tpu.memory_space<vmem>>, %arg10: memref<2x2xf32, #tpu.memory_space<vmem>>, %arg11: memref<2x2xf32, #tpu.memory_space<vmem>>) attributes {dimension_semantics = [#tpu.dimension_semantics<arbitrary>], iteration_bounds = array<i64: 1>, scalar_prefetch = 0 : i64, scratch_operands = 0 : i64, tpu.core_type = #tpu.core_type<tc>, window_params = [{pipeline_mode = #tpu.pipeline_mode<synchronous>, transform_indices = @transform_0, window_bounds = array<i64: 2, 3136>}, {pipeline_mode = #tpu.pipeline_mode<synchronous>, transform_indices = @transform_1, window_bounds = array<i64: 3136, 16>}, {pipeline_mode = #tpu.pipeline_mode<synchronous>, transform_indices = @transform_2, window_bounds = array<i64: 1, 16>}, {pipeline_mode = #tpu.pipeline_mode<synchronous>, transform_indices = @transform_3, window_bounds = array<i64: 16, 4>}, {pipeline_mode = #tpu.pipeline_mode<synchronous>, transform_indices = @transform_4, window_bounds = array<i64: 1, 4>}, {pipeline_mode = #tpu.pipeline_mode<synchronous>, transform_indices = @transform_5, window_bounds = array<i64: 2, 2>}, {pipeline_mode = #tpu.pipeline_mode<synchronous>, transform_indices = @transform_6, window_bounds = array<i64: 2, 3136>}, {pipeline_mode = #tpu.pipeline_mode<synchronous>, transform_indices = @transform_7, window_bounds = array<i64: 1, 3136>}, {pipeline_mode = #tpu.pipeline_mode<synchronous>, transform_indices = @transform_8, window_bounds = array<i64: 2, 3136>}, {pipeline_mode = #tpu.pipeline_mode<synchronous>, transform_indices = @transform_9, window_bounds = array<i64: 2, 2>}, {pipeline_mode = #tpu.pipeline_mode<synchronous>, transform_indices = @transform_10, window_bounds = array<i64: 2, 2>}]} {
    %c0 = arith.constant 0 : index
    %c0_0 = arith.constant 0 : index
    %0 = vector.load %arg1[%c0, %c0_0] : memref<2x3136xf32, #tpu.memory_space<vmem>>, vector<2x3136xf32>
    %c0_1 = arith.constant 0 : index
    %c0_2 = arith.constant 0 : index
    %1 = vector.load %arg2[%c0_1, %c0_2] : memref<3136x16xf32, #tpu.memory_space<vmem>>, vector<3136x16xf32>
    %cst = arith.constant dense<0.000000e+00> : vector<2x16xf32>
    %2 = tpu.matmul %0, %1, %cst {dimension_numbers = #tpu.dot_dimension_numbers<[1], [0], [0], [1], [0, 0, 1, 1], [], []>} : vector<2x3136xf32>, vector<3136x16xf32>, vector<2x16xf32> -> vector<2x16xf32>
    %c0_3 = arith.constant 0 : index
    %c0_4 = arith.constant 0 : index
    %3 = vector.load %arg3[%c0_3, %c0_4] : memref<1x16xf32, #tpu.memory_space<vmem>>, vector<1x16xf32>
    %4 = vector.broadcast %3 : vector<1x16xf32> to vector<2x16xf32>
    %5 = arith.addf %2, %4 : vector<2x16xf32>
    %cst_5 = arith.constant 0.000000e+00 : f32
    %6 = vector.broadcast %cst_5 : f32 to vector<2x16xf32>
    %7 = arith.maximumf %5, %6 : vector<2x16xf32>
    %c0_6 = arith.constant 0 : index
    %c0_7 = arith.constant 0 : index
    %8 = vector.load %arg4[%c0_6, %c0_7] : memref<16x4xf32, #tpu.memory_space<vmem>>, vector<16x4xf32>
    %cst_8 = arith.constant dense<0.000000e+00> : vector<2x4xf32>
    %9 = tpu.matmul %7, %8, %cst_8 {dimension_numbers = #tpu.dot_dimension_numbers<[1], [0], [0], [1], [0, 0, 1, 1], [], []>} : vector<2x16xf32>, vector<16x4xf32>, vector<2x4xf32> -> vector<2x4xf32>
    %c0_9 = arith.constant 0 : index
    %c0_10 = arith.constant 0 : index
    %10 = vector.load %arg5[%c0_9, %c0_10] : memref<1x4xf32, #tpu.memory_space<vmem>>, vector<1x4xf32>
    %11 = vector.broadcast %10 : vector<1x4xf32> to vector<2x4xf32>
    %12 = arith.addf %9, %11 : vector<2x4xf32>
    %13 = vector.extract_strided_slice %12 {offsets = [0, 0], sizes = [2, 2], strides = [1, 1]} : vector<2x4xf32> to vector<2x2xf32>
    %14 = vector.extract_strided_slice %12 {offsets = [0, 2], sizes = [2, 2], strides = [1, 1]} : vector<2x4xf32> to vector<2x2xf32>
    %c0_11 = arith.constant 0 : index
    %c0_12 = arith.constant 0 : index
    %15 = vector.load %arg6[%c0_11, %c0_12] : memref<2x2xf32, #tpu.memory_space<vmem>>, vector<2x2xf32>
    %cst_13 = arith.constant 5.000000e-01 : f32
    %16 = vector.broadcast %cst_13 : f32 to vector<2x2xf32>
    %17 = arith.mulf %16, %14 : vector<2x2xf32>
    %18 = math.exp %17 : vector<2x2xf32>
    %19 = arith.mulf %15, %18 : vector<2x2xf32>
    %20 = arith.addf %13, %19 : vector<2x2xf32>
    %c0_14 = arith.constant 0 : index
    %c0_15 = arith.constant 0 : index
    %21 = vector.load %arg7[%c0_14, %c0_15] : memref<2x3136xf32, #tpu.memory_space<vmem>>, vector<2x3136xf32>
    %cst_16 = arith.constant dense<0.000000e+00> : vector<2x3136xf32>
    %22 = tpu.matmul %20, %21, %cst_16 {dimension_numbers = #tpu.dot_dimension_numbers<[1], [0], [0], [1], [0, 0, 1, 1], [], []>} : vector<2x2xf32>, vector<2x3136xf32>, vector<2x3136xf32> -> vector<2x3136xf32>
    %c0_17 = arith.constant 0 : index
    %c0_18 = arith.constant 0 : index
    %23 = vector.load %arg8[%c0_17, %c0_18] : memref<1x3136xf32, #tpu.memory_space<vmem>>, vector<1x3136xf32>
    %24 = vector.broadcast %23 : vector<1x3136xf32> to vector<2x3136xf32>
    %25 = arith.addf %22, %24 : vector<2x3136xf32>
    %cst_19 = arith.constant 0.000000e+00 : f32
    %26 = vector.broadcast %cst_19 : f32 to vector<2x3136xf32>
    %27 = arith.maximumf %25, %26 : vector<2x3136xf32>
    %c0_20 = arith.constant 0 : index
    %c0_21 = arith.constant 0 : index
    %28 = vector.load %arg9[%c0_20, %c0_21] : memref<2x3136xf32, #tpu.memory_space<vmem>>, vector<2x3136xf32>
    tpu.vector_store %arg9[%c0_20, %c0_21], %27 {strides = array<i32>} : memref<2x3136xf32, #tpu.memory_space<vmem>>, vector<2x3136xf32>,
    %c0_22 = arith.constant 0 : index
    %c0_23 = arith.constant 0 : index
    %29 = vector.load %arg10[%c0_22, %c0_23] : memref<2x2xf32, #tpu.memory_space<vmem>>, vector<2x2xf32>
    tpu.vector_store %arg10[%c0_22, %c0_23], %13 {strides = array<i32>} : memref<2x2xf32, #tpu.memory_space<vmem>>, vector<2x2xf32>,
    %c0_24 = arith.constant 0 : index
    %c0_25 = arith.constant 0 : index
    %30 = vector.load %arg11[%c0_24, %c0_25] : memref<2x2xf32, #tpu.memory_space<vmem>>, vector<2x2xf32>
    tpu.vector_store %arg11[%c0_24, %c0_25], %14 {strides = array<i32>} : memref<2x2xf32, #tpu.memory_space<vmem>>, vector<2x2xf32>,
    return
  }
  func.func @transform_0(%arg0: i32) -> (i32, i32) {
    %c0_i32 = arith.constant 0 : i32
    %c0_i32_0 = arith.constant 0 : i32
    %c0_i32_1 = arith.constant 0 : i32
    return %c0_i32, %c0_i32_0 : i32, i32
  }
  func.func @transform_1(%arg0: i32) -> (i32, i32) {
    %c0_i32 = arith.constant 0 : i32
    %c0_i32_0 = arith.constant 0 : i32
    %c0_i32_1 = arith.constant 0 : i32
    return %c0_i32, %c0_i32_0 : i32, i32
  }
  func.func @transform_2(%arg0: i32) -> (i32, i32) {
    %c0_i32 = arith.constant 0 : i32
    %c0_i32_0 = arith.constant 0 : i32
    %c0_i32_1 = arith.constant 0 : i32
    return %c0_i32, %c0_i32_0 : i32, i32
  }
  func.func @transform_3(%arg0: i32) -> (i32, i32) {
    %c0_i32 = arith.constant 0 : i32
    %c0_i32_0 = arith.constant 0 : i32
    %c0_i32_1 = arith.constant 0 : i32
    return %c0_i32, %c0_i32_0 : i32, i32
  }
  func.func @transform_4(%arg0: i32) -> (i32, i32) {
    %c0_i32 = arith.constant 0 : i32
    %c0_i32_0 = arith.constant 0 : i32
    %c0_i32_1 = arith.constant 0 : i32
    return %c0_i32, %c0_i32_0 : i32, i32
  }
  func.func @transform_5(%arg0: i32) -> (i32, i32) {
    %c0_i32 = arith.constant 0 : i32
    %c0_i32_0 = arith.constant 0 : i32
    %c0_i32_1 = arith.constant 0 : i32
    return %c0_i32, %c0_i32_0 : i32, i32
  }
  func.func @transform_6(%arg0: i32) -> (i32, i32) {
    %c0_i32 = arith.constant 0 : i32
    %c0_i32_0 = arith.constant 0 : i32
    %c0_i32_1 = arith.constant 0 : i32
    return %c0_i32, %c0_i32_0 : i32, i32
  }
  func.func @transform_7(%arg0: i32) -> (i32, i32) {
    %c0_i32 = arith.constant 0 : i32
    %c0_i32_0 = arith.constant 0 : i32
    %c0_i32_1 = arith.constant 0 : i32
    return %c0_i32, %c0_i32_0 : i32, i32
  }
  func.func @transform_8(%arg0: i32) -> (i32, i32) {
    %c0_i32 = arith.constant 0 : i32
    %c0_i32_0 = arith.constant 0 : i32
    %c0_i32_1 = arith.constant 0 : i32
    return %c0_i32, %c0_i32_0 : i32, i32
  }
  func.func @transform_9(%arg0: i32) -> (i32, i32) {
    %c0_i32 = arith.constant 0 : i32
    %c0_i32_0 = arith.constant 0 : i32
    %c0_i32_1 = arith.constant 0 : i32
    return %c0_i32, %c0_i32_0 : i32, i32
  }
  func.func @transform_10(%arg0: i32) -> (i32, i32) {
    %c0_i32 = arith.constant 0 : i32
    %c0_i32_0 = arith.constant 0 : i32
    %c0_i32_1 = arith.constant 0 : i32
    return %c0_i32, %c0_i32_0 : i32, i32
  }
}

module attributes {stable_mosaic.version = 11 : i64} {
  func.func @fused_matmul_kernel(%arg0: i32, %arg1: memref<98x256xbf16, #tpu.memory_space<vmem>>, %arg2: memref<256x128xbf16, #tpu.memory_space<vmem>>, %arg3: memref<1x128xf32, #tpu.memory_space<vmem>>, %arg4: memref<98x128xbf16, #tpu.memory_space<vmem>>) attributes {dimension_semantics = [#tpu.dimension_semantics<parallel>], iteration_bounds = array<i64: 1>, scalar_prefetch = 0 : i64, scratch_operands = 0 : i64, tpu.core_type = #tpu.core_type<tc>, window_params = [{transform_indices = @transform_0, window_bounds = array<i64: 98, 256>}, {pipeline_mode = #tpu.pipeline_mode<synchronous>, transform_indices = @transform_1, window_bounds = array<i64: 256, 128>}, {pipeline_mode = #tpu.pipeline_mode<synchronous>, transform_indices = @transform_2, window_bounds = array<i64: 1, 128>}, {transform_indices = @transform_3, window_bounds = array<i64: 98, 128>}]} {
    %c0 = arith.constant 0 : index
    %c0_0 = arith.constant 0 : index
    %0 = vector.load %arg1[%c0, %c0_0] : memref<98x256xbf16, #tpu.memory_space<vmem>>, vector<98x256xbf16>
    %c0_1 = arith.constant 0 : index
    %c0_2 = arith.constant 0 : index
    %1 = vector.load %arg2[%c0_1, %c0_2] : memref<256x128xbf16, #tpu.memory_space<vmem>>, vector<256x128xbf16>
    %cst = arith.constant dense<0.000000e+00> : vector<98x128xf32>
    %2 = tpu.matmul %0, %1, %cst {dimension_numbers = #tpu.dot_dimension_numbers<[1], [0], [0], [1], [0, 0, 1, 1], [], []>} : vector<98x256xbf16>, vector<256x128xbf16>, vector<98x128xf32> -> vector<98x128xf32>
    %c0_3 = arith.constant 0 : index
    %c0_4 = arith.constant 0 : index
    %3 = vector.load %arg3[%c0_3, %c0_4] : memref<1x128xf32, #tpu.memory_space<vmem>>, vector<1x128xf32>
    %4 = vector.broadcast %3 : vector<1x128xf32> to vector<98x128xf32>
    %5 = arith.addf %2, %4 : vector<98x128xf32>
    %cst_5 = arith.constant 0.000000e+00 : f32
    %6 = vector.broadcast %cst_5 : f32 to vector<98x128xf32>
    %7 = arith.maximumf %5, %6 : vector<98x128xf32>
    %8 = arith.truncf %7 : vector<98x128xf32> to vector<98x128xbf16>
    %c0_6 = arith.constant 0 : index
    %c0_7 = arith.constant 0 : index
    %9 = vector.load %arg4[%c0_6, %c0_7] : memref<98x128xbf16, #tpu.memory_space<vmem>>, vector<98x128xbf16>
    tpu.vector_store %arg4[%c0_6, %c0_7], %8 {strides = array<i32>} : memref<98x128xbf16, #tpu.memory_space<vmem>>, vector<98x128xbf16>,
    return
  }
  func.func @transform_0(%arg0: i32) -> (i32, i32) {
    %c0_i32 = arith.constant 0 : i32
    %c0_i32_0 = arith.constant 0 : i32
    return %arg0, %c0_i32 : i32, i32
  }
  func.func @transform_1(%arg0: i32) -> (i32, i32) {
    %c0_i32 = arith.constant 0 : i32
    %c0_i32_0 = arith.constant 0 : i32
    %c0_i32_1 = arith.constant 0 : i32
    return %c0_i32, %c0_i32_0 : i32, i32
  }
  func.func @transform_2(%arg0: i32) -> (i32, i32) {
    %c0_i32 = arith.constant 0 : i32
    %c0_i32_0 = arith.constant 0 : i32
    %c0_i32_1 = arith.constant 0 : i32
    return %c0_i32, %c0_i32_0 : i32, i32
  }
  func.func @transform_3(%arg0: i32) -> (i32, i32) {
    %c0_i32 = arith.constant 0 : i32
    %c0_i32_0 = arith.constant 0 : i32
    return %arg0, %c0_i32 : i32, i32
  }
}

module attributes {stable_mosaic.version = 11 : i64} {
  func.func @fused_matmul_kernel(%arg0: i32, %arg1: memref<392x128xbf16, #tpu.memory_space<vmem>>, %arg2: memref<128x4xbf16, #tpu.memory_space<vmem>>, %arg3: memref<1x4xf32, #tpu.memory_space<vmem>>, %arg4: memref<392x4xf32, #tpu.memory_space<vmem>>) attributes {dimension_semantics = [#tpu.dimension_semantics<parallel>], iteration_bounds = array<i64: 1>, scalar_prefetch = 0 : i64, scratch_operands = 0 : i64, tpu.core_type = #tpu.core_type<tc>, window_params = [{transform_indices = @transform_0, window_bounds = array<i64: 392, 128>}, {pipeline_mode = #tpu.pipeline_mode<synchronous>, transform_indices = @transform_1, window_bounds = array<i64: 128, 4>}, {pipeline_mode = #tpu.pipeline_mode<synchronous>, transform_indices = @transform_2, window_bounds = array<i64: 1, 4>}, {transform_indices = @transform_3, window_bounds = array<i64: 392, 4>}]} {
    %c0 = arith.constant 0 : index
    %c0_0 = arith.constant 0 : index
    %0 = vector.load %arg1[%c0, %c0_0] : memref<392x128xbf16, #tpu.memory_space<vmem>>, vector<392x128xbf16>
    %c0_1 = arith.constant 0 : index
    %c0_2 = arith.constant 0 : index
    %1 = vector.load %arg2[%c0_1, %c0_2] : memref<128x4xbf16, #tpu.memory_space<vmem>>, vector<128x4xbf16>
    %cst = arith.constant dense<0.000000e+00> : vector<392x4xf32>
    %2 = tpu.matmul %0, %1, %cst {dimension_numbers = #tpu.dot_dimension_numbers<[1], [0], [0], [1], [0, 0, 1, 1], [], []>} : vector<392x128xbf16>, vector<128x4xbf16>, vector<392x4xf32> -> vector<392x4xf32>
    %c0_3 = arith.constant 0 : index
    %c0_4 = arith.constant 0 : index
    %3 = vector.load %arg3[%c0_3, %c0_4] : memref<1x4xf32, #tpu.memory_space<vmem>>, vector<1x4xf32>
    %4 = vector.broadcast %3 : vector<1x4xf32> to vector<392x4xf32>
    %5 = arith.addf %2, %4 : vector<392x4xf32>
    %6 = arith.negf %5 : vector<392x4xf32>
    %7 = math.exp %6 : vector<392x4xf32>
    %cst_5 = arith.constant 1.000000e+00 : f32
    %8 = vector.broadcast %cst_5 : f32 to vector<392x4xf32>
    %9 = arith.addf %8, %7 : vector<392x4xf32>
    %10 = arith.divf %8, %9 : vector<392x4xf32>
    %c0_6 = arith.constant 0 : index
    %c0_7 = arith.constant 0 : index
    %11 = vector.load %arg4[%c0_6, %c0_7] : memref<392x4xf32, #tpu.memory_space<vmem>>, vector<392x4xf32>
    tpu.vector_store %arg4[%c0_6, %c0_7], %10 {strides = array<i32>} : memref<392x4xf32, #tpu.memory_space<vmem>>, vector<392x4xf32>,
    return
  }
  func.func @transform_0(%arg0: i32) -> (i32, i32) {
    %c0_i32 = arith.constant 0 : i32
    %c0_i32_0 = arith.constant 0 : i32
    return %arg0, %c0_i32 : i32, i32
  }
  func.func @transform_1(%arg0: i32) -> (i32, i32) {
    %c0_i32 = arith.constant 0 : i32
    %c0_i32_0 = arith.constant 0 : i32
    %c0_i32_1 = arith.constant 0 : i32
    return %c0_i32, %c0_i32_0 : i32, i32
  }
  func.func @transform_2(%arg0: i32) -> (i32, i32) {
    %c0_i32 = arith.constant 0 : i32
    %c0_i32_0 = arith.constant 0 : i32
    %c0_i32_1 = arith.constant 0 : i32
    return %c0_i32, %c0_i32_0 : i32, i32
  }
  func.func @transform_3(%arg0: i32) -> (i32, i32) {
    %c0_i32 = arith.constant 0 : i32
    %c0_i32_0 = arith.constant 0 : i32
    return %arg0, %c0_i32 : i32, i32
  }
}

</mosaic_0001>

<bundles_post_ra>
// kernel: vae_forward.5
= control target key start
LH: loop header
LB: loop body
LE: loop exit
PB: predicated region body
PF: predicated region fallthrough
CT: control target
= control target key end

     0   :  { %8 = vsyncpa [#allocation3], 0  ;;  %s1187_s0 = inlined_call_operand.vmem [shape: bf16[392,9], index: 0, kind: input, shape index: {}]   ;;  %s1188_s1 = inlined_call_operand.hbm [shape: bf16[9,32], index: 1, kind: input, shape index: {}]   ;;  %s1189_s2 = inlined_call_operand.hbm [shape: f32[1,32], index: 2, kind: input, shape index: {}]   ;;  %s1190_s3 = inlined_call_operand.vmem [shape: bf16[392,32], index: 3, kind: output, shape index: {}]  }
   0x1   :  { %s16_s14 = sshll.u32 %s1188_s1, 4  ;;  %s17_s14 = int_to_ptr.hbm [resolvable:$true] %s16_s14 }
   0x2   :  { %9 = vsyncpa [#allocation5], 0  ;;  %s809_s15 = smov [#allocation2]   ;;  %s30_s19 = sshll.u32 %s1189_s2, 4  ;;  %s31_s19 = int_to_ptr.hbm [resolvable:$true] %s30_s19 }
   0x3   :  { %s18_s16 = sshll.u32 %s809_s15, 4  ;;  %s810_s20 = smov 64   ;;  %s19_s16 = int_to_ptr.vmem [resolvable:$true] %s18_s16 }
   0x4   :  { %s811_s21 = smov 4   ;;  %s812_s22 = smov [#allocation4]  }
   0x5   :  { %24 = dma.hbm_to_vmem [thread:$0]  %s17_s14, 128, %s19_s16, [#allocation3], %s810_s20, %s810_s20, %s811_s21  }
   0x6   :  { %s32_s23 = sshll.u32 %s812_s22, 4  ;;  %s33_s23 = int_to_ptr.vmem [resolvable:$true] %s32_s23 }
   0x7   :  { %35 = dma.hbm_to_vmem [thread:$0]  %s31_s19, 16, %s33_s23, [#allocation5]  }
   0x8   :  { %805 = dma.done.wait [#allocation3], 128  }
   0x9   :  { %806 = vsyncadd [#allocation3], 4294967168 }
   0xa   :  { %807 = dma.done.wait [#allocation5], 16  }
   0xb   :  { %808 = vsyncadd [#allocation5], 4294967280  ;;  %vm304_vm0 = vcmask 1043456   ;;  %vm305_vm1 = vcmask 1044480   ;;  %v813_v0 = vmov 65535   ;;  %v723_v7 = vld [vmem:[%s1187_s0] sm:$0xff] }
   0xc   :  { %v306_v1 = vsel %vm304_vm0, 4294967295, %v813_v0  ;;  %v696_v2 = vld [vmem:[#allocation2] sm:$0xf]  ;;  %v747_v3 = vld [vmem:[#allocation2] sm:$0x10]  ;;  %v730_v8 = vld [vmem:[%s1187_s0 + $0x38] sm:$0xff] }
   0xd   :  { %v307_v4 = vsel %vm305_vm1, %v306_v1, 0  ;;  %v697_v5 = vor.u32 %v747_v3, %v696_v2  ;;  %vm228_vm2 = vcmask 72704   ;;  %v737_v9 = vld [vmem:[%s1187_s0 + $0x70] sm:$0xff]  ;;  %v744_v10 = vld [vmem:[%s1187_s0 + $0xa8] sm:$0xff]  ;;  %v731_v12 = vld [vmem:[%s1187_s0 + $0x40] sm:$0xff]  ;;  %vm542_vm3 = vcmask 257024  }
   0xe   :  { %v724_v11 = vld [vmem:[%s1187_s0 + $0x8] sm:$0xff]  ;;  %v738_v13 = vld [vmem:[%s1187_s0 + $0x78] sm:$0xff]  ;;  %v745_v14 = vld [vmem:[%s1187_s0 + $0xb0] sm:$0xff] }
   0xf   :  { %v309_v6 = vand.u32 %v697_v5, %v307_v4  ;;  %v725_v15 = vld [vmem:[%s1187_s0 + $0x10] sm:$0xff]  ;;  %v732_v16 = vld [vmem:[%s1187_s0 + $0x48] sm:$0xff]  ;;  %v739_v17 = vld [vmem:[%s1187_s0 + $0x80] sm:$0xff] }
  0x10   :  { %v746_v18 = vld [vmem:[%s1187_s0 + $0xb8] sm:$0xff]  ;;  %v733_v20 = vld [vmem:[%s1187_s0 + $0x50] sm:$0xff]  ;;  %v740_v21 = vld [vmem:[%s1187_s0 + $0x88] sm:$0xff] }
  0x11   :  { %318 = vmatpush.bf16.msra.mxu0 %v309_v6  ;;  %748 = vmatpush.bf16.msra.mxu1 %v309_v6  ;;  %v726_v19 = vld [vmem:[%s1187_s0 + $0x18] sm:$0xff]  ;;  %v93_v22 = vld [vmem:[%s1187_s0 + $0xc0] sm:$0xf]  ;;  %v741_v27 = vld [vmem:[%s1187_s0 + $0x90] sm:$0xff] }
  0x12   :  { %749 = vmatpush.bf16.msra.mxu2 %v309_v6  ;;  %750 = vmatpush.bf16.msra.mxu3 %v309_v6  ;;  %v197_v23 = vunpack.c.l.b16 %v93_v22  ;;  %v727_v25 = vld [vmem:[%s1187_s0 + $0x20] sm:$0xff]  ;;  %v734_v26 = vld [vmem:[%s1187_s0 + $0x58] sm:$0xff]  ;;  %v728_v28 = vld [vmem:[%s1187_s0 + $0x28] sm:$0xff] }
  0x13   :  { %v735_v29 = vld [vmem:[%s1187_s0 + $0x60] sm:$0xff]  ;;  %v742_v30 = vld [vmem:[%s1187_s0 + $0x98] sm:$0xff]  ;;  %v729_v31 = vld [vmem:[%s1187_s0 + $0x30] sm:$0xff] }
  0x14   :  { %698 = vmatmul.msk.bf16.vlgmr.msra.gmra.mxu0 %vm228_vm2, %v723_v7  ;;  %705 = vmatmul.msk.bf16.vlgmr.msra.gmra.mxu1 %vm228_vm2, %v730_v8  ;;  %v222_v24 = vpack.c.b16 %v197_v23, %v197_v23  ;;  %v736_v32 = vld [vmem:[%s1187_s0 + $0x68] sm:$0xff]  ;;  %v743_v33 = vld [vmem:[%s1187_s0 + $0xa0] sm:$0xff] }
  0x15   :  { %712 = vmatmul.msk.bf16.vlgmr.msra.gmra.mxu2 %vm228_vm2, %v737_v9  ;;  %719 = vmatmul.msk.bf16.vlgmr.msra.gmra.mxu3 %vm228_vm2, %v744_v10  ;;  %v940_v34 = vld [vmem:[#allocation4] ss:$0 sm:$0xff] }
  0x24   :  { %699 = vmatmul.msk.bf16.gmra.mxu0 %vm228_vm2, %v724_v11  ;;  %706 = vmatmul.msk.bf16.gmra.mxu1 %vm228_vm2, %v731_v12 }
  0x25   :  { %713 = vmatmul.msk.bf16.gmra.mxu2 %vm228_vm2, %v738_v13  ;;  %720 = vmatmul.msk.bf16.gmra.mxu3 %vm228_vm2, %v745_v14 }
  0x34   :  { %700 = vmatmul.msk.bf16.gmra.mxu0 %vm228_vm2, %v725_v15  ;;  %707 = vmatmul.msk.bf16.gmra.mxu1 %vm228_vm2, %v732_v16 }
  0x35   :  { %714 = vmatmul.msk.bf16.gmra.mxu2 %vm228_vm2, %v739_v17  ;;  %721 = vmatmul.msk.bf16.gmra.mxu3 %vm228_vm2, %v746_v18 }
  0x44   :  { %701 = vmatmul.msk.bf16.gmra.mxu0 %vm228_vm2, %v726_v19  ;;  %708 = vmatmul.msk.bf16.gmra.mxu1 %vm228_vm2, %v733_v20 }
  0x45   :  { %715 = vmatmul.msk.bf16.gmra.mxu2 %vm228_vm2, %v740_v21  ;;  %722 = vmatmul.msk.bf16.gmra.mxu3 %vm228_vm2, %v222_v24 }
  0x54   :  { %702 = vmatmul.msk.bf16.gmra.mxu0 %vm228_vm2, %v727_v25  ;;  %709 = vmatmul.msk.bf16.gmra.mxu1 %vm228_vm2, %v734_v26 }
  0x55   :  { %716 = vmatmul.msk.bf16.gmra.mxu2 %vm228_vm2, %v741_v27 }
  0x64   :  { %703 = vmatmul.msk.bf16.gmra.mxu0 %vm228_vm2, %v728_v28  ;;  %710 = vmatmul.msk.bf16.gmra.mxu1 %vm228_vm2, %v735_v29 }
  0x65   :  { %717 = vmatmul.msk.bf16.gmra.mxu2 %vm228_vm2, %v742_v30 }
  0x74   :  { %704 = vmatmul.msk.bf16.gmra.mxu0 %vm228_vm2, %v729_v31  ;;  %711 = vmatmul.msk.bf16.gmra.mxu1 %vm228_vm2, %v736_v32 }
  0x75   :  { %718 = vmatmul.msk.bf16.gmra.mxu2 %vm228_vm2, %v743_v33 }
  0x91   :  { %v320_v35 = vpop.f32.mrf.mxu0  ;;  %v355_v36 = vpop.f32.mrf.mxu1 }
  0x92   :  { %v321_v37 = vadd.f32 %v940_v34, %v320_v35  ;;  %v356_v38 = vadd.f32 %v940_v34, %v355_v36 }
  0x94   :  { %v444_v39 = vmax.f32 %v321_v37, 0.0  ;;  %v458_v40 = vmax.f32 %v356_v38, 0.0 }
  0x96   :  { %v493_v41 = vpack.c.bf16 %v444_v39, %v444_v39  ;;  %v507_v42 = vpack.c.bf16 %v458_v40, %v458_v40 }
  0x98   :  { %543 = vst.msk [vmem:[%s1190_s3] sm:$0xf] %vm542_vm3, %v493_v41  ;;  %v390_v43 = vpop.f32.mrf.mxu2  ;;  %v425_v3 = vpop.f32.mrf.mxu3 }
  0x99   :  { %557 = vst.msk [vmem:[%s1190_s3 + $0x38] sm:$0xf] %vm542_vm3, %v507_v42  ;;  %v391_v44 = vadd.f32 %v940_v34, %v390_v43  ;;  %v322_v45 = vpop.f32.mrf.mxu0  ;;  %v357_v46 = vpop.f32.mrf.mxu1  ;;  %v426_v8 = vadd.f32 %v940_v34, %v425_v3 }
  0x9a   :  { %v323_v47 = vadd.f32 %v940_v34, %v322_v45  ;;  %v358_v48 = vadd.f32 %v940_v34, %v357_v46 }
  0x9b   :  { %v472_v49 = vmax.f32 %v391_v44, 0.0  ;;  %v486_v12 = vmax.f32 %v426_v8, 0.0 }
  0x9c   :  { %v445_v50 = vmax.f32 %v323_v47, 0.0  ;;  %v459_v51 = vmax.f32 %v358_v48, 0.0 }
  0x9d   :  { %v521_v52 = vpack.c.bf16 %v472_v49, %v472_v49  ;;  %v535_v18 = vpack.c.bf16 %v486_v12, %v486_v12 }
  0x9e   :  { %v494_v53 = vpack.c.bf16 %v445_v50, %v445_v50  ;;  %v508_v54 = vpack.c.bf16 %v459_v51, %v459_v51 }
  0x9f   :  { %571 = vst.msk [vmem:[%s1190_s3 + $0x70] sm:$0xf] %vm542_vm3, %v521_v52 }
  0xa0   :  { %544 = vst.msk [vmem:[%s1190_s3 + $0x4] sm:$0xf] %vm542_vm3, %v494_v53  ;;  %v392_v55 = vpop.f32.mrf.mxu2  ;;  %v427_v19 = vpop.f32.mrf.mxu3 }
  0xa1   :  { %558 = vst.msk [vmem:[%s1190_s3 + $0x3c] sm:$0xf] %vm542_vm3, %v508_v54  ;;  %v393_v56 = vadd.f32 %v940_v34, %v392_v55  ;;  %v325_v57 = vpop.f32.mrf.mxu0  ;;  %v360_v58 = vpop.f32.mrf.mxu1  ;;  %v428_v21 = vadd.f32 %v940_v34, %v427_v19 }
  0xa2   :  { %v326_v59 = vadd.f32 %v940_v34, %v325_v57  ;;  %v361_v60 = vadd.f32 %v940_v34, %v360_v58  ;;  %585 = vst.msk [vmem:[%s1190_s3 + $0xa8] sm:$0xf] %vm542_vm3, %v535_v18 }
  0xa3   :  { %v473_v61 = vmax.f32 %v393_v56, 0.0  ;;  %v487_v27 = vmax.f32 %v428_v21, 0.0 }
  0xa4   :  { %v446_v62 = vmax.f32 %v326_v59, 0.0  ;;  %v460_v63 = vmax.f32 %v361_v60, 0.0 }
  0xa5   :  { %v522_v0 = vpack.c.bf16 %v473_v61, %v473_v61  ;;  %v536_v31 = vpack.c.bf16 %v487_v27, %v487_v27 }
  0xa6   :  { %v495_v1 = vpack.c.bf16 %v446_v62, %v446_v62  ;;  %v509_v2 = vpack.c.bf16 %v460_v63, %v460_v63 }
  0xa7   :  { %572 = vst.msk [vmem:[%s1190_s3 + $0x74] sm:$0xf] %vm542_vm3, %v522_v0 }
  0xa8   :  { %545 = vst.msk [vmem:[%s1190_s3 + $0x8] sm:$0xf] %vm542_vm3, %v495_v1  ;;  %v395_v4 = vpop.f32.mrf.mxu2  ;;  %v430_v36 = vpop.f32.mrf.mxu3 }
  0xa9   :  { %559 = vst.msk [vmem:[%s1190_s3 + $0x40] sm:$0xf] %vm542_vm3, %v509_v2  ;;  %v396_v5 = vadd.f32 %v940_v34, %v395_v4  ;;  %v327_v6 = vpop.f32.mrf.mxu0  ;;  %v362_v7 = vpop.f32.mrf.mxu1  ;;  %v431_v41 = vadd.f32 %v940_v34, %v430_v36 }
  0xaa   :  { %v328_v9 = vadd.f32 %v940_v34, %v327_v6  ;;  %v363_v10 = vadd.f32 %v940_v34, %v362_v7  ;;  %586 = vst.msk [vmem:[%s1190_s3 + $0xac] sm:$0xf] %vm542_vm3, %v536_v31 }
  0xab   :  { %v474_v11 = vmax.f32 %v396_v5, 0.0  ;;  %v488_v45 = vmax.f32 %v431_v41, 0.0 }
  0xac   :  { %v447_v13 = vmax.f32 %v328_v9, 0.0  ;;  %v461_v14 = vmax.f32 %v363_v10, 0.0 }
  0xad   :  { %v523_v15 = vpack.c.bf16 %v474_v11, %v474_v11  ;;  %v537_v51 = vpack.c.bf16 %v488_v45, %v488_v45 }
  0xae   :  { %v496_v16 = vpack.c.bf16 %v447_v13, %v447_v13  ;;  %v510_v17 = vpack.c.bf16 %v461_v14, %v461_v14 }
  0xaf   :  { %573 = vst.msk [vmem:[%s1190_s3 + $0x78] sm:$0xf] %vm542_vm3, %v523_v15 }
  0xb0   :  { %546 = vst.msk [vmem:[%s1190_s3 + $0xc] sm:$0xf] %vm542_vm3, %v496_v16  ;;  %v397_v20 = vpop.f32.mrf.mxu2  ;;  %v432_v52 = vpop.f32.mrf.mxu3 }
  0xb1   :  { %560 = vst.msk [vmem:[%s1190_s3 + $0x44] sm:$0xf] %vm542_vm3, %v510_v17  ;;  %v398_v22 = vadd.f32 %v940_v34, %v397_v20  ;;  %v330_v23 = vpop.f32.mrf.mxu0  ;;  %v365_v24 = vpop.f32.mrf.mxu1  ;;  %v433_v54 = vadd.f32 %v940_v34, %v432_v52 }
  0xb2   :  { %v331_v25 = vadd.f32 %v940_v34, %v330_v23  ;;  %v366_v26 = vadd.f32 %v940_v34, %v365_v24  ;;  %587 = vst.msk [vmem:[%s1190_s3 + $0xb0] sm:$0xf] %vm542_vm3, %v537_v51 }
  0xb3   :  { %v475_v28 = vmax.f32 %v398_v22, 0.0  ;;  %v489_v60 = vmax.f32 %v433_v54, 0.0 }
  0xb4   :  { %v448_v29 = vmax.f32 %v331_v25, 0.0  ;;  %v462_v30 = vmax.f32 %v366_v26, 0.0 }
  0xb5   :  { %v524_v32 = vpack.c.bf16 %v475_v28, %v475_v28  ;;  %v538_v0 = vpack.c.bf16 %v489_v60, %v489_v60 }
  0xb6   :  { %v497_v33 = vpack.c.bf16 %v448_v29, %v448_v29  ;;  %v511_v35 = vpack.c.bf16 %v462_v30, %v462_v30 }
  0xb7   :  { %574 = vst.msk [vmem:[%s1190_s3 + $0x7c] sm:$0xf] %vm542_vm3, %v524_v32 }
  0xb8   :  { %547 = vst.msk [vmem:[%s1190_s3 + $0x10] sm:$0xf] %vm542_vm3, %v497_v33  ;;  %v400_v37 = vpop.f32.mrf.mxu2  ;;  %v435_v4 = vpop.f32.mrf.mxu3 }
  0xb9   :  { %561 = vst.msk [vmem:[%s1190_s3 + $0x48] sm:$0xf] %vm542_vm3, %v511_v35  ;;  %v401_v38 = vadd.f32 %v940_v34, %v400_v37  ;;  %v332_v39 = vpop.f32.mrf.mxu0  ;;  %v367_v40 = vpop.f32.mrf.mxu1  ;;  %v436_v9 = vadd.f32 %v940_v34, %v435_v4 }
  0xba   :  { %v333_v42 = vadd.f32 %v940_v34, %v332_v39  ;;  %v368_v43 = vadd.f32 %v940_v34, %v367_v40  ;;  %588 = vst.msk [vmem:[%s1190_s3 + $0xb4] sm:$0xf] %vm542_vm3, %v538_v0 }
  0xbb   :  { %v476_v44 = vmax.f32 %v401_v38, 0.0  ;;  %v490_v13 = vmax.f32 %v436_v9, 0.0 }
  0xbc   :  { %v449_v46 = vmax.f32 %v333_v42, 0.0  ;;  %v463_v47 = vmax.f32 %v368_v43, 0.0 }
  0xbd   :  { %v525_v48 = vpack.c.bf16 %v476_v44, %v476_v44  ;;  %v539_v19 = vpack.c.bf16 %v490_v13, %v490_v13 }
  0xbe   :  { %v498_v49 = vpack.c.bf16 %v449_v46, %v449_v46  ;;  %v512_v50 = vpack.c.bf16 %v463_v47, %v463_v47 }
  0xbf   :  { %575 = vst.msk [vmem:[%s1190_s3 + $0x80] sm:$0xf] %vm542_vm3, %v525_v48 }
  0xc0   :  { %548 = vst.msk [vmem:[%s1190_s3 + $0x14] sm:$0xf] %vm542_vm3, %v498_v49  ;;  %v402_v53 = vpop.f32.mrf.mxu2  ;;  %v437_v20 = vpop.f32.mrf.mxu3 }
  0xc1   :  { %562 = vst.msk [vmem:[%s1190_s3 + $0x4c] sm:$0xf] %vm542_vm3, %v512_v50  ;;  %v403_v55 = vadd.f32 %v940_v34, %v402_v53  ;;  %v335_v56 = vpop.f32.mrf.mxu0  ;;  %v370_v57 = vpop.f32.mrf.mxu1  ;;  %v438_v22 = vadd.f32 %v940_v34, %v437_v20 }
  0xc2   :  { %v336_v58 = vadd.f32 %v940_v34, %v335_v56  ;;  %v371_v59 = vadd.f32 %v940_v34, %v370_v57  ;;  %589 = vst.msk [vmem:[%s1190_s3 + $0xb8] sm:$0xf] %vm542_vm3, %v539_v19 }
  0xc3   :  { %v477_v61 = vmax.f32 %v403_v55, 0.0  ;;  %v491_v28 = vmax.f32 %v438_v22, 0.0 }
  0xc4   :  { %v450_v62 = vmax.f32 %v336_v58, 0.0  ;;  %v464_v63 = vmax.f32 %v371_v59, 0.0 }
  0xc5   :  { %v526_v1 = vpack.c.bf16 %v477_v61, %v477_v61  ;;  %v540_v32 = vpack.c.bf16 %v491_v28, %v491_v28 }
  0xc6   :  { %v499_v2 = vpack.c.bf16 %v450_v62, %v450_v62  ;;  %v513_v3 = vpack.c.bf16 %v464_v63, %v464_v63 }
  0xc7   :  { %576 = vst.msk [vmem:[%s1190_s3 + $0x84] sm:$0xf] %vm542_vm3, %v526_v1 }
  0xc8   :  { %549 = vst.msk [vmem:[%s1190_s3 + $0x18] sm:$0xf] %vm542_vm3, %v499_v2  ;;  %v405_v5 = vpop.f32.mrf.mxu2  ;;  %v440_v37 = vpop.f32.mrf.mxu3 }
  0xc9   :  { %563 = vst.msk [vmem:[%s1190_s3 + $0x50] sm:$0xf] %vm542_vm3, %v513_v3  ;;  %v406_v6 = vadd.f32 %v940_v34, %v405_v5  ;;  %v337_v7 = vpop.f32.mrf.mxu0  ;;  %v372_v8 = vpop.f32.mrf.mxu1  ;;  %v441_v42 = vadd.f32 %v940_v34, %v440_v37 }
  0xca   :  { %v338_v10 = vadd.f32 %v940_v34, %v337_v7  ;;  %v373_v11 = vadd.f32 %v940_v34, %v372_v8  ;;  %590 = vst.msk [vmem:[%s1190_s3 + $0xbc] sm:$0xf] %vm542_vm3, %v540_v32 }
  0xcb   :  { %v478_v12 = vmax.f32 %v406_v6, 0.0  ;;  %v492_v46 = vmax.f32 %v441_v42, 0.0 }
  0xcc   :  { %v451_v14 = vmax.f32 %v338_v10, 0.0  ;;  %v465_v15 = vmax.f32 %v373_v11, 0.0 }
  0xcd   :  { %v527_v16 = vpack.c.bf16 %v478_v12, %v478_v12  ;;  %v541_v52 = vpack.c.bf16 %v492_v46, %v492_v46 }
  0xce   :  { %v500_v17 = vpack.c.bf16 %v451_v14, %v451_v14  ;;  %v514_v18 = vpack.c.bf16 %v465_v15, %v465_v15 }
  0xcf   :  { %577 = vst.msk [vmem:[%s1190_s3 + $0x88] sm:$0xf] %vm542_vm3, %v527_v16 }
  0xd0   :  { %550 = vst.msk [vmem:[%s1190_s3 + $0x1c] sm:$0xf] %vm542_vm3, %v500_v17  ;;  %v407_v21 = vpop.f32.mrf.mxu2  ;;  %v442_v53 = vpop.f32.mrf.mxu3 }
  0xd1   :  { %564 = vst.msk [vmem:[%s1190_s3 + $0x54] sm:$0xf] %vm542_vm3, %v514_v18  ;;  %v408_v23 = vadd.f32 %v940_v34, %v407_v21  ;;  %v340_v24 = vpop.f32.mrf.mxu0  ;;  %v375_v25 = vpop.f32.mrf.mxu1 }
  0xd2   :  { %v341_v26 = vadd.f32 %v940_v34, %v340_v24  ;;  %v376_v27 = vadd.f32 %v940_v34, %v375_v25  ;;  %591 = vst.msk [vmem:[%s1190_s3 + $0xc0] sm:$0xf] %vm542_vm3, %v541_v52 }
  0xd3   :  { %v479_v29 = vmax.f32 %v408_v23, 0.0 }
  0xd4   :  { %v452_v30 = vmax.f32 %v341_v26, 0.0  ;;  %v466_v31 = vmax.f32 %v376_v27, 0.0 }
  0xd5   :  { %v528_v33 = vpack.c.bf16 %v479_v29, %v479_v29 }
  0xd6   :  { %v501_v35 = vpack.c.bf16 %v452_v30, %v452_v30  ;;  %v515_v36 = vpack.c.bf16 %v466_v31, %v466_v31 }
  0xd7   :  { %578 = vst.msk [vmem:[%s1190_s3 + $0x8c] sm:$0xf] %vm542_vm3, %v528_v33 }
  0xd8   :  { %551 = vst.msk [vmem:[%s1190_s3 + $0x20] sm:$0xf] %vm542_vm3, %v501_v35  ;;  %v410_v38 = vpop.f32.mrf.mxu2 }
  0xd9   :  { %565 = vst.msk [vmem:[%s1190_s3 + $0x58] sm:$0xf] %vm542_vm3, %v515_v36  ;;  %v411_v39 = vadd.f32 %v940_v34, %v410_v38  ;;  %v342_v40 = vpop.f32.mrf.mxu0  ;;  %v377_v41 = vpop.f32.mrf.mxu1 }
  0xda   :  { %v343_v43 = vadd.f32 %v940_v34, %v342_v40  ;;  %v378_v44 = vadd.f32 %v940_v34, %v377_v41 }
  0xdb   :  { %v480_v45 = vmax.f32 %v411_v39, 0.0 }
  0xdc   :  { %v453_v47 = vmax.f32 %v343_v43, 0.0  ;;  %v467_v48 = vmax.f32 %v378_v44, 0.0 }
  0xdd   :  { %v529_v49 = vpack.c.bf16 %v480_v45, %v480_v45 }
  0xde   :  { %v502_v50 = vpack.c.bf16 %v453_v47, %v453_v47  ;;  %v516_v51 = vpack.c.bf16 %v467_v48, %v467_v48 }
  0xdf   :  { %579 = vst.msk [vmem:[%s1190_s3 + $0x90] sm:$0xf] %vm542_vm3, %v529_v49 }
  0xe0   :  { %552 = vst.msk [vmem:[%s1190_s3 + $0x24] sm:$0xf] %vm542_vm3, %v502_v50  ;;  %v412_v54 = vpop.f32.mrf.mxu2 }
  0xe1   :  { %566 = vst.msk [vmem:[%s1190_s3 + $0x5c] sm:$0xf] %vm542_vm3, %v516_v51  ;;  %v413_v55 = vadd.f32 %v940_v34, %v412_v54  ;;  %v345_v56 = vpop.f32.mrf.mxu0  ;;  %v380_v57 = vpop.f32.mrf.mxu1 }
  0xe2   :  { %v346_v58 = vadd.f32 %v940_v34, %v345_v56  ;;  %v381_v59 = vadd.f32 %v940_v34, %v380_v57 }
  0xe3   :  { %v481_v60 = vmax.f32 %v413_v55, 0.0 }
  0xe4   :  { %v454_v61 = vmax.f32 %v346_v58, 0.0  ;;  %v468_v62 = vmax.f32 %v381_v59, 0.0 }
  0xe5   :  { %v530_v63 = vpack.c.bf16 %v481_v60, %v481_v60 }
  0xe6   :  { %v503_v0 = vpack.c.bf16 %v454_v61, %v454_v61  ;;  %v517_v1 = vpack.c.bf16 %v468_v62, %v468_v62 }
  0xe7   :  { %580 = vst.msk [vmem:[%s1190_s3 + $0x94] sm:$0xf] %vm542_vm3, %v530_v63 }
  0xe8   :  { %553 = vst.msk [vmem:[%s1190_s3 + $0x28] sm:$0xf] %vm542_vm3, %v503_v0  ;;  %v415_v2 = vpop.f32.mrf.mxu2 }
  0xe9   :  { %567 = vst.msk [vmem:[%s1190_s3 + $0x60] sm:$0xf] %vm542_vm3, %v517_v1  ;;  %v416_v3 = vadd.f32 %v940_v34, %v415_v2  ;;  %v347_v4 = vpop.f32.mrf.mxu0  ;;  %v382_v5 = vpop.f32.mrf.mxu1 }
  0xea   :  { %v348_v6 = vadd.f32 %v940_v34, %v347_v4  ;;  %v383_v7 = vadd.f32 %v940_v34, %v382_v5 }
  0xeb   :  { %v482_v8 = vmax.f32 %v416_v3, 0.0 }
  0xec   :  { %v455_v9 = vmax.f32 %v348_v6, 0.0  ;;  %v469_v10 = vmax.f32 %v383_v7, 0.0 }
  0xed   :  { %v531_v11 = vpack.c.bf16 %v482_v8, %v482_v8 }
  0xee   :  { %v504_v12 = vpack.c.bf16 %v455_v9, %v455_v9  ;;  %v518_v13 = vpack.c.bf16 %v469_v10, %v469_v10 }
  0xef   :  { %581 = vst.msk [vmem:[%s1190_s3 + $0x98] sm:$0xf] %vm542_vm3, %v531_v11 }
  0xf0   :  { %554 = vst.msk [vmem:[%s1190_s3 + $0x2c] sm:$0xf] %vm542_vm3, %v504_v12  ;;  %v417_v14 = vpop.f32.mrf.mxu2 }
  0xf1   :  { %568 = vst.msk [vmem:[%s1190_s3 + $0x64] sm:$0xf] %vm542_vm3, %v518_v13  ;;  %v418_v15 = vadd.f32 %v940_v34, %v417_v14  ;;  %v350_v16 = vpop.f32.mrf.mxu0  ;;  %v385_v17 = vpop.f32.mrf.mxu1 }
  0xf2   :  { %v351_v18 = vadd.f32 %v940_v34, %v350_v16  ;;  %v386_v19 = vadd.f32 %v940_v34, %v385_v17 }
  0xf3   :  { %v483_v20 = vmax.f32 %v418_v15, 0.0 }
  0xf4   :  { %v456_v21 = vmax.f32 %v351_v18, 0.0  ;;  %v470_v22 = vmax.f32 %v386_v19, 0.0 }
  0xf5   :  { %v532_v23 = vpack.c.bf16 %v483_v20, %v483_v20 }
  0xf6   :  { %v505_v24 = vpack.c.bf16 %v456_v21, %v456_v21  ;;  %v519_v25 = vpack.c.bf16 %v470_v22, %v470_v22 }
  0xf7   :  { %582 = vst.msk [vmem:[%s1190_s3 + $0x9c] sm:$0xf] %vm542_vm3, %v532_v23 }
  0xf8   :  { %555 = vst.msk [vmem:[%s1190_s3 + $0x30] sm:$0xf] %vm542_vm3, %v505_v24  ;;  %v420_v26 = vpop.f32.mrf.mxu2 }
  0xf9   :  { %569 = vst.msk [vmem:[%s1190_s3 + $0x68] sm:$0xf] %vm542_vm3, %v519_v25  ;;  %v421_v27 = vadd.f32 %v940_v34, %v420_v26  ;;  %v352_v28 = vpop.f32.mrf.mxu0  ;;  %v387_v29 = vpop.f32.mrf.mxu1 }
  0xfa   :  { %v353_v30 = vadd.f32 %v940_v34, %v352_v28  ;;  %v388_v31 = vadd.f32 %v940_v34, %v387_v29 }
  0xfb   :  { %v484_v32 = vmax.f32 %v421_v27, 0.0 }
  0xfc   :  { %v457_v33 = vmax.f32 %v353_v30, 0.0  ;;  %v471_v35 = vmax.f32 %v388_v31, 0.0 }
  0xfd   :  { %v533_v36 = vpack.c.bf16 %v484_v32, %v484_v32 }
  0xfe   :  { %v506_v37 = vpack.c.bf16 %v457_v33, %v457_v33  ;;  %v520_v38 = vpack.c.bf16 %v471_v35, %v471_v35 }
  0xff   :  { %583 = vst.msk [vmem:[%s1190_s3 + $0xa0] sm:$0xf] %vm542_vm3, %v533_v36 }
 0x100   :  { %556 = vst.msk [vmem:[%s1190_s3 + $0x34] sm:$0xf] %vm542_vm3, %v506_v37  ;;  %v422_v39 = vpop.f32.mrf.mxu2 }
 0x101   :  { %570 = vst.msk [vmem:[%s1190_s3 + $0x6c] sm:$0xf] %vm542_vm3, %v520_v38  ;;  %v423_v40 = vadd.f32 %v940_v34, %v422_v39 }
 0x103   :  { %v485_v41 = vmax.f32 %v423_v40, 0.0 }
 0x105   :  { %v534_v42 = vpack.c.bf16 %v485_v41, %v485_v41 }
 0x107   :  { %584 = vst.msk [vmem:[%s1190_s3 + $0xa4] sm:$0xf] %vm542_vm3, %v534_v42 }
 0x108   :  { %596 = vsyncpa [#allocation3], 1 }
 0x109   :  { %597 = vsyncpa [#allocation5], 1 }

// kernel: vae_forward.6
= control target key start
LH: loop header
LB: loop body
LE: loop exit
PB: predicated region body
PF: predicated region fallthrough
CT: control target
= control target key end

     0   :  { %vm289_vm0 = vcmask 261120   ;;  %vm453_vm1 = vcmask 523264   ;;  %vm466_vm2 = vcmask 517120   ;;  %s946_s1 = inlined_call_operand.vmem [shape: bf16[288,64], index: 1, kind: input, shape index: {}]   ;;  %s947_s0 = inlined_call_operand.vmem [shape: bf16[98,288], index: 0, kind: input, shape index: {}]   ;;  %s948_s2 = inlined_call_operand.vmem [shape: f32[1,64], index: 2, kind: input, shape index: {}]   ;;  %s949_s3 = inlined_call_operand.vmem [shape: f32[98,64], index: 3, kind: output, shape index: {}]  }
   0x1   :  { %v648_v0 = vld [vmem:[%s946_s1 + $0x38] sm:$0xff]  ;;  %v658_v2 = vld [vmem:[%s946_s1 + $0x88] sm:$0xff]  ;;  %v647_v3 = vld [vmem:[%s946_s1 + $0x30] sm:$0xff] }
   0x2   :  { %v656_v1 = vld [vmem:[%s946_s1 + $0x78] sm:$0xff]  ;;  %311 = vmatpush.bf16.msra.mxu0 %v648_v0  ;;  %659 = vmatpush.bf16.msra.mxu3 %v648_v0  ;;  %v655_v4 = vld [vmem:[%s946_s1 + $0x70] sm:$0xff]  ;;  %v657_v5 = vld [vmem:[%s946_s1 + $0x80] sm:$0xff] }
   0x3   :  { %354 = vmatpush.bf16.msra.mxu1 %v656_v1  ;;  %403 = vmatpush.bf16.msra.mxu2 %v658_v2  ;;  %v482_v6 = vld [vmem:[%s947_s0 + $0x8] sm:$0xf]  ;;  %v625_v7 = vld [vmem:[%s947_s0 + $0x10] sm:$0xf0]  ;;  %v645_v11 = vld [vmem:[%s946_s1 + $0x20] sm:$0xff] }
   0x4   :  { %v483_v8 = vor.u32 %v625_v7, %v482_v6  ;;  %v646_v9 = vld [vmem:[%s946_s1 + $0x28] sm:$0xff]  ;;  %v653_v12 = vld [vmem:[%s946_s1 + $0x60] sm:$0xff]  ;;  %v644_v13 = vld [vmem:[%s946_s1 + $0x18] sm:$0xff] }
   0x5   :  { %v654_v10 = vld [vmem:[%s946_s1 + $0x68] sm:$0xff]  ;;  %v652_v14 = vld [vmem:[%s946_s1 + $0x58] sm:$0xff]  ;;  %v643_v15 = vld [vmem:[%s946_s1 + $0x10] sm:$0xff] }
   0x6   :  { %312 = vmatpush.bf16.msra.mxu0 %v647_v3  ;;  %660 = vmatpush.bf16.msra.mxu3 %v647_v3  ;;  %v651_v16 = vld [vmem:[%s946_s1 + $0x50] sm:$0xff]  ;;  %v494_v17 = vld [vmem:[%s947_s0 + $0x20] sm:$0xf]  ;;  %v628_v18 = vld [vmem:[%s947_s0 + $0x28] sm:$0xf0] }
   0x7   :  { %355 = vmatpush.bf16.msra.mxu1 %v655_v4  ;;  %404 = vmatpush.bf16.msra.mxu2 %v657_v5  ;;  %v495_v19 = vor.u32 %v628_v18, %v494_v17  ;;  %v642_v20 = vld [vmem:[%s946_s1 + $0x8] sm:$0xff]  ;;  %v641_v22 = vld [vmem:[%s946_s1] sm:$0xff]  ;;  %v534_v26 = vld [vmem:[%s947_s0 + $0x78] sm:$0xf] }
   0x8   :  { %v650_v21 = vld [vmem:[%s946_s1 + $0x48] sm:$0xff]  ;;  %v649_v23 = vld [vmem:[%s946_s1 + $0x40] sm:$0xff]  ;;  %v476_v29 = vld [vmem:[%s947_s0 + $0xc] sm:$0xf0] }
   0x9   :  { %v474_v24 = vld [vmem:[%s947_s0] sm:$0xf]  ;;  %v624_v25 = vld [vmem:[%s947_s0 + $0x8] sm:$0xf0]  ;;  %v639_v27 = vld [vmem:[%s947_s0 + $0x80] sm:$0xf0] }
   0xa   :  { %616 = vmatmul.msk.bf16.vlgmr.msra.gmra.mxu2 %vm289_vm0, %v483_v8  ;;  %313 = vmatpush.bf16.msra.mxu0 %v646_v9  ;;  %v623_v28 = vld [vmem:[%s947_s0 + $0x4] sm:$0xf]  ;;  %v475_v30 = vor.u32 %v624_v25, %v474_v24  ;;  %v535_v31 = vor.u32 %v639_v27, %v534_v26  ;;  %v506_v33 = vld [vmem:[%s947_s0 + $0x38] sm:$0xf]  ;;  %v39_v36 = vld [vmem:[%s947_s0 + $0x90] sm:$0x11] }
   0xb   :  { %661 = vmatpush.bf16.msra.mxu3 %v646_v9  ;;  %356 = vmatpush.bf16.msra.mxu1 %v654_v10  ;;  %v479_v32 = vor.u32 %v623_v28, %v476_v29  ;;  %v631_v34 = vld [vmem:[%s947_s0 + $0x40] sm:$0xf0]  ;;  %v486_v37 = vld [vmem:[%s947_s0 + $0x18] sm:$0xf]  ;;  %v143_v39 = vunpack.c.l.b16 %v39_v36  ;;  %v626_v40 = vld [vmem:[%s947_s0 + $0x1c] sm:$0xf]  ;;  %v144_v62 = vunpack.c.h.b16 %v39_v36 }
   0xc   :  { %v507_v35 = vor.u32 %v631_v34, %v506_v33  ;;  %v627_v38 = vld [vmem:[%s947_s0 + $0x20] sm:$0xf0]  ;;  %v488_v41 = vld [vmem:[%s947_s0 + $0x24] sm:$0xf0]  ;;  %v518_v45 = vld [vmem:[%s947_s0 + $0x50] sm:$0xf] }
   0xd   :  { %v487_v42 = vor.u32 %v627_v38, %v486_v37  ;;  %v164_v43 = vpack.c.b16 %v143_v39, %v143_v39  ;;  %v491_v44 = vor.u32 %v626_v40, %v488_v41  ;;  %v634_v46 = vld [vmem:[%s947_s0 + $0x58] sm:$0xf0]  ;;  %v498_v48 = vld [vmem:[%s947_s0 + $0x30] sm:$0xf]  ;;  %v629_v50 = vld [vmem:[%s947_s0 + $0x34] sm:$0xf]  ;;  %v165_v3 = vpack.c.b16 %v144_v62, %v144_v62 }
   0xe   :  { %314 = vmatpush.bf16.msra.mxu0 %v645_v11  ;;  %v519_v47 = vor.u32 %v634_v46, %v518_v45  ;;  %v630_v49 = vld [vmem:[%s947_s0 + $0x38] sm:$0xf0]  ;;  %v500_v51 = vld [vmem:[%s947_s0 + $0x3c] sm:$0xf0]  ;;  %v536_v53 = vld [vmem:[%s947_s0 + $0x84] sm:$0xf0] }
   0xf   :  { %662 = vmatpush.bf16.msra.mxu3 %v645_v11  ;;  %357 = vmatpush.bf16.msra.mxu1 %v653_v12  ;;  %v638_v52 = vld [vmem:[%s947_s0 + $0x7c] sm:$0xf]  ;;  %v499_v54 = vor.u32 %v630_v49, %v498_v48  ;;  %v503_v55 = vor.u32 %v629_v50, %v500_v51  ;;  %v530_v57 = vld [vmem:[%s947_s0 + $0x68] sm:$0xf]  ;;  %v637_v58 = vld [vmem:[%s947_s0 + $0x70] sm:$0xf0] }
  0x10   :  { %v539_v56 = vor.u32 %v638_v52, %v536_v53  ;;  %v531_v59 = vor.u32 %v637_v58, %v530_v57  ;;  %v510_v60 = vld [vmem:[%s947_s0 + $0x48] sm:$0xf]  ;;  %v633_v61 = vld [vmem:[%s947_s0 + $0x50] sm:$0xf0]  ;;  %v632_v63 = vld [vmem:[%s947_s0 + $0x4c] sm:$0xf] }
  0x11   :  { %v512_v0 = vld [vmem:[%s947_s0 + $0x54] sm:$0xf0]  ;;  %v640_v5 = vld [vmem:[%s947_s0 + $0x88] sm:$0xf0]  ;;  %v522_v7 = vld [vmem:[%s947_s0 + $0x60] sm:$0xf] }
  0x12   :  { %315 = vmatpush.bf16.msra.mxu0 %v644_v13  ;;  %v515_v2 = vor.u32 %v632_v63, %v512_v0  ;;  %v636_v8 = vld [vmem:[%s947_s0 + $0x68] sm:$0xf0]  ;;  %v635_v9 = vld [vmem:[%s947_s0 + $0x64] sm:$0xf]  ;;  %v874_v18 = vld [vmem:[%s948_s2] ss:$0 sm:$0xff] }
  0x13   :  { %663 = vmatpush.bf16.msra.mxu3 %v644_v13  ;;  %358 = vmatpush.bf16.msra.mxu1 %v652_v14  ;;  %v523_v11 = vor.u32 %v636_v8, %v522_v7  ;;  %v40_v13 = vld [vmem:[%s947_s0 + $0x98] sm:$0x1] }
  0x16   :  { %316 = vmatpush.bf16.msra.mxu0 %v643_v15 }
  0x17   :  { %664 = vmatpush.bf16.msra.mxu3 %v643_v15  ;;  %359 = vmatpush.bf16.msra.mxu1 %v651_v16 }
  0x1a   :  { %617 = vmatmul.msk.bf16.gmra.mxu2 %vm289_vm0, %v495_v19  ;;  %317 = vmatpush.bf16.msra.mxu0 %v642_v20 }
  0x1b   :  { %665 = vmatpush.bf16.msra.mxu3 %v642_v20  ;;  %360 = vmatpush.bf16.msra.mxu1 %v650_v21 }
  0x1e   :  { %318 = vmatpush.bf16.msra.mxu0 %v641_v22 }
  0x1f   :  { %666 = vmatpush.bf16.msra.mxu3 %v641_v22  ;;  %361 = vmatpush.bf16.msra.mxu1 %v649_v23 }
  0x21   :  { %319 = vmatmul.bf16.vlgmr.msra.gmra.mxu0 %v475_v30 }
  0x22   :  { %344 = vmatmul.bf16.vlgmr.msra.gmra.mxu3 %v535_v31  ;;  %362 = vmatmul.bf16.vlgmr.msra.gmra.mxu1 %v479_v32 }
  0x23   :  { %667 = vmatpush.bf16.msrb.mxu3 %v656_v1  ;;  %v511_v1 = vor.u32 %v633_v61, %v510_v60 }
  0x27   :  { %668 = vmatpush.bf16.msrb.mxu3 %v655_v4  ;;  %v542_v4 = vld [vmem:[%s947_s0 + $0x80] sm:$0xf] }
  0x28   :  { %v543_v6 = vor.u32 %v640_v5, %v542_v4 }
  0x2a   :  { %618 = vmatmul.msk.bf16.gmra.mxu2 %vm289_vm0, %v507_v35 }
  0x2b   :  { %669 = vmatpush.bf16.msrb.mxu3 %v654_v10  ;;  %v524_v10 = vld [vmem:[%s947_s0 + $0x6c] sm:$0xf0] }
  0x2f   :  { %670 = vmatpush.bf16.msrb.mxu3 %v653_v12  ;;  %v527_v12 = vor.u32 %v635_v9, %v524_v10 }
  0x31   :  { %324 = vmatmul.bf16.gmra.mxu0 %v487_v42 }
  0x32   :  { %349 = vmatmul.bf16.gmra.mxu3 %v164_v43  ;;  %367 = vmatmul.bf16.gmra.mxu1 %v491_v44 }
  0x33   :  { %671 = vmatpush.bf16.msrb.mxu3 %v652_v14  ;;  %v145_v14 = vunpack.c.l.b16 %v40_v13 }
  0x35   :  { %v166_v15 = vpack.c.b16 %v145_v14, %v145_v14 }
  0x37   :  { %672 = vmatpush.bf16.msrb.mxu3 %v651_v16 }
  0x3a   :  { %619 = vmatmul.msk.bf16.gmra.mxu2 %vm289_vm0, %v519_v47 }
  0x3b   :  { %673 = vmatpush.bf16.msrb.mxu3 %v650_v21 }
  0x3f   :  { %674 = vmatpush.bf16.msrb.mxu3 %v649_v23 }
  0x41   :  { %329 = vmatmul.bf16.gmra.mxu0 %v499_v54 }
  0x42   :  { %372 = vmatmul.bf16.gmra.mxu1 %v503_v55  ;;  %387 = vmatmul.bf16.vlgmr.msrb.gmra.mxu3 %v539_v56 }
  0x4a   :  { %620 = vmatmul.msk.bf16.gmra.mxu2 %vm289_vm0, %v531_v59 }
  0x51   :  { %334 = vmatmul.bf16.gmra.mxu0 %v511_v1 }
  0x52   :  { %377 = vmatmul.bf16.gmra.mxu1 %v515_v2  ;;  %392 = vmatmul.bf16.gmra.mxu3 %v165_v3 }
  0x5a   :  { %621 = vmatmul.msk.bf16.gmra.mxu2 %vm289_vm0, %v543_v6 }
  0x61   :  { %339 = vmatmul.bf16.gmra.mxu0 %v523_v11 }
  0x62   :  { %382 = vmatmul.bf16.gmra.mxu1 %v527_v12 }
  0x6a   :  { %622 = vmatmul.msk.bf16.gmra.mxu2 %vm289_vm0, %v166_v15 }
  0x8d   :  { %v406_v16 = vpop.f32.mrf.mxu2 }
  0x95   :  { %v408_v17 = vpop.f32.mrf.mxu2 }
  0x9d   :  { %v411_v19 = vpop.f32.mrf.mxu2 }
  0x9e   :  { %v320_v20 = vpop.f32.mrf.mxu0 }
  0x9f   :  { %v321_v21 = vadd.f32 %v874_v18, %v320_v20  ;;  %v363_v22 = vpop.f32.mrf.mxu1 }
  0xa1   :  { %v364_v23 = vadd.f32 %v363_v22, %v321_v21 }
  0xa3   :  { %v407_v24 = vadd.f32 %v406_v16, %v364_v23 }
  0xa5   :  { %v440_v25 = vmax.f32 %v407_v24, 0.0  ;;  %v345_v26 = vpop.f32.mrf.mxu3  ;;  %v413_v27 = vpop.f32.mrf.mxu2 }
  0xa6   :  { %v322_v28 = vpop.f32.mrf.mxu0  ;;  %v346_v16 = vadd.f32 %v874_v18, %v345_v26 }
  0xa7   :  { %454 = vst.msk [vmem:[%s949_s3] sm:$0xff] %vm453_vm1, %v440_v25  ;;  %v323_v29 = vadd.f32 %v874_v18, %v322_v28  ;;  %v365_v30 = vpop.f32.mrf.mxu1 }
  0xa9   :  { %v366_v31 = vadd.f32 %v365_v30, %v323_v29 }
  0xab   :  { %v409_v32 = vadd.f32 %v408_v17, %v366_v31 }
  0xad   :  { %v441_v33 = vmax.f32 %v409_v32, 0.0  ;;  %v882_v34 = vpop.f32.mrf.mxu3  ;;  %v416_v35 = vpop.f32.mrf.mxu2 }
  0xae   :  { %v325_v36 = vpop.f32.mrf.mxu0  ;;  %v348_v26 = vadd.f32 %v874_v18, %v882_v34 }
  0xaf   :  { %455 = vst.msk [vmem:[%s949_s3 + $0x8] sm:$0xff] %vm453_vm1, %v441_v33  ;;  %v326_v37 = vadd.f32 %v874_v18, %v325_v36  ;;  %v368_v38 = vpop.f32.mrf.mxu1 }
  0xb1   :  { %v369_v39 = vadd.f32 %v368_v38, %v326_v37 }
  0xb3   :  { %v412_v40 = vadd.f32 %v411_v19, %v369_v39 }
  0xb5   :  { %v442_v41 = vmax.f32 %v412_v40, 0.0  ;;  %v889_v42 = vpop.f32.mrf.mxu3  ;;  %v418_v43 = vpop.f32.mrf.mxu2 }
  0xb6   :  { %v327_v44 = vpop.f32.mrf.mxu0  ;;  %v351_v40 = vadd.f32 %v874_v18, %v889_v42 }
  0xb7   :  { %456 = vst.msk [vmem:[%s949_s3 + $0x10] sm:$0xff] %vm453_vm1, %v442_v41  ;;  %v328_v45 = vadd.f32 %v874_v18, %v327_v44  ;;  %v370_v46 = vpop.f32.mrf.mxu1 }
  0xb9   :  { %v371_v47 = vadd.f32 %v370_v46, %v328_v45 }
  0xbb   :  { %v414_v48 = vadd.f32 %v413_v27, %v371_v47 }
  0xbd   :  { %v443_v49 = vmax.f32 %v414_v48, 0.0  ;;  %v352_v50 = vpop.f32.mrf.mxu3  ;;  %v421_v51 = vpop.f32.mrf.mxu2 }
  0xbe   :  { %v330_v52 = vpop.f32.mrf.mxu0 }
  0xbf   :  { %457 = vst.msk [vmem:[%s949_s3 + $0x18] sm:$0xff] %vm453_vm1, %v443_v49  ;;  %v331_v53 = vadd.f32 %v874_v18, %v330_v52  ;;  %v373_v54 = vpop.f32.mrf.mxu1 }
  0xc1   :  { %v374_v55 = vadd.f32 %v373_v54, %v331_v53 }
  0xc3   :  { %v417_v56 = vadd.f32 %v416_v35, %v374_v55 }
  0xc5   :  { %v444_v57 = vmax.f32 %v417_v56, 0.0  ;;  %v388_v58 = vpop.f32.mrf.mxu3  ;;  %v423_v59 = vpop.f32.mrf.mxu2 }
  0xc6   :  { %v332_v60 = vpop.f32.mrf.mxu0  ;;  %v389_v19 = vadd.f32 %v388_v58, %v346_v16 }
  0xc7   :  { %458 = vst.msk [vmem:[%s949_s3 + $0x20] sm:$0xff] %vm453_vm1, %v444_v57  ;;  %v333_v61 = vadd.f32 %v874_v18, %v332_v60  ;;  %v375_v62 = vpop.f32.mrf.mxu1 }
  0xc9   :  { %v376_v63 = vadd.f32 %v375_v62, %v333_v61 }
  0xcb   :  { %v419_v0 = vadd.f32 %v418_v43, %v376_v63 }
  0xcd   :  { %v445_v1 = vmax.f32 %v419_v0, 0.0  ;;  %v390_v2 = vpop.f32.mrf.mxu3  ;;  %v426_v3 = vpop.f32.mrf.mxu2 }
  0xce   :  { %v335_v4 = vpop.f32.mrf.mxu0  ;;  %v391_v31 = vadd.f32 %v390_v2, %v348_v26 }
  0xcf   :  { %459 = vst.msk [vmem:[%s949_s3 + $0x28] sm:$0xff] %vm453_vm1, %v445_v1  ;;  %v336_v5 = vadd.f32 %v874_v18, %v335_v4  ;;  %v378_v6 = vpop.f32.mrf.mxu1 }
  0xd1   :  { %v379_v7 = vadd.f32 %v378_v6, %v336_v5 }
  0xd3   :  { %v422_v8 = vadd.f32 %v421_v51, %v379_v7 }
  0xd5   :  { %v446_v9 = vmax.f32 %v422_v8, 0.0  ;;  %v393_v10 = vpop.f32.mrf.mxu3  ;;  %v428_v11 = vpop.f32.mrf.mxu2 }
  0xd6   :  { %v337_v12 = vpop.f32.mrf.mxu0  ;;  %v394_v43 = vadd.f32 %v393_v10, %v351_v40 }
  0xd7   :  { %460 = vst.msk [vmem:[%s949_s3 + $0x30] sm:$0xff] %vm453_vm1, %v446_v9  ;;  %v338_v13 = vadd.f32 %v874_v18, %v337_v12  ;;  %v380_v14 = vpop.f32.mrf.mxu1 }
  0xd9   :  { %v381_v15 = vadd.f32 %v380_v14, %v338_v13 }
  0xdb   :  { %v424_v17 = vadd.f32 %v423_v59, %v381_v15 }
  0xdd   :  { %v447_v20 = vmax.f32 %v424_v17, 0.0  ;;  %v431_v21 = vpop.f32.mrf.mxu2  ;;  %v395_v22 = vpop.f32.mrf.mxu3 }
  0xde   :  { %v432_v23 = vadd.f32 %v431_v21, %v389_v19  ;;  %v340_v24 = vpop.f32.mrf.mxu0 }
  0xdf   :  { %461 = vst.msk [vmem:[%s949_s3 + $0x38] sm:$0xff] %vm453_vm1, %v447_v20  ;;  %v341_v25 = vadd.f32 %v874_v18, %v340_v24  ;;  %v383_v27 = vpop.f32.mrf.mxu1 }
  0xe0   :  { %v450_v28 = vmax.f32 %v432_v23, 0.0 }
  0xe1   :  { %v384_v29 = vadd.f32 %v383_v27, %v341_v25 }
  0xe2   :  { %464 = vst.msk [vmem:[%s949_s3 + $0x50] sm:$0xff] %vm453_vm1, %v450_v28 }
  0xe3   :  { %v427_v30 = vadd.f32 %v426_v3, %v384_v29 }
  0xe5   :  { %v448_v32 = vmax.f32 %v427_v30, 0.0  ;;  %v433_v33 = vpop.f32.mrf.mxu2 }
  0xe6   :  { %v434_v35 = vadd.f32 %v433_v33, %v391_v31  ;;  %v342_v36 = vpop.f32.mrf.mxu0 }
  0xe7   :  { %462 = vst.msk [vmem:[%s949_s3 + $0x40] sm:$0xff] %vm453_vm1, %v448_v32  ;;  %v343_v37 = vadd.f32 %v874_v18, %v342_v36  ;;  %v385_v34 = vpop.f32.mrf.mxu1 }
  0xe8   :  { %v451_v38 = vmax.f32 %v434_v35, 0.0 }
  0xe9   :  { %v386_v39 = vadd.f32 %v385_v34, %v343_v37 }
  0xea   :  { %465 = vst.msk [vmem:[%s949_s3 + $0x58] sm:$0xff] %vm453_vm1, %v451_v38 }
  0xeb   :  { %v429_v41 = vadd.f32 %v428_v11, %v386_v39 }
  0xed   :  { %v449_v44 = vmax.f32 %v429_v41, 0.0  ;;  %v436_v45 = vpop.f32.mrf.mxu2 }
  0xee   :  { %v437_v46 = vadd.f32 %v436_v45, %v394_v43 }
  0xef   :  { %463 = vst.msk [vmem:[%s949_s3 + $0x48] sm:$0xff] %vm453_vm1, %v449_v44 }
  0xf0   :  { %v452_v47 = vmax.f32 %v437_v46, 0.0 }
  0xf2   :  { %467 = vst.msk [vmem:[%s949_s3 + $0x60] sm:$0x3] %vm466_vm2, %v452_v47 }
  0xf5   :  { %v438_v18 = vpop.f32.mrf.mxu2 }

// kernel: vae_forward.7
= control target key start
LH: loop header
LB: loop body
LE: loop exit
PB: predicated region body
PF: predicated region fallthrough
CT: control target
= control target key end

     0   :  { %16 = vsyncpa [#allocation3], 0  ;;  %s3406_s0 = inlined_call_operand.vmem [shape: f32[2,3136], index: 0, kind: input, shape index: {}]   ;;  %s3407_s1 = inlined_call_operand.vmem [shape: f32[3136,16], index: 1, kind: input, shape index: {}]   ;;  %s3408_s2 = inlined_call_operand.vmem [shape: f32[1,16], index: 2, kind: input, shape index: {}]   ;;  %s3409_s3 = inlined_call_operand.vmem [shape: f32[16,4], index: 3, kind: input, shape index: {}]   ;;  %s3410_s4 = inlined_call_operand.vmem [shape: f32[1,4], index: 4, kind: input, shape index: {}]   ;;  %s3411_s5 = inlined_call_operand.vmem [shape: f32[2,2], index: 5, kind: input, shape index: {}]   ;;  %s3412_s6 = inlined_call_operand.vmem [shape: f32[2,3136], index: 6, kind: input, shape index: {}]   ;;  %s3413_s7 = inlined_call_operand.vmem [shape: f32[1,3136], index: 7, kind: input, shape index: {}]   ;;  %s3414_s8 = inlined_call_operand.vmem [shape: f32[2,3136], index: 8, kind: output, shape index: {0}]   ;;  %s3415_s9 = inlined_call_operand.hbm [shape: f32[2,2], index: 9, kind: output, shape index: {1}]   ;;  %s3416_s10 = inlined_call_operand.hbm [shape: f32[2,2], index: 10, kind: output, shape index: {2}]  }
   0x1   :  { %v56_v0 = vld [vmem:[%s3407_s1 + $0x78] sm:$0xff]  ;;  %v55_v2 = vld [vmem:[%s3407_s1 + $0x70] sm:$0xff]  ;;  %v54_v6 = vld [vmem:[%s3407_s1 + $0x68] sm:$0xff] }
   0x2   :  { %v88_v1 = vld [vmem:[%s3407_s1 + $0x178] sm:$0xff]  ;;  %504 = vmatpush.msra.mxu0 %v56_v0  ;;  %v87_v4 = vld [vmem:[%s3407_s1 + $0x170] sm:$0xff]  ;;  %v86_v8 = vld [vmem:[%s3407_s1 + $0x168] sm:$0xff] }
   0x3   :  { %544 = vmatpush.msra.mxu2 %v88_v1  ;;  %v72_v3 = vld [vmem:[%s3407_s1 + $0xf8] sm:$0xff]  ;;  %v71_v7 = vld [vmem:[%s3407_s1 + $0xf0] sm:$0xff]  ;;  %v70_v10 = vld [vmem:[%s3407_s1 + $0xe8] sm:$0xff] }
   0x4   :  { %v104_v5 = vld [vmem:[%s3407_s1 + $0x1f8] sm:$0xff]  ;;  %524 = vmatpush.msra.mxu1 %v72_v3  ;;  %505 = vmatpush.msra.mxu0 %v55_v2  ;;  %v103_v9 = vld [vmem:[%s3407_s1 + $0x1f0] sm:$0xff]  ;;  %v53_v11 = vld [vmem:[%s3407_s1 + $0x60] sm:$0xff] }
   0x5   :  { %564 = vmatpush.msra.mxu3 %v104_v5  ;;  %545 = vmatpush.msra.mxu2 %v87_v4  ;;  %v85_v12 = vld [vmem:[%s3407_s1 + $0x160] sm:$0xff]  ;;  %v102_v13 = vld [vmem:[%s3407_s1 + $0x1e8] sm:$0xff]  ;;  %v52_v16 = vld [vmem:[%s3407_s1 + $0x58] sm:$0xff] }
   0x6   :  { %525 = vmatpush.msra.mxu1 %v71_v7  ;;  %506 = vmatpush.msra.mxu0 %v54_v6  ;;  %v69_v14 = vld [vmem:[%s3407_s1 + $0xe0] sm:$0xff]  ;;  %v84_v17 = vld [vmem:[%s3407_s1 + $0x158] sm:$0xff]  ;;  %v51_v20 = vld [vmem:[%s3407_s1 + $0x50] sm:$0xff] }
   0x7   :  { %565 = vmatpush.msra.mxu3 %v103_v9  ;;  %546 = vmatpush.msra.mxu2 %v86_v8  ;;  %v101_v15 = vld [vmem:[%s3407_s1 + $0x1e0] sm:$0xff]  ;;  %v68_v18 = vld [vmem:[%s3407_s1 + $0xd8] sm:$0xff]  ;;  %v83_v21 = vld [vmem:[%s3407_s1 + $0x150] sm:$0xff] }
   0x8   :  { %526 = vmatpush.msra.mxu1 %v70_v10  ;;  %507 = vmatpush.msra.mxu0 %v53_v11  ;;  %v100_v19 = vld [vmem:[%s3407_s1 + $0x1d8] sm:$0xff]  ;;  %v67_v22 = vld [vmem:[%s3407_s1 + $0xd0] sm:$0xff]  ;;  %v50_v24 = vld [vmem:[%s3407_s1 + $0x48] sm:$0xff] }
   0x9   :  { %566 = vmatpush.msra.mxu3 %v102_v13  ;;  %547 = vmatpush.msra.mxu2 %v85_v12  ;;  %v99_v23 = vld [vmem:[%s3407_s1 + $0x1d0] sm:$0xff]  ;;  %v82_v25 = vld [vmem:[%s3407_s1 + $0x148] sm:$0xff]  ;;  %v49_v28 = vld [vmem:[%s3407_s1 + $0x40] sm:$0xff] }
   0xa   :  { %527 = vmatpush.msra.mxu1 %v69_v14  ;;  %508 = vmatpush.msra.mxu0 %v52_v16  ;;  %v66_v26 = vld [vmem:[%s3407_s1 + $0xc8] sm:$0xff]  ;;  %v81_v29 = vld [vmem:[%s3407_s1 + $0x140] sm:$0xff]  ;;  %v48_v32 = vld [vmem:[%s3407_s1 + $0x38] sm:$0xff] }
   0xb   :  { %567 = vmatpush.msra.mxu3 %v101_v15  ;;  %548 = vmatpush.msra.mxu2 %v84_v17  ;;  %v98_v27 = vld [vmem:[%s3407_s1 + $0x1c8] sm:$0xff]  ;;  %v65_v30 = vld [vmem:[%s3407_s1 + $0xc0] sm:$0xff]  ;;  %v80_v33 = vld [vmem:[%s3407_s1 + $0x138] sm:$0xff] }
   0xc   :  { %528 = vmatpush.msra.mxu1 %v68_v18  ;;  %509 = vmatpush.msra.mxu0 %v51_v20  ;;  %v97_v31 = vld [vmem:[%s3407_s1 + $0x1c0] sm:$0xff]  ;;  %v64_v34 = vld [vmem:[%s3407_s1 + $0xb8] sm:$0xff]  ;;  %v47_v36 = vld [vmem:[%s3407_s1 + $0x30] sm:$0xff] }
   0xd   :  { %568 = vmatpush.msra.mxu3 %v100_v19  ;;  %549 = vmatpush.msra.mxu2 %v83_v21  ;;  %v96_v35 = vld [vmem:[%s3407_s1 + $0x1b8] sm:$0xff]  ;;  %v79_v37 = vld [vmem:[%s3407_s1 + $0x130] sm:$0xff]  ;;  %v46_v40 = vld [vmem:[%s3407_s1 + $0x28] sm:$0xff] }
   0xe   :  { %529 = vmatpush.msra.mxu1 %v67_v22  ;;  %510 = vmatpush.msra.mxu0 %v50_v24  ;;  %v63_v38 = vld [vmem:[%s3407_s1 + $0xb0] sm:$0xff]  ;;  %v78_v41 = vld [vmem:[%s3407_s1 + $0x128] sm:$0xff]  ;;  %v45_v44 = vld [vmem:[%s3407_s1 + $0x20] sm:$0xff] }
   0xf   :  { %569 = vmatpush.msra.mxu3 %v99_v23  ;;  %550 = vmatpush.msra.mxu2 %v82_v25  ;;  %v95_v39 = vld [vmem:[%s3407_s1 + $0x1b0] sm:$0xff]  ;;  %v62_v42 = vld [vmem:[%s3407_s1 + $0xa8] sm:$0xff]  ;;  %v77_v45 = vld [vmem:[%s3407_s1 + $0x120] sm:$0xff] }
  0x10   :  { %530 = vmatpush.msra.mxu1 %v66_v26  ;;  %511 = vmatpush.msra.mxu0 %v49_v28  ;;  %v94_v43 = vld [vmem:[%s3407_s1 + $0x1a8] sm:$0xff]  ;;  %v61_v46 = vld [vmem:[%s3407_s1 + $0xa0] sm:$0xff]  ;;  %v44_v48 = vld [vmem:[%s3407_s1 + $0x18] sm:$0xff] }
  0x11   :  { %570 = vmatpush.msra.mxu3 %v98_v27  ;;  %551 = vmatpush.msra.mxu2 %v81_v29  ;;  %v93_v47 = vld [vmem:[%s3407_s1 + $0x1a0] sm:$0xff]  ;;  %v76_v49 = vld [vmem:[%s3407_s1 + $0x118] sm:$0xff]  ;;  %v43_v52 = vld [vmem:[%s3407_s1 + $0x10] sm:$0xff] }
  0x12   :  { %531 = vmatpush.msra.mxu1 %v65_v30  ;;  %512 = vmatpush.msra.mxu0 %v48_v32  ;;  %v60_v50 = vld [vmem:[%s3407_s1 + $0x98] sm:$0xff]  ;;  %v75_v53 = vld [vmem:[%s3407_s1 + $0x110] sm:$0xff]  ;;  %v42_v56 = vld [vmem:[%s3407_s1 + $0x8] sm:$0xff] }
  0x13   :  { %571 = vmatpush.msra.mxu3 %v97_v31  ;;  %552 = vmatpush.msra.mxu2 %v80_v33  ;;  %v92_v51 = vld [vmem:[%s3407_s1 + $0x198] sm:$0xff]  ;;  %v59_v54 = vld [vmem:[%s3407_s1 + $0x90] sm:$0xff]  ;;  %v74_v57 = vld [vmem:[%s3407_s1 + $0x108] sm:$0xff] }
  0x14   :  { %532 = vmatpush.msra.mxu1 %v64_v34  ;;  %513 = vmatpush.msra.mxu0 %v47_v36  ;;  %v91_v55 = vld [vmem:[%s3407_s1 + $0x190] sm:$0xff]  ;;  %v58_v58 = vld [vmem:[%s3407_s1 + $0x88] sm:$0xff]  ;;  %v41_v60 = vld [vmem:[%s3407_s1] sm:$0xff] }
  0x15   :  { %572 = vmatpush.msra.mxu3 %v96_v35  ;;  %553 = vmatpush.msra.mxu2 %v79_v37  ;;  %v90_v59 = vld [vmem:[%s3407_s1 + $0x188] sm:$0xff]  ;;  %v73_v61 = vld [vmem:[%s3407_s1 + $0x100] sm:$0xff]  ;;  %v120_v62 = vld [vmem:[%s3407_s1 + $0x278] sm:$0xff] }
  0x16   :  { %533 = vmatpush.msra.mxu1 %v63_v38  ;;  %514 = vmatpush.msra.mxu0 %v46_v40  ;;  %v152_v63 = vld [vmem:[%s3407_s1 + $0x378] sm:$0xff]  ;;  %v57_v0 = vld [vmem:[%s3407_s1 + $0x80] sm:$0xff]  ;;  %v119_v2 = vld [vmem:[%s3407_s1 + $0x270] sm:$0xff] }
  0x17   :  { %573 = vmatpush.msra.mxu3 %v95_v39  ;;  %554 = vmatpush.msra.mxu2 %v78_v41  ;;  %v89_v1 = vld [vmem:[%s3407_s1 + $0x180] sm:$0xff]  ;;  %v136_v3 = vld [vmem:[%s3407_s1 + $0x2f8] sm:$0xff]  ;;  %v151_v4 = vld [vmem:[%s3407_s1 + $0x370] sm:$0xff] }
  0x18   :  { %534 = vmatpush.msra.mxu1 %v62_v42  ;;  %515 = vmatpush.msra.mxu0 %v45_v44  ;;  %v168_v5 = vld [vmem:[%s3407_s1 + $0x3f8] sm:$0xff]  ;;  %v118_v6 = vld [vmem:[%s3407_s1 + $0x268] sm:$0xff]  ;;  %v135_v7 = vld [vmem:[%s3407_s1 + $0x2f0] sm:$0xff] }
  0x19   :  { %574 = vmatpush.msra.mxu3 %v94_v43  ;;  %555 = vmatpush.msra.mxu2 %v77_v45  ;;  %v150_v8 = vld [vmem:[%s3407_s1 + $0x368] sm:$0xff]  ;;  %v167_v9 = vld [vmem:[%s3407_s1 + $0x3f0] sm:$0xff]  ;;  %v117_v10 = vld [vmem:[%s3407_s1 + $0x260] sm:$0xff] }
  0x1a   :  { %535 = vmatpush.msra.mxu1 %v61_v46  ;;  %516 = vmatpush.msra.mxu0 %v44_v48  ;;  %v134_v11 = vld [vmem:[%s3407_s1 + $0x2e8] sm:$0xff]  ;;  %v149_v12 = vld [vmem:[%s3407_s1 + $0x360] sm:$0xff]  ;;  %v116_v14 = vld [vmem:[%s3407_s1 + $0x258] sm:$0xff] }
  0x1b   :  { %575 = vmatpush.msra.mxu3 %v93_v47  ;;  %556 = vmatpush.msra.mxu2 %v76_v49  ;;  %v166_v13 = vld [vmem:[%s3407_s1 + $0x3e8] sm:$0xff]  ;;  %v133_v15 = vld [vmem:[%s3407_s1 + $0x2e0] sm:$0xff]  ;;  %v148_v16 = vld [vmem:[%s3407_s1 + $0x358] sm:$0xff] }
  0x1c   :  { %536 = vmatpush.msra.mxu1 %v60_v50  ;;  %517 = vmatpush.msra.mxu0 %v43_v52  ;;  %v165_v17 = vld [vmem:[%s3407_s1 + $0x3e0] sm:$0xff]  ;;  %v115_v18 = vld [vmem:[%s3407_s1 + $0x250] sm:$0xff]  ;;  %v132_v19 = vld [vmem:[%s3407_s1 + $0x2d8] sm:$0xff] }
  0x1d   :  { %576 = vmatpush.msra.mxu3 %v92_v51  ;;  %557 = vmatpush.msra.mxu2 %v75_v53  ;;  %v147_v20 = vld [vmem:[%s3407_s1 + $0x350] sm:$0xff]  ;;  %v164_v21 = vld [vmem:[%s3407_s1 + $0x3d8] sm:$0xff]  ;;  %v34_v22 = vld [vmem:[%s3406_s0] sm:$0xff] }
  0x1e   :  { %537 = vmatpush.msra.mxu1 %v59_v54  ;;  %518 = vmatpush.msra.mxu0 %v42_v56  ;;  %v114_v23 = vld [vmem:[%s3407_s1 + $0x248] sm:$0xff]  ;;  %v131_v24 = vld [vmem:[%s3407_s1 + $0x2d0] sm:$0xff]  ;;  %444 = vst [vmem:[#allocation1] ss:$4 sm:$0xff] %v34_v22  ;;  %v113_v27 = vld [vmem:[%s3407_s1 + $0x240] sm:$0xff] }
  0x1f   :  { %577 = vmatpush.msra.mxu3 %v91_v55  ;;  %558 = vmatpush.msra.mxu2 %v74_v57  ;;  %v146_v25 = vld [vmem:[%s3407_s1 + $0x348] sm:$0xff]  ;;  %v163_v26 = vld [vmem:[%s3407_s1 + $0x3d0] sm:$0xff]  ;;  %v145_v29 = vld [vmem:[%s3407_s1 + $0x340] sm:$0xff] }
  0x20   :  { %538 = vmatpush.msra.mxu1 %v58_v58  ;;  %519 = vmatpush.msra.mxu0 %v41_v60  ;;  %v130_v28 = vld [vmem:[%s3407_s1 + $0x2c8] sm:$0xff]  ;;  %v112_v31 = vld [vmem:[%s3407_s1 + $0x238] sm:$0xff]  ;;  %v129_v32 = vld [vmem:[%s3407_s1 + $0x2c0] sm:$0xff] }
  0x21   :  { %578 = vmatpush.msra.mxu3 %v90_v59  ;;  %559 = vmatpush.msra.mxu2 %v73_v61  ;;  %v162_v30 = vld [vmem:[%s3407_s1 + $0x3c8] sm:$0xff]  ;;  %v144_v33 = vld [vmem:[%s3407_s1 + $0x338] sm:$0xff]  ;;  %v161_v34 = vld [vmem:[%s3407_s1 + $0x3c0] sm:$0xff] }
  0x22   :  { %584 = vmatpush.msrb.mxu0 %v120_v62  ;;  %539 = vmatpush.msra.mxu1 %v57_v0  ;;  %v111_v35 = vld [vmem:[%s3407_s1 + $0x230] sm:$0xff]  ;;  %v128_v36 = vld [vmem:[%s3407_s1 + $0x2b8] sm:$0xff]  ;;  %v35_v39 = vld [vmem:[%s3406_s0 + $0x8] sm:$0xff] }
  0x23   :  { %624 = vmatpush.msrb.mxu2 %v152_v63  ;;  %579 = vmatpush.msra.mxu3 %v89_v1  ;;  %v143_v37 = vld [vmem:[%s3407_s1 + $0x330] sm:$0xff]  ;;  %v160_v38 = vld [vmem:[%s3407_s1 + $0x3b8] sm:$0xff]  ;;  %v110_v40 = vld [vmem:[%s3407_s1 + $0x228] sm:$0xff]  ;;  %446 = vst [vmem:[#allocation1 + $0x20] ss:$4 sm:$0xff] %v35_v39 }
  0x24   :  { %585 = vmatpush.msrb.mxu0 %v119_v2  ;;  %604 = vmatpush.msrb.mxu1 %v136_v3  ;;  %v127_v41 = vld [vmem:[%s3407_s1 + $0x2b0] sm:$0xff]  ;;  %v142_v43 = vld [vmem:[%s3407_s1 + $0x328] sm:$0xff]  ;;  %v109_v49 = vld [vmem:[%s3407_s1 + $0x220] sm:$0xff] }
  0x25   :  { %625 = vmatpush.msrb.mxu2 %v151_v4  ;;  %644 = vmatpush.msrb.mxu3 %v168_v5  ;;  %v36_v42 = vld [vmem:[%s3406_s0 + $0x10] sm:$0xff]  ;;  %v2343_v45 = vld.sshfl [vmem:[#allocation1] sm:$0xff pattern:$0x73625140]  ;;  %v126_v50 = vld [vmem:[%s3407_s1 + $0x2a8] sm:$0xff] }
  0x26   :  { %586 = vmatpush.msrb.mxu0 %v118_v6  ;;  %605 = vmatpush.msrb.mxu1 %v135_v7  ;;  %v449_v44 = vld.sshfl [vmem:[#allocation1 + $0x10] sm:$0xff pattern:$0x73625140]  ;;  %v2345_v46 = vld.sshfl [vmem:[#allocation1 + $0x18] sm:$0xff pattern:$0x73625140] }
  0x27   :  { %626 = vmatpush.msrb.mxu2 %v150_v8  ;;  %645 = vmatpush.msrb.mxu3 %v167_v9  ;;  %v2347_v47 = vld.sshfl [vmem:[#allocation1 + $0x8] sm:$0xff pattern:$0x73625140]  ;;  %v159_v48 = vld [vmem:[%s3407_s1 + $0x3b0] sm:$0xff]  ;;  %v141_v51 = vld [vmem:[%s3407_s1 + $0x320] sm:$0xff] }
  0x28   :  { %587 = vmatpush.msrb.mxu0 %v117_v10  ;;  %606 = vmatpush.msrb.mxu1 %v134_v11  ;;  %455 = vst [vmem:[#allocation1] ss:$4 sm:$0xff] %v36_v42  ;;  %v158_v52 = vld [vmem:[%s3407_s1 + $0x3a8] sm:$0xff]  ;;  %v108_v53 = vld [vmem:[%s3407_s1 + $0x218] sm:$0xff]  ;;  %v125_v54 = vld [vmem:[%s3407_s1 + $0x2a0] sm:$0xff] }
  0x29   :  { %627 = vmatpush.msrb.mxu2 %v149_v12  ;;  %646 = vmatpush.msrb.mxu3 %v166_v13  ;;  %v140_v55 = vld [vmem:[%s3407_s1 + $0x318] sm:$0xff]  ;;  %v157_v56 = vld [vmem:[%s3407_s1 + $0x3a0] sm:$0xff]  ;;  %v107_v57 = vld [vmem:[%s3407_s1 + $0x210] sm:$0xff] }
  0x2a   :  { %588 = vmatpush.msrb.mxu0 %v116_v14  ;;  %607 = vmatpush.msrb.mxu1 %v133_v15  ;;  %v124_v58 = vld [vmem:[%s3407_s1 + $0x298] sm:$0xff]  ;;  %v2385_v60 = vld.sshfl [vmem:[#allocation1 + $0x30] sm:$0xff pattern:$0x73625140]  ;;  %v106_v2 = vld [vmem:[%s3407_s1 + $0x208] sm:$0xff] }
  0x2b   :  { %628 = vmatpush.msrb.mxu2 %v148_v16  ;;  %647 = vmatpush.msrb.mxu3 %v165_v17  ;;  %v37_v59 = vld [vmem:[%s3406_s0 + $0x18] sm:$0xff]  ;;  %v2387_v61 = vld.sshfl [vmem:[#allocation1 + $0x20] sm:$0xff pattern:$0x73625140]  ;;  %v139_v0 = vld [vmem:[%s3407_s1 + $0x310] sm:$0xff] }
  0x2c   :  { %589 = vmatpush.msrb.mxu0 %v115_v18  ;;  %608 = vmatpush.msrb.mxu1 %v132_v19  ;;  %v2389_v62 = vld.sshfl [vmem:[#allocation1 + $0x38] sm:$0xff pattern:$0x73625140]  ;;  %v2391_v63 = vld.sshfl [vmem:[#allocation1 + $0x28] sm:$0xff pattern:$0x73625140] }
  0x2d   :  { %629 = vmatpush.msrb.mxu2 %v147_v20  ;;  %648 = vmatpush.msrb.mxu3 %v164_v21  ;;  %v156_v1 = vld [vmem:[%s3407_s1 + $0x398] sm:$0xff]  ;;  %456 = vst [vmem:[#allocation1 + $0x20] ss:$4 sm:$0xff] %v37_v59  ;;  %v123_v3 = vld [vmem:[%s3407_s1 + $0x290] sm:$0xff]  ;;  %v138_v4 = vld [vmem:[%s3407_s1 + $0x308] sm:$0xff] }
  0x2e   :  { %590 = vmatpush.msrb.mxu0 %v114_v23  ;;  %609 = vmatpush.msrb.mxu1 %v131_v24  ;;  %v155_v5 = vld [vmem:[%s3407_s1 + $0x390] sm:$0xff]  ;;  %v105_v6 = vld [vmem:[%s3407_s1 + $0x200] sm:$0xff]  ;;  %v122_v7 = vld [vmem:[%s3407_s1 + $0x288] sm:$0xff] }
  0x2f   :  { %630 = vmatpush.msrb.mxu2 %v146_v25  ;;  %649 = vmatpush.msrb.mxu3 %v163_v26  ;;  %v137_v8 = vld [vmem:[%s3407_s1 + $0x300] sm:$0xff]  ;;  %v154_v9 = vld [vmem:[%s3407_s1 + $0x388] sm:$0xff]  ;;  %v184_v10 = vld [vmem:[%s3407_s1 + $0x478] sm:$0xff] }
  0x30   :  { %591 = vmatpush.msrb.mxu0 %v113_v27  ;;  %610 = vmatpush.msrb.mxu1 %v130_v28  ;;  %v216_v11 = vld [vmem:[%s3407_s1 + $0x578] sm:$0xff]  ;;  %v121_v12 = vld [vmem:[%s3407_s1 + $0x280] sm:$0xff]  ;;  %v183_v14 = vld [vmem:[%s3407_s1 + $0x470] sm:$0xff] }
  0x31   :  { %631 = vmatpush.msrb.mxu2 %v145_v29  ;;  %650 = vmatpush.msrb.mxu3 %v162_v30  ;;  %v153_v13 = vld [vmem:[%s3407_s1 + $0x380] sm:$0xff]  ;;  %v200_v15 = vld [vmem:[%s3407_s1 + $0x4f8] sm:$0xff]  ;;  %v215_v16 = vld [vmem:[%s3407_s1 + $0x570] sm:$0xff] }
  0x32   :  { %592 = vmatpush.msrb.mxu0 %v112_v31  ;;  %611 = vmatpush.msrb.mxu1 %v129_v32  ;;  %v232_v17 = vld [vmem:[%s3407_s1 + $0x5f8] sm:$0xff]  ;;  %v182_v18 = vld [vmem:[%s3407_s1 + $0x468] sm:$0xff]  ;;  %v199_v19 = vld [vmem:[%s3407_s1 + $0x4f0] sm:$0xff] }
  0x33   :  { %632 = vmatpush.msrb.mxu2 %v144_v33  ;;  %651 = vmatpush.msrb.mxu3 %v161_v34  ;;  %v214_v20 = vld [vmem:[%s3407_s1 + $0x568] sm:$0xff]  ;;  %v231_v21 = vld [vmem:[%s3407_s1 + $0x5f0] sm:$0xff]  ;;  %v181_v22 = vld [vmem:[%s3407_s1 + $0x460] sm:$0xff] }
  0x34   :  { %593 = vmatpush.msrb.mxu0 %v111_v35  ;;  %612 = vmatpush.msrb.mxu1 %v128_v36  ;;  %v198_v23 = vld [vmem:[%s3407_s1 + $0x4e8] sm:$0xff]  ;;  %v213_v24 = vld [vmem:[%s3407_s1 + $0x560] sm:$0xff]  ;;  %v2473_v26 = vld.sshfl [vmem:[#allocation1 + $0x10] sm:$0xff pattern:$0x73625140] }
  0x35   :  { %633 = vmatpush.msrb.mxu2 %v143_v37  ;;  %652 = vmatpush.msrb.mxu3 %v160_v38  ;;  %v2471_v25 = vld.sshfl [vmem:[#allocation1] sm:$0xff pattern:$0x73625140]  ;;  %v2475_v27 = vld.sshfl [vmem:[#allocation1 + $0x8] sm:$0xff pattern:$0x73625140] }
  0x36   :  { %594 = vmatpush.msrb.mxu0 %v110_v40  ;;  %613 = vmatpush.msrb.mxu1 %v127_v41  ;;  %v230_v28 = vld [vmem:[%s3407_s1 + $0x5e8] sm:$0xff]  ;;  %v38_v29 = vld [vmem:[%s3406_s0 + $0x20] sm:$0xff]  ;;  %v2483_v30 = vld.sshfl [vmem:[#allocation1 + $0x18] sm:$0xff pattern:$0x73625140] }
  0x37   :  { %634 = vmatpush.msrb.mxu2 %v142_v43  ;;  %653 = vmatpush.msrb.mxu3 %v159_v48  ;;  %v180_v31 = vld [vmem:[%s3407_s1 + $0x458] sm:$0xff]  ;;  %v197_v32 = vld [vmem:[%s3407_s1 + $0x4e0] sm:$0xff]  ;;  %465 = vst [vmem:[#allocation1] ss:$4 sm:$0xff] %v38_v29  ;;  %v179_v35 = vld [vmem:[%s3407_s1 + $0x450] sm:$0xff] }
  0x38   :  { %595 = vmatpush.msrb.mxu0 %v109_v49  ;;  %614 = vmatpush.msrb.mxu1 %v126_v50  ;;  %v212_v33 = vld [vmem:[%s3407_s1 + $0x558] sm:$0xff]  ;;  %v229_v34 = vld [vmem:[%s3407_s1 + $0x5e0] sm:$0xff] }
  0x39   :  { %635 = vmatpush.msrb.mxu2 %v141_v51  ;;  %654 = vmatpush.msrb.mxu3 %v158_v52  ;;  %v196_v36 = vld [vmem:[%s3407_s1 + $0x4d8] sm:$0xff] }
  0x3a   :  { %596 = vmatpush.msrb.mxu0 %v108_v53  ;;  %615 = vmatpush.msrb.mxu1 %v125_v54 }
  0x3b   :  { %636 = vmatpush.msrb.mxu2 %v140_v55  ;;  %655 = vmatpush.msrb.mxu3 %v157_v56 }
  0x3c   :  { %597 = vmatpush.msrb.mxu0 %v107_v57  ;;  %616 = vmatpush.msrb.mxu1 %v124_v58 }
  0x3d   :  { %637 = vmatpush.msrb.mxu2 %v139_v0  ;;  %656 = vmatpush.msrb.mxu3 %v156_v1 }
  0x3e   :  { %598 = vmatpush.msrb.mxu0 %v106_v2  ;;  %617 = vmatpush.msrb.mxu1 %v123_v3 }
  0x3f   :  { %638 = vmatpush.msrb.mxu2 %v138_v4  ;;  %657 = vmatpush.msrb.mxu3 %v155_v5 }
  0x40   :  { %560 = vmatmul.f32.vlgmr.msra.gmra.mxu2 %v449_v44  ;;  %599 = vmatpush.msrb.mxu0 %v105_v6 }
  0x41   :  { %618 = vmatpush.msrb.mxu1 %v122_v7  ;;  %639 = vmatpush.msrb.mxu2 %v137_v8 }
  0x42   :  { %658 = vmatpush.msrb.mxu3 %v154_v9  ;;  %520 = vmatmul.f32.vlgmr.msra.gmra.mxu0 %v2343_v45 }
  0x43   :  { %580 = vmatmul.f32.vlgmr.msra.gmra.mxu3 %v2345_v46  ;;  %664 = vmatpush.msra.mxu0 %v184_v10 }
  0x44   :  { %704 = vmatpush.msra.mxu2 %v216_v11  ;;  %619 = vmatpush.msrb.mxu1 %v121_v12 }
  0x45   :  { %659 = vmatpush.msrb.mxu3 %v153_v13  ;;  %540 = vmatmul.f32.vlgmr.msra.gmra.mxu1 %v2347_v47 }
  0x46   :  { %665 = vmatpush.msra.mxu0 %v183_v14  ;;  %684 = vmatpush.msra.mxu1 %v200_v15 }
  0x47   :  { %705 = vmatpush.msra.mxu2 %v215_v16  ;;  %724 = vmatpush.msra.mxu3 %v232_v17 }
  0x48   :  { %666 = vmatpush.msra.mxu0 %v182_v18  ;;  %685 = vmatpush.msra.mxu1 %v199_v19 }
  0x49   :  { %706 = vmatpush.msra.mxu2 %v214_v20  ;;  %725 = vmatpush.msra.mxu3 %v231_v21 }
  0x4a   :  { %640 = vmatmul.f32.vlgmr.msrb.gmra.mxu2 %v2385_v60  ;;  %667 = vmatpush.msra.mxu0 %v181_v22 }
  0x4b   :  { %686 = vmatpush.msra.mxu1 %v198_v23  ;;  %707 = vmatpush.msra.mxu2 %v213_v24 }
  0x4c   :  { %726 = vmatpush.msra.mxu3 %v230_v28  ;;  %600 = vmatmul.f32.vlgmr.msrb.gmra.mxu0 %v2387_v61 }
  0x4d   :  { %660 = vmatmul.f32.vlgmr.msrb.gmra.mxu3 %v2389_v62  ;;  %668 = vmatpush.msra.mxu0 %v180_v31 }
  0x4e   :  { %17 = vsyncpa [#allocation5], 0  ;;  %687 = vmatpush.msra.mxu1 %v197_v32  ;;  %708 = vmatpush.msra.mxu2 %v212_v33  ;;  %v211_v37 = vld [vmem:[%s3407_s1 + $0x550] sm:$0xff]  ;;  %v228_v38 = vld [vmem:[%s3407_s1 + $0x5d8] sm:$0xff]  ;;  %vm501_vm0 = vcmask 523264   ;;  %vm1011_vm1 = vcmask 130048  }
  0x4f   :  { %727 = vmatpush.msra.mxu3 %v229_v34  ;;  %620 = vmatmul.f32.vlgmr.msrb.gmra.mxu1 %v2391_v63  ;;  %v178_v39 = vld [vmem:[%s3407_s1 + $0x448] sm:$0xff]  ;;  %v195_v40 = vld [vmem:[%s3407_s1 + $0x4d0] sm:$0xff]  ;;  %v177_v43 = vld [vmem:[%s3407_s1 + $0x440] sm:$0xff]  ;;  %vm1154_vm2 = vcmask 1041408   ;;  %vm1806_vm3 = vcmask 9216   ;;  %s1961_s13 = smov 126  }
  0x50   :  { %669 = vmatpush.msra.mxu0 %v179_v35  ;;  %688 = vmatpush.msra.mxu1 %v196_v36  ;;  %v210_v41 = vld [vmem:[%s3407_s1 + $0x548] sm:$0xff]  ;;  %v227_v42 = vld [vmem:[%s3407_s1 + $0x5d0] sm:$0xff]  ;;  %v209_v45 = vld [vmem:[%s3407_s1 + $0x540] sm:$0xff]  ;;  %vm1150_vm4 = vcmask 15360   ;;  %s1833_s30 = sshll.u32 %s3416_s10, 4  ;;  %vm1773_vm5 = vcmask 1045508   ;;  %s1834_s30 = int_to_ptr.hbm [resolvable:$true] %s1833_s30 }
  0x51   :  { %709 = vmatpush.msra.mxu2 %v211_v37  ;;  %728 = vmatpush.msra.mxu3 %v228_v38  ;;  %v194_v44 = vld [vmem:[%s3407_s1 + $0x4c8] sm:$0xff]  ;;  %v176_v47 = vld [vmem:[%s3407_s1 + $0x438] sm:$0xff]  ;;  %v193_v48 = vld [vmem:[%s3407_s1 + $0x4c0] sm:$0xff]  ;;  %vm1775_vm6 = vcmask 1043456   ;;  %vm1804_vm7 = vcmask 517120  }
  0x52   :  { %670 = vmatpush.msra.mxu0 %v178_v39  ;;  %689 = vmatpush.msra.mxu1 %v195_v40  ;;  %v226_v46 = vld [vmem:[%s3407_s1 + $0x5c8] sm:$0xff]  ;;  %v208_v49 = vld [vmem:[%s3407_s1 + $0x538] sm:$0xff]  ;;  %v225_v50 = vld [vmem:[%s3407_s1 + $0x5c0] sm:$0xff] }
  0x53   :  { %710 = vmatpush.msra.mxu2 %v210_v41  ;;  %729 = vmatpush.msra.mxu3 %v227_v42  ;;  %v175_v51 = vld [vmem:[%s3407_s1 + $0x430] sm:$0xff]  ;;  %v192_v52 = vld [vmem:[%s3407_s1 + $0x4b8] sm:$0xff]  ;;  %v174_v55 = vld [vmem:[%s3407_s1 + $0x428] sm:$0xff] }
  0x54   :  { %671 = vmatpush.msra.mxu0 %v177_v43  ;;  %690 = vmatpush.msra.mxu1 %v194_v44  ;;  %v207_v53 = vld [vmem:[%s3407_s1 + $0x530] sm:$0xff]  ;;  %v224_v54 = vld [vmem:[%s3407_s1 + $0x5b8] sm:$0xff]  ;;  %v206_v57 = vld [vmem:[%s3407_s1 + $0x528] sm:$0xff] }
  0x55   :  { %711 = vmatpush.msra.mxu2 %v209_v45  ;;  %730 = vmatpush.msra.mxu3 %v226_v46  ;;  %v191_v56 = vld [vmem:[%s3407_s1 + $0x4b0] sm:$0xff]  ;;  %v173_v59 = vld [vmem:[%s3407_s1 + $0x420] sm:$0xff]  ;;  %v190_v60 = vld [vmem:[%s3407_s1 + $0x4a8] sm:$0xff] }
  0x56   :  { %672 = vmatpush.msra.mxu0 %v176_v47  ;;  %691 = vmatpush.msra.mxu1 %v193_v48  ;;  %v223_v58 = vld [vmem:[%s3407_s1 + $0x5b0] sm:$0xff]  ;;  %v205_v61 = vld [vmem:[%s3407_s1 + $0x520] sm:$0xff]  ;;  %v222_v62 = vld [vmem:[%s3407_s1 + $0x5a8] sm:$0xff] }
  0x57   :  { %712 = vmatpush.msra.mxu2 %v208_v49  ;;  %731 = vmatpush.msra.mxu3 %v225_v50  ;;  %v172_v63 = vld [vmem:[%s3407_s1 + $0x418] sm:$0xff]  ;;  %v189_v0 = vld [vmem:[%s3407_s1 + $0x4a0] sm:$0xff]  ;;  %v171_v3 = vld [vmem:[%s3407_s1 + $0x410] sm:$0xff] }
  0x58   :  { %673 = vmatpush.msra.mxu0 %v175_v51  ;;  %692 = vmatpush.msra.mxu1 %v192_v52  ;;  %v204_v1 = vld [vmem:[%s3407_s1 + $0x518] sm:$0xff]  ;;  %v221_v2 = vld [vmem:[%s3407_s1 + $0x5a0] sm:$0xff]  ;;  %v203_v5 = vld [vmem:[%s3407_s1 + $0x510] sm:$0xff] }
  0x59   :  { %713 = vmatpush.msra.mxu2 %v207_v53  ;;  %732 = vmatpush.msra.mxu3 %v224_v54  ;;  %v188_v4 = vld [vmem:[%s3407_s1 + $0x498] sm:$0xff]  ;;  %v170_v7 = vld [vmem:[%s3407_s1 + $0x408] sm:$0xff]  ;;  %v187_v8 = vld [vmem:[%s3407_s1 + $0x490] sm:$0xff] }
  0x5a   :  { %674 = vmatpush.msra.mxu0 %v174_v55  ;;  %693 = vmatpush.msra.mxu1 %v191_v56  ;;  %v220_v6 = vld [vmem:[%s3407_s1 + $0x598] sm:$0xff]  ;;  %v202_v9 = vld [vmem:[%s3407_s1 + $0x508] sm:$0xff]  ;;  %v219_v10 = vld [vmem:[%s3407_s1 + $0x590] sm:$0xff] }
  0x5b   :  { %714 = vmatpush.msra.mxu2 %v206_v57  ;;  %733 = vmatpush.msra.mxu3 %v223_v58  ;;  %v169_v11 = vld [vmem:[%s3407_s1 + $0x400] sm:$0xff]  ;;  %v186_v12 = vld [vmem:[%s3407_s1 + $0x488] sm:$0xff]  ;;  %v248_v15 = vld [vmem:[%s3407_s1 + $0x678] sm:$0xff] }
  0x5c   :  { %675 = vmatpush.msra.mxu0 %v173_v59  ;;  %694 = vmatpush.msra.mxu1 %v190_v60  ;;  %v201_v13 = vld [vmem:[%s3407_s1 + $0x500] sm:$0xff]  ;;  %v218_v14 = vld [vmem:[%s3407_s1 + $0x588] sm:$0xff]  ;;  %v280_v16 = vld [vmem:[%s3407_s1 + $0x778] sm:$0xff] }
  0x5d   :  { %715 = vmatpush.msra.mxu2 %v205_v61  ;;  %734 = vmatpush.msra.mxu3 %v222_v62  ;;  %v185_v17 = vld [vmem:[%s3407_s1 + $0x480] sm:$0xff]  ;;  %v247_v19 = vld [vmem:[%s3407_s1 + $0x670] sm:$0xff]  ;;  %v264_v20 = vld [vmem:[%s3407_s1 + $0x6f8] sm:$0xff] }
  0x5e   :  { %676 = vmatpush.msra.mxu0 %v172_v63  ;;  %695 = vmatpush.msra.mxu1 %v189_v0  ;;  %v217_v18 = vld [vmem:[%s3407_s1 + $0x580] sm:$0xff]  ;;  %v279_v21 = vld [vmem:[%s3407_s1 + $0x770] sm:$0xff]  ;;  %v296_v22 = vld [vmem:[%s3407_s1 + $0x7f8] sm:$0xff] }
  0x5f   :  { %716 = vmatpush.msra.mxu2 %v204_v1  ;;  %735 = vmatpush.msra.mxu3 %v221_v2  ;;  %v246_v23 = vld [vmem:[%s3407_s1 + $0x668] sm:$0xff]  ;;  %v263_v24 = vld [vmem:[%s3407_s1 + $0x6f0] sm:$0xff]  ;;  %v245_v28 = vld [vmem:[%s3407_s1 + $0x660] sm:$0xff] }
  0x60   :  { %677 = vmatpush.msra.mxu0 %v171_v3  ;;  %696 = vmatpush.msra.mxu1 %v188_v4  ;;  %v2676_v29 = vld.sshfl [vmem:[#allocation1 + $0x20] sm:$0xff pattern:$0x73625140]  ;;  %v2678_v31 = vld.sshfl [vmem:[#allocation1 + $0x30] sm:$0xff pattern:$0x73625140] }
  0x61   :  { %717 = vmatpush.msra.mxu2 %v203_v5  ;;  %736 = vmatpush.msra.mxu3 %v220_v6  ;;  %v2680_v32 = vld.sshfl [vmem:[#allocation1 + $0x28] sm:$0xff pattern:$0x73625140]  ;;  %v2688_v33 = vld.sshfl [vmem:[#allocation1 + $0x38] sm:$0xff pattern:$0x73625140] }
  0x62   :  { %678 = vmatpush.msra.mxu0 %v170_v7  ;;  %697 = vmatpush.msra.mxu1 %v187_v8  ;;  %v277_v34 = vld [vmem:[%s3407_s1 + $0x760] sm:$0xff]  ;;  %v294_v35 = vld [vmem:[%s3407_s1 + $0x7e8] sm:$0xff]  ;;  %v244_v36 = vld [vmem:[%s3407_s1 + $0x658] sm:$0xff] }
  0x63   :  { %718 = vmatpush.msra.mxu2 %v202_v9  ;;  %737 = vmatpush.msra.mxu3 %v219_v10  ;;  %v261_v37 = vld [vmem:[%s3407_s1 + $0x6e0] sm:$0xff]  ;;  %v276_v38 = vld [vmem:[%s3407_s1 + $0x758] sm:$0xff]  ;;  %v243_v40 = vld [vmem:[%s3407_s1 + $0x650] sm:$0xff] }
  0x64   :  { %679 = vmatpush.msra.mxu0 %v169_v11  ;;  %698 = vmatpush.msra.mxu1 %v186_v12  ;;  %v293_v39 = vld [vmem:[%s3407_s1 + $0x7e0] sm:$0xff]  ;;  %v260_v41 = vld [vmem:[%s3407_s1 + $0x6d8] sm:$0xff]  ;;  %v275_v42 = vld [vmem:[%s3407_s1 + $0x750] sm:$0xff] }
  0x65   :  { %719 = vmatpush.msra.mxu2 %v201_v13  ;;  %738 = vmatpush.msra.mxu3 %v218_v14  ;;  %v292_v43 = vld [vmem:[%s3407_s1 + $0x7d8] sm:$0xff]  ;;  %v242_v44 = vld [vmem:[%s3407_s1 + $0x648] sm:$0xff]  ;;  %v259_v45 = vld [vmem:[%s3407_s1 + $0x6d0] sm:$0xff] }
  0x66   :  { %680 = vmatmul.f32.vlgmr.msra.gmra.mxu0 %v2471_v25  ;;  %720 = vmatmul.f32.vlgmr.msra.gmra.mxu2 %v2473_v26  ;;  %v278_v25 = vld [vmem:[%s3407_s1 + $0x768] sm:$0xff]  ;;  %v295_v26 = vld [vmem:[%s3407_s1 + $0x7f0] sm:$0xff]  ;;  %v241_v48 = vld [vmem:[%s3407_s1 + $0x640] sm:$0xff] }
  0x67   :  { %744 = vmatpush.msrb.mxu0 %v248_v15  ;;  %784 = vmatpush.msrb.mxu2 %v280_v16  ;;  %v274_v46 = vld [vmem:[%s3407_s1 + $0x748] sm:$0xff]  ;;  %v291_v47 = vld [vmem:[%s3407_s1 + $0x7d0] sm:$0xff]  ;;  %v273_v50 = vld [vmem:[%s3407_s1 + $0x740] sm:$0xff] }
  0x68   :  { %699 = vmatpush.msra.mxu1 %v185_v17  ;;  %739 = vmatpush.msra.mxu3 %v217_v18  ;;  %v258_v49 = vld [vmem:[%s3407_s1 + $0x6c8] sm:$0xff]  ;;  %v240_v52 = vld [vmem:[%s3407_s1 + $0x638] sm:$0xff]  ;;  %v257_v53 = vld [vmem:[%s3407_s1 + $0x6c0] sm:$0xff] }
  0x69   :  { %700 = vmatmul.f32.vlgmr.msra.gmra.mxu1 %v2475_v27  ;;  %740 = vmatmul.f32.vlgmr.msra.gmra.mxu3 %v2483_v30  ;;  %v262_v27 = vld [vmem:[%s3407_s1 + $0x6e8] sm:$0xff]  ;;  %v272_v54 = vld [vmem:[%s3407_s1 + $0x738] sm:$0xff]  ;;  %v289_v55 = vld [vmem:[%s3407_s1 + $0x7c0] sm:$0xff] }
  0x6a   :  { %745 = vmatpush.msrb.mxu0 %v247_v19  ;;  %764 = vmatpush.msrb.mxu1 %v264_v20  ;;  %v39_v30 = vld [vmem:[%s3406_s0 + $0x28] sm:$0xff]  ;;  %v239_v56 = vld [vmem:[%s3407_s1 + $0x630] sm:$0xff]  ;;  %v256_v57 = vld [vmem:[%s3407_s1 + $0x6b8] sm:$0xff] }
  0x6b   :  { %785 = vmatpush.msrb.mxu2 %v279_v21  ;;  %804 = vmatpush.msrb.mxu3 %v296_v22  ;;  %466 = vst [vmem:[#allocation1 + $0x20] ss:$4 sm:$0xff] %v39_v30  ;;  %v290_v51 = vld [vmem:[%s3407_s1 + $0x7c8] sm:$0xff]  ;;  %v271_v58 = vld [vmem:[%s3407_s1 + $0x730] sm:$0xff]  ;;  %v288_v59 = vld [vmem:[%s3407_s1 + $0x7b8] sm:$0xff] }
  0x6c   :  { %746 = vmatpush.msrb.mxu0 %v246_v23  ;;  %765 = vmatpush.msrb.mxu1 %v263_v24  ;;  %v238_v60 = vld [vmem:[%s3407_s1 + $0x628] sm:$0xff]  ;;  %v255_v61 = vld [vmem:[%s3407_s1 + $0x6b0] sm:$0xff]  ;;  %v237_v0 = vld [vmem:[%s3407_s1 + $0x620] sm:$0xff] }
  0x6d   :  { %786 = vmatpush.msrb.mxu2 %v278_v25  ;;  %805 = vmatpush.msrb.mxu3 %v295_v26  ;;  %v270_v62 = vld [vmem:[%s3407_s1 + $0x728] sm:$0xff]  ;;  %v287_v63 = vld [vmem:[%s3407_s1 + $0x7b0] sm:$0xff]  ;;  %v269_v2 = vld [vmem:[%s3407_s1 + $0x720] sm:$0xff] }
  0x6e   :  { %747 = vmatpush.msrb.mxu0 %v245_v28  ;;  %766 = vmatpush.msrb.mxu1 %v262_v27  ;;  %v254_v1 = vld [vmem:[%s3407_s1 + $0x6a8] sm:$0xff]  ;;  %v236_v4 = vld [vmem:[%s3407_s1 + $0x618] sm:$0xff]  ;;  %v253_v5 = vld [vmem:[%s3407_s1 + $0x6a0] sm:$0xff] }
  0x6f   :  { %787 = vmatpush.msrb.mxu2 %v277_v34  ;;  %806 = vmatpush.msrb.mxu3 %v294_v35  ;;  %v286_v3 = vld [vmem:[%s3407_s1 + $0x7a8] sm:$0xff]  ;;  %v268_v6 = vld [vmem:[%s3407_s1 + $0x718] sm:$0xff]  ;;  %v285_v7 = vld [vmem:[%s3407_s1 + $0x7a0] sm:$0xff] }
  0x70   :  { %748 = vmatpush.msrb.mxu0 %v244_v36  ;;  %767 = vmatpush.msrb.mxu1 %v261_v37  ;;  %v235_v8 = vld [vmem:[%s3407_s1 + $0x610] sm:$0xff]  ;;  %v252_v9 = vld [vmem:[%s3407_s1 + $0x698] sm:$0xff]  ;;  %v234_v12 = vld [vmem:[%s3407_s1 + $0x608] sm:$0xff] }
  0x71   :  { %788 = vmatpush.msrb.mxu2 %v276_v38  ;;  %807 = vmatpush.msrb.mxu3 %v293_v39  ;;  %v267_v10 = vld [vmem:[%s3407_s1 + $0x710] sm:$0xff]  ;;  %v284_v11 = vld [vmem:[%s3407_s1 + $0x798] sm:$0xff]  ;;  %v266_v14 = vld [vmem:[%s3407_s1 + $0x708] sm:$0xff] }
  0x72   :  { %749 = vmatpush.msrb.mxu0 %v243_v40  ;;  %768 = vmatpush.msrb.mxu1 %v260_v41  ;;  %v251_v13 = vld [vmem:[%s3407_s1 + $0x690] sm:$0xff]  ;;  %v233_v16 = vld [vmem:[%s3407_s1 + $0x600] sm:$0xff]  ;;  %v250_v17 = vld [vmem:[%s3407_s1 + $0x688] sm:$0xff] }
  0x73   :  { %789 = vmatpush.msrb.mxu2 %v275_v42  ;;  %808 = vmatpush.msrb.mxu3 %v292_v43  ;;  %v283_v15 = vld [vmem:[%s3407_s1 + $0x790] sm:$0xff]  ;;  %v265_v18 = vld [vmem:[%s3407_s1 + $0x700] sm:$0xff]  ;;  %v282_v19 = vld [vmem:[%s3407_s1 + $0x788] sm:$0xff] }
  0x74   :  { %750 = vmatpush.msrb.mxu0 %v242_v44  ;;  %769 = vmatpush.msrb.mxu1 %v259_v45  ;;  %v312_v20 = vld [vmem:[%s3407_s1 + $0x878] sm:$0xff]  ;;  %v249_v22 = vld [vmem:[%s3407_s1 + $0x680] sm:$0xff]  ;;  %v311_v24 = vld [vmem:[%s3407_s1 + $0x870] sm:$0xff] }
  0x75   :  { %790 = vmatpush.msrb.mxu2 %v274_v46  ;;  %809 = vmatpush.msrb.mxu3 %v291_v47  ;;  %v344_v21 = vld [vmem:[%s3407_s1 + $0x978] sm:$0xff]  ;;  %v281_v23 = vld [vmem:[%s3407_s1 + $0x780] sm:$0xff]  ;;  %v343_v26 = vld [vmem:[%s3407_s1 + $0x970] sm:$0xff] }
  0x76   :  { %751 = vmatpush.msrb.mxu0 %v241_v48  ;;  %770 = vmatpush.msrb.mxu1 %v258_v49  ;;  %v328_v25 = vld [vmem:[%s3407_s1 + $0x8f8] sm:$0xff]  ;;  %v342_v27 = vld [vmem:[%s3407_s1 + $0x968] sm:$0xff]  ;;  %v309_v30 = vld [vmem:[%s3407_s1 + $0x860] sm:$0xff] }
  0x77   :  { %791 = vmatpush.msrb.mxu2 %v273_v50  ;;  %810 = vmatpush.msrb.mxu3 %v290_v51  ;;  %v360_v28 = vld [vmem:[%s3407_s1 + $0x9f8] sm:$0xff]  ;;  %v341_v34 = vld [vmem:[%s3407_s1 + $0x960] sm:$0xff]  ;;  %v358_v35 = vld [vmem:[%s3407_s1 + $0x9e8] sm:$0xff] }
  0x78   :  { %752 = vmatpush.msrb.mxu0 %v240_v52  ;;  %771 = vmatpush.msrb.mxu1 %v257_v53  ;;  %v308_v36 = vld [vmem:[%s3407_s1 + $0x858] sm:$0xff]  ;;  %v325_v37 = vld [vmem:[%s3407_s1 + $0x8e0] sm:$0xff]  ;;  %v307_v40 = vld [vmem:[%s3407_s1 + $0x850] sm:$0xff] }
  0x79   :  { %792 = vmatpush.msrb.mxu2 %v272_v54  ;;  %811 = vmatpush.msrb.mxu3 %v289_v55  ;;  %v340_v38 = vld [vmem:[%s3407_s1 + $0x958] sm:$0xff]  ;;  %v357_v39 = vld [vmem:[%s3407_s1 + $0x9e0] sm:$0xff]  ;;  %v339_v42 = vld [vmem:[%s3407_s1 + $0x950] sm:$0xff] }
  0x7a   :  { %753 = vmatpush.msrb.mxu0 %v239_v56  ;;  %772 = vmatpush.msrb.mxu1 %v256_v57  ;;  %v324_v41 = vld [vmem:[%s3407_s1 + $0x8d8] sm:$0xff]  ;;  %v306_v44 = vld [vmem:[%s3407_s1 + $0x848] sm:$0xff]  ;;  %v323_v45 = vld [vmem:[%s3407_s1 + $0x8d0] sm:$0xff] }
  0x7b   :  { %793 = vmatpush.msrb.mxu2 %v271_v58  ;;  %812 = vmatpush.msrb.mxu3 %v288_v59  ;;  %v356_v43 = vld [vmem:[%s3407_s1 + $0x9d8] sm:$0xff]  ;;  %v338_v46 = vld [vmem:[%s3407_s1 + $0x948] sm:$0xff]  ;;  %v355_v47 = vld [vmem:[%s3407_s1 + $0x9d0] sm:$0xff] }
  0x7c   :  { %754 = vmatpush.msrb.mxu0 %v238_v60  ;;  %773 = vmatpush.msrb.mxu1 %v255_v61  ;;  %v305_v48 = vld [vmem:[%s3407_s1 + $0x840] sm:$0xff]  ;;  %v322_v49 = vld [vmem:[%s3407_s1 + $0x8c8] sm:$0xff]  ;;  %v304_v52 = vld [vmem:[%s3407_s1 + $0x838] sm:$0xff] }
  0x7d   :  { %794 = vmatpush.msrb.mxu2 %v270_v62  ;;  %813 = vmatpush.msrb.mxu3 %v287_v63  ;;  %v337_v50 = vld [vmem:[%s3407_s1 + $0x940] sm:$0xff]  ;;  %v354_v51 = vld [vmem:[%s3407_s1 + $0x9c8] sm:$0xff]  ;;  %v336_v54 = vld [vmem:[%s3407_s1 + $0x938] sm:$0xff] }
  0x7e   :  { %755 = vmatpush.msrb.mxu0 %v237_v0  ;;  %774 = vmatpush.msrb.mxu1 %v254_v1  ;;  %v321_v53 = vld [vmem:[%s3407_s1 + $0x8c0] sm:$0xff]  ;;  %v303_v56 = vld [vmem:[%s3407_s1 + $0x830] sm:$0xff]  ;;  %v320_v57 = vld [vmem:[%s3407_s1 + $0x8b8] sm:$0xff] }
  0x7f   :  { %795 = vmatpush.msrb.mxu2 %v269_v2  ;;  %814 = vmatpush.msrb.mxu3 %v286_v3  ;;  %v353_v55 = vld [vmem:[%s3407_s1 + $0x9c0] sm:$0xff]  ;;  %v335_v58 = vld [vmem:[%s3407_s1 + $0x930] sm:$0xff]  ;;  %v352_v59 = vld [vmem:[%s3407_s1 + $0x9b8] sm:$0xff] }
  0x80   :  { %756 = vmatpush.msrb.mxu0 %v236_v4  ;;  %775 = vmatpush.msrb.mxu1 %v253_v5  ;;  %v302_v60 = vld [vmem:[%s3407_s1 + $0x828] sm:$0xff]  ;;  %v319_v61 = vld [vmem:[%s3407_s1 + $0x8b0] sm:$0xff]  ;;  %v301_v0 = vld [vmem:[%s3407_s1 + $0x820] sm:$0xff] }
  0x81   :  { %796 = vmatpush.msrb.mxu2 %v268_v6  ;;  %815 = vmatpush.msrb.mxu3 %v285_v7  ;;  %v334_v62 = vld [vmem:[%s3407_s1 + $0x928] sm:$0xff]  ;;  %v351_v63 = vld [vmem:[%s3407_s1 + $0x9b0] sm:$0xff]  ;;  %v333_v2 = vld [vmem:[%s3407_s1 + $0x920] sm:$0xff] }
  0x82   :  { %757 = vmatpush.msrb.mxu0 %v235_v8  ;;  %776 = vmatpush.msrb.mxu1 %v252_v9  ;;  %v318_v1 = vld [vmem:[%s3407_s1 + $0x8a8] sm:$0xff]  ;;  %v300_v4 = vld [vmem:[%s3407_s1 + $0x818] sm:$0xff]  ;;  %v317_v5 = vld [vmem:[%s3407_s1 + $0x8a0] sm:$0xff] }
  0x83   :  { %797 = vmatpush.msrb.mxu2 %v267_v10  ;;  %816 = vmatpush.msrb.mxu3 %v284_v11  ;;  %v350_v3 = vld [vmem:[%s3407_s1 + $0x9a8] sm:$0xff]  ;;  %v332_v6 = vld [vmem:[%s3407_s1 + $0x918] sm:$0xff]  ;;  %v349_v7 = vld [vmem:[%s3407_s1 + $0x9a0] sm:$0xff] }
  0x84   :  { %758 = vmatpush.msrb.mxu0 %v234_v12  ;;  %777 = vmatpush.msrb.mxu1 %v251_v13  ;;  %v299_v8 = vld [vmem:[%s3407_s1 + $0x810] sm:$0xff]  ;;  %v316_v9 = vld [vmem:[%s3407_s1 + $0x898] sm:$0xff]  ;;  %v298_v12 = vld [vmem:[%s3407_s1 + $0x808] sm:$0xff] }
  0x85   :  { %798 = vmatpush.msrb.mxu2 %v266_v14  ;;  %817 = vmatpush.msrb.mxu3 %v283_v15  ;;  %v331_v10 = vld [vmem:[%s3407_s1 + $0x910] sm:$0xff]  ;;  %v348_v11 = vld [vmem:[%s3407_s1 + $0x998] sm:$0xff]  ;;  %v330_v14 = vld [vmem:[%s3407_s1 + $0x908] sm:$0xff] }
  0x86   :  { %759 = vmatpush.msrb.mxu0 %v233_v16  ;;  %778 = vmatpush.msrb.mxu1 %v250_v17  ;;  %v315_v13 = vld [vmem:[%s3407_s1 + $0x890] sm:$0xff]  ;;  %v297_v16 = vld [vmem:[%s3407_s1 + $0x800] sm:$0xff]  ;;  %v314_v17 = vld [vmem:[%s3407_s1 + $0x888] sm:$0xff] }
  0x87   :  { %799 = vmatpush.msrb.mxu2 %v265_v18  ;;  %818 = vmatpush.msrb.mxu3 %v282_v19  ;;  %v347_v15 = vld [vmem:[%s3407_s1 + $0x990] sm:$0xff]  ;;  %v329_v18 = vld [vmem:[%s3407_s1 + $0x900] sm:$0xff]  ;;  %v346_v19 = vld [vmem:[%s3407_s1 + $0x988] sm:$0xff] }
  0x88   :  { %760 = vmatmul.f32.vlgmr.msrb.gmra.mxu0 %v2676_v29  ;;  %800 = vmatmul.f32.vlgmr.msrb.gmra.mxu2 %v2678_v31  ;;  %v310_v29 = vld [vmem:[%s3407_s1 + $0x868] sm:$0xff]  ;;  %v327_v31 = vld [vmem:[%s3407_s1 + $0x8f0] sm:$0xff] }
  0x89   :  { %824 = vmatpush.msra.mxu0 %v312_v20  ;;  %864 = vmatpush.msra.mxu2 %v344_v21  ;;  %v467_v20 = vld.sshfl [vmem:[#allocation1] sm:$0xff pattern:$0x73625140]  ;;  %v469_v21 = vld.sshfl [vmem:[#allocation1 + $0x10] sm:$0xff pattern:$0x73625140] }
  0x8a   :  { %779 = vmatpush.msrb.mxu1 %v249_v22  ;;  %819 = vmatpush.msrb.mxu3 %v281_v23  ;;  %v376_v22 = vld [vmem:[%s3407_s1 + $0xa78] sm:$0xff] }
  0x8b   :  { %780 = vmatmul.f32.vlgmr.msrb.gmra.mxu1 %v2680_v32  ;;  %820 = vmatmul.f32.vlgmr.msrb.gmra.mxu3 %v2688_v33  ;;  %v359_v32 = vld [vmem:[%s3407_s1 + $0x9f0] sm:$0xff]  ;;  %v326_v33 = vld [vmem:[%s3407_s1 + $0x8e8] sm:$0xff]  ;;  %v408_v23 = vld [vmem:[%s3407_s1 + $0xb78] sm:$0xff] }
  0x8c   :  { %825 = vmatpush.msra.mxu0 %v311_v24  ;;  %844 = vmatpush.msra.mxu1 %v328_v25  ;;  %v313_v24 = vld [vmem:[%s3407_s1 + $0x880] sm:$0xff] }
  0x8d   :  { %865 = vmatpush.msra.mxu2 %v343_v26  ;;  %884 = vmatpush.msra.mxu3 %v360_v28  ;;  %v345_v25 = vld [vmem:[%s3407_s1 + $0x980] sm:$0xff]  ;;  %v468_v26 = vld.sshfl [vmem:[#allocation1 + $0x8] sm:$0xff pattern:$0x73625140] }
  0x8e   :  { %826 = vmatpush.msra.mxu0 %v310_v29  ;;  %845 = vmatpush.msra.mxu1 %v327_v31  ;;  %v470_v28 = vld.sshfl [vmem:[#allocation1 + $0x18] sm:$0xff pattern:$0x73625140]  ;;  %v375_v29 = vld [vmem:[%s3407_s1 + $0xa70] sm:$0xff] }
  0x8f   :  { %866 = vmatpush.msra.mxu2 %v342_v27  ;;  %885 = vmatpush.msra.mxu3 %v359_v32  ;;  %v392_v31 = vld [vmem:[%s3407_s1 + $0xaf8] sm:$0xff]  ;;  %v407_v27 = vld [vmem:[%s3407_s1 + $0xb70] sm:$0xff] }
  0x90   :  { %827 = vmatpush.msra.mxu0 %v309_v30  ;;  %846 = vmatpush.msra.mxu1 %v326_v33  ;;  %v424_v32 = vld [vmem:[%s3407_s1 + $0xbf8] sm:$0xff]  ;;  %v374_v30 = vld [vmem:[%s3407_s1 + $0xa68] sm:$0xff]  ;;  %v391_v33 = vld [vmem:[%s3407_s1 + $0xaf0] sm:$0xff] }
  0x91   :  { %867 = vmatpush.msra.mxu2 %v341_v34  ;;  %886 = vmatpush.msra.mxu3 %v358_v35  ;;  %v406_v34 = vld [vmem:[%s3407_s1 + $0xb68] sm:$0xff]  ;;  %v423_v35 = vld [vmem:[%s3407_s1 + $0xbf0] sm:$0xff] }
  0x92   :  { %828 = vmatpush.msra.mxu0 %v308_v36  ;;  %847 = vmatpush.msra.mxu1 %v325_v37  ;;  %v373_v36 = vld [vmem:[%s3407_s1 + $0xa60] sm:$0xff]  ;;  %v390_v37 = vld [vmem:[%s3407_s1 + $0xae8] sm:$0xff] }
  0x93   :  { %868 = vmatpush.msra.mxu2 %v340_v38  ;;  %887 = vmatpush.msra.mxu3 %v357_v39  ;;  %v405_v38 = vld [vmem:[%s3407_s1 + $0xb60] sm:$0xff]  ;;  %v422_v39 = vld [vmem:[%s3407_s1 + $0xbe8] sm:$0xff] }
  0x94   :  { %829 = vmatpush.msra.mxu0 %v307_v40  ;;  %848 = vmatpush.msra.mxu1 %v324_v41  ;;  %v372_v40 = vld [vmem:[%s3407_s1 + $0xa58] sm:$0xff]  ;;  %v389_v41 = vld [vmem:[%s3407_s1 + $0xae0] sm:$0xff] }
  0x95   :  { %869 = vmatpush.msra.mxu2 %v339_v42  ;;  %888 = vmatpush.msra.mxu3 %v356_v43  ;;  %v404_v42 = vld [vmem:[%s3407_s1 + $0xb58] sm:$0xff]  ;;  %v421_v43 = vld [vmem:[%s3407_s1 + $0xbe0] sm:$0xff] }
  0x96   :  { %830 = vmatpush.msra.mxu0 %v306_v44  ;;  %849 = vmatpush.msra.mxu1 %v323_v45  ;;  %v371_v44 = vld [vmem:[%s3407_s1 + $0xa50] sm:$0xff]  ;;  %v388_v45 = vld [vmem:[%s3407_s1 + $0xad8] sm:$0xff] }
  0x97   :  { %870 = vmatpush.msra.mxu2 %v338_v46  ;;  %889 = vmatpush.msra.mxu3 %v355_v47  ;;  %v40_v46 = vld [vmem:[%s3406_s0 + $0x30] sm:$0x3] }
  0x98   :  { %831 = vmatpush.msra.mxu0 %v305_v48  ;;  %850 = vmatpush.msra.mxu1 %v322_v49  ;;  %v403_v47 = vld [vmem:[%s3407_s1 + $0xb50] sm:$0xff]  ;;  %v420_v48 = vld [vmem:[%s3407_s1 + $0xbd8] sm:$0xff]  ;;  %475 = vst [vmem:[#allocation1] ss:$4 sm:$0xff] %v40_v46  ;;  %v370_v49 = vld [vmem:[%s3407_s1 + $0xa48] sm:$0xff] }
  0x99   :  { %871 = vmatpush.msra.mxu2 %v337_v50  ;;  %890 = vmatpush.msra.mxu3 %v354_v51  ;;  %v387_v50 = vld [vmem:[%s3407_s1 + $0xad0] sm:$0xff]  ;;  %v402_v51 = vld [vmem:[%s3407_s1 + $0xb48] sm:$0xff] }
  0x9a   :  { %832 = vmatpush.msra.mxu0 %v304_v52  ;;  %851 = vmatpush.msra.mxu1 %v321_v53  ;;  %v419_v52 = vld [vmem:[%s3407_s1 + $0xbd0] sm:$0xff]  ;;  %v369_v53 = vld [vmem:[%s3407_s1 + $0xa40] sm:$0xff] }
  0x9b   :  { %872 = vmatpush.msra.mxu2 %v336_v54  ;;  %891 = vmatpush.msra.mxu3 %v353_v55  ;;  %v386_v54 = vld [vmem:[%s3407_s1 + $0xac8] sm:$0xff]  ;;  %v401_v55 = vld [vmem:[%s3407_s1 + $0xb40] sm:$0xff] }
  0x9c   :  { %833 = vmatpush.msra.mxu0 %v303_v56  ;;  %852 = vmatpush.msra.mxu1 %v320_v57  ;;  %v418_v56 = vld [vmem:[%s3407_s1 + $0xbc8] sm:$0xff]  ;;  %v368_v57 = vld [vmem:[%s3407_s1 + $0xa38] sm:$0xff] }
  0x9d   :  { %873 = vmatpush.msra.mxu2 %v335_v58  ;;  %892 = vmatpush.msra.mxu3 %v352_v59  ;;  %v385_v58 = vld [vmem:[%s3407_s1 + $0xac0] sm:$0xff]  ;;  %v400_v59 = vld [vmem:[%s3407_s1 + $0xb38] sm:$0xff] }
  0x9e   :  { %834 = vmatpush.msra.mxu0 %v302_v60  ;;  %853 = vmatpush.msra.mxu1 %v319_v61  ;;  %v417_v60 = vld [vmem:[%s3407_s1 + $0xbc0] sm:$0xff]  ;;  %v367_v61 = vld [vmem:[%s3407_s1 + $0xa30] sm:$0xff] }
  0x9f   :  { %874 = vmatpush.msra.mxu2 %v334_v62  ;;  %893 = vmatpush.msra.mxu3 %v351_v63  ;;  %v384_v62 = vld [vmem:[%s3407_s1 + $0xab8] sm:$0xff]  ;;  %v399_v63 = vld [vmem:[%s3407_s1 + $0xb30] sm:$0xff] }
  0xa0   :  { %835 = vmatpush.msra.mxu0 %v301_v0  ;;  %854 = vmatpush.msra.mxu1 %v318_v1  ;;  %v416_v0 = vld [vmem:[%s3407_s1 + $0xbb8] sm:$0xff]  ;;  %v366_v1 = vld [vmem:[%s3407_s1 + $0xa28] sm:$0xff] }
  0xa1   :  { %875 = vmatpush.msra.mxu2 %v333_v2  ;;  %894 = vmatpush.msra.mxu3 %v350_v3  ;;  %v383_v2 = vld [vmem:[%s3407_s1 + $0xab0] sm:$0xff]  ;;  %v398_v3 = vld [vmem:[%s3407_s1 + $0xb28] sm:$0xff] }
  0xa2   :  { %836 = vmatpush.msra.mxu0 %v300_v4  ;;  %855 = vmatpush.msra.mxu1 %v317_v5  ;;  %v415_v4 = vld [vmem:[%s3407_s1 + $0xbb0] sm:$0xff]  ;;  %v365_v5 = vld [vmem:[%s3407_s1 + $0xa20] sm:$0xff] }
  0xa3   :  { %876 = vmatpush.msra.mxu2 %v332_v6  ;;  %895 = vmatpush.msra.mxu3 %v349_v7  ;;  %v382_v6 = vld [vmem:[%s3407_s1 + $0xaa8] sm:$0xff]  ;;  %v397_v7 = vld [vmem:[%s3407_s1 + $0xb20] sm:$0xff] }
  0xa4   :  { %837 = vmatpush.msra.mxu0 %v299_v8  ;;  %856 = vmatpush.msra.mxu1 %v316_v9  ;;  %v414_v8 = vld [vmem:[%s3407_s1 + $0xba8] sm:$0xff]  ;;  %v364_v9 = vld [vmem:[%s3407_s1 + $0xa18] sm:$0xff] }
  0xa5   :  { %877 = vmatpush.msra.mxu2 %v331_v10  ;;  %896 = vmatpush.msra.mxu3 %v348_v11  ;;  %v381_v10 = vld [vmem:[%s3407_s1 + $0xaa0] sm:$0xff]  ;;  %v396_v11 = vld [vmem:[%s3407_s1 + $0xb18] sm:$0xff] }
  0xa6   :  { %838 = vmatpush.msra.mxu0 %v298_v12  ;;  %857 = vmatpush.msra.mxu1 %v315_v13  ;;  %v413_v12 = vld [vmem:[%s3407_s1 + $0xba0] sm:$0xff]  ;;  %v363_v13 = vld [vmem:[%s3407_s1 + $0xa10] sm:$0xff] }
  0xa7   :  { %878 = vmatpush.msra.mxu2 %v330_v14  ;;  %897 = vmatpush.msra.mxu3 %v347_v15  ;;  %v380_v14 = vld [vmem:[%s3407_s1 + $0xa98] sm:$0xff]  ;;  %v395_v15 = vld [vmem:[%s3407_s1 + $0xb10] sm:$0xff] }
  0xa8   :  { %839 = vmatpush.msra.mxu0 %v297_v16  ;;  %858 = vmatpush.msra.mxu1 %v314_v17  ;;  %v412_v16 = vld [vmem:[%s3407_s1 + $0xb98] sm:$0xff]  ;;  %v362_v17 = vld [vmem:[%s3407_s1 + $0xa08] sm:$0xff] }
  0xa9   :  { %879 = vmatpush.msra.mxu2 %v329_v18  ;;  %898 = vmatpush.msra.mxu3 %v346_v19  ;;  %v379_v18 = vld [vmem:[%s3407_s1 + $0xa90] sm:$0xff]  ;;  %v394_v19 = vld [vmem:[%s3407_s1 + $0xb08] sm:$0xff] }
  0xaa   :  { %840 = vmatmul.f32.vlgmr.msra.gmra.mxu0 %v467_v20  ;;  %880 = vmatmul.f32.vlgmr.msra.gmra.mxu2 %v469_v21  ;;  %v411_v20 = vld [vmem:[%s3407_s1 + $0xb90] sm:$0xff]  ;;  %v361_v21 = vld [vmem:[%s3407_s1 + $0xa00] sm:$0xff] }
  0xab   :  { %904 = vmatpush.msrb.mxu0 %v376_v22  ;;  %944 = vmatpush.msrb.mxu2 %v408_v23  ;;  %v378_v22 = vld [vmem:[%s3407_s1 + $0xa88] sm:$0xff]  ;;  %v393_v23 = vld [vmem:[%s3407_s1 + $0xb00] sm:$0xff] }
  0xac   :  { %859 = vmatpush.msra.mxu1 %v313_v24  ;;  %899 = vmatpush.msra.mxu3 %v345_v25  ;;  %v410_v24 = vld [vmem:[%s3407_s1 + $0xb88] sm:$0xff]  ;;  %v471_v25 = vld.sshfl [vmem:[#allocation1 + $0x20] sm:$0xff pattern:$0x73625140] }
  0xad   :  { %860 = vmatmul.f32.vlgmr.msra.gmra.mxu1 %v468_v26  ;;  %900 = vmatmul.f32.vlgmr.msra.gmra.mxu3 %v470_v28  ;;  %v473_v26 = vld.sshfl [vmem:[#allocation1 + $0x30] sm:$0xff pattern:$0x73625140]  ;;  %v432_v28 = vld [vmem:[%s3407_s1 + $0xc38] sm:$0xff] }
  0xae   :  { %905 = vmatpush.msrb.mxu0 %v375_v29  ;;  %924 = vmatpush.msrb.mxu1 %v392_v31  ;;  %v377_v29 = vld [vmem:[%s3407_s1 + $0xa80] sm:$0xff] }
  0xaf   :  { %945 = vmatpush.msrb.mxu2 %v407_v27  ;;  %964 = vmatpush.msrb.mxu3 %v424_v32  ;;  %v409_v31 = vld [vmem:[%s3407_s1 + $0xb80] sm:$0xff]  ;;  %v472_v27 = vld.sshfl [vmem:[#allocation1 + $0x28] sm:$0xff pattern:$0x73625140] }
  0xb0   :  { %906 = vmatpush.msrb.mxu0 %v374_v30  ;;  %925 = vmatpush.msrb.mxu1 %v391_v33  ;;  %v474_v32 = vld.sshfl [vmem:[#allocation1 + $0x38] sm:$0xff pattern:$0x73625140]  ;;  %v431_v30 = vld [vmem:[%s3407_s1 + $0xc30] sm:$0xff]  ;;  %v430_v33 = vld [vmem:[%s3407_s1 + $0xc28] sm:$0xff] }
  0xb1   :  { %946 = vmatpush.msrb.mxu2 %v406_v34  ;;  %965 = vmatpush.msrb.mxu3 %v423_v35  ;;  %v429_v34 = vld [vmem:[%s3407_s1 + $0xc20] sm:$0xff]  ;;  %v428_v35 = vld [vmem:[%s3407_s1 + $0xc18] sm:$0xff] }
  0xb2   :  { %907 = vmatpush.msrb.mxu0 %v373_v36  ;;  %926 = vmatpush.msrb.mxu1 %v390_v37  ;;  %v427_v36 = vld [vmem:[%s3407_s1 + $0xc10] sm:$0xff]  ;;  %v426_v37 = vld [vmem:[%s3407_s1 + $0xc08] sm:$0xff] }
  0xb3   :  { %947 = vmatpush.msrb.mxu2 %v405_v38  ;;  %966 = vmatpush.msrb.mxu3 %v422_v39  ;;  %v425_v38 = vld [vmem:[%s3407_s1 + $0xc00] sm:$0xff]  ;;  %s1822_s1 = sshll.u32 %s3415_s9, 4  ;;  %s1823_s1 = int_to_ptr.hbm [resolvable:$true] %s1822_s1 }
  0xb4   :  { %908 = vmatpush.msrb.mxu0 %v372_v40  ;;  %927 = vmatpush.msrb.mxu1 %v389_v41  ;;  %v476_v39 = vld.sshfl [vmem:[#allocation1] sm:$0xff pattern:$0x73625140] }
  0xb5   :  { %948 = vmatpush.msrb.mxu2 %v404_v42  ;;  %967 = vmatpush.msrb.mxu3 %v421_v43  ;;  %v1904_v40 = vld [vmem:[%s3408_s2] ss:$0 sm:$0xff]  ;;  %s1963_s2 = smov [#allocation4]  }
  0xb6   :  { %909 = vmatpush.msrb.mxu0 %v371_v44  ;;  %928 = vmatpush.msrb.mxu1 %v388_v45  ;;  %s1831_s28 = sshll.u32 %s1963_s2, 4  ;;  %s1832_s28 = int_to_ptr.vmem [resolvable:$true] %s1831_s28 }
  0xb7   :  { %949 = vmatpush.msrb.mxu2 %v403_v47  ;;  %968 = vmatpush.msrb.mxu3 %v420_v48 }
  0xb8   :  { %910 = vmatpush.msrb.mxu0 %v370_v49  ;;  %929 = vmatpush.msrb.mxu1 %v387_v50 }
  0xb9   :  { %950 = vmatpush.msrb.mxu2 %v402_v51  ;;  %969 = vmatpush.msrb.mxu3 %v419_v52 }
  0xba   :  { %911 = vmatpush.msrb.mxu0 %v369_v53  ;;  %930 = vmatpush.msrb.mxu1 %v386_v54 }
  0xbb   :  { %951 = vmatpush.msrb.mxu2 %v401_v55  ;;  %970 = vmatpush.msrb.mxu3 %v418_v56 }
  0xbc   :  { %912 = vmatpush.msrb.mxu0 %v368_v57  ;;  %931 = vmatpush.msrb.mxu1 %v385_v58 }
  0xbd   :  { %952 = vmatpush.msrb.mxu2 %v400_v59  ;;  %971 = vmatpush.msrb.mxu3 %v417_v60 }
  0xbe   :  { %913 = vmatpush.msrb.mxu0 %v367_v61  ;;  %932 = vmatpush.msrb.mxu1 %v384_v62 }
  0xbf   :  { %953 = vmatpush.msrb.mxu2 %v399_v63  ;;  %972 = vmatpush.msrb.mxu3 %v416_v0  ;;  %v521_v41 = vpop.f32.mrf.mxu0 }
  0xc0   :  { %914 = vmatpush.msrb.mxu0 %v366_v1  ;;  %933 = vmatpush.msrb.mxu1 %v383_v2  ;;  %v522_v42 = vadd.f32 %v1904_v40, %v521_v41  ;;  %v1006_v1 = vld [vmem:[%s3409_s3 + $0x8] sm:$0xff] }
  0xc1   :  { %954 = vmatpush.msrb.mxu2 %v398_v3  ;;  %973 = vmatpush.msrb.mxu3 %v415_v4 }
  0xc2   :  { %915 = vmatpush.msrb.mxu0 %v365_v5  ;;  %934 = vmatpush.msrb.mxu1 %v382_v6  ;;  %v541_v43 = vpop.f32.mrf.mxu1 }
  0xc3   :  { %955 = vmatpush.msrb.mxu2 %v397_v7  ;;  %974 = vmatpush.msrb.mxu3 %v414_v8  ;;  %v542_v44 = vadd.f32 %v541_v43, %v522_v42  ;;  %v561_v45 = vpop.f32.mrf.mxu2  ;;  %v1005_v8 = vld [vmem:[%s3409_s3] sm:$0xff]  ;;  %v1047_v42 = vld [vmem:[%s3412_s6 + $0x10] sm:$0xff] }
  0xc4   :  { %916 = vmatpush.msrb.mxu0 %v364_v9  ;;  %935 = vmatpush.msrb.mxu1 %v381_v10 }
  0xc5   :  { %956 = vmatpush.msrb.mxu2 %v396_v11  ;;  %975 = vmatpush.msrb.mxu3 %v413_v12  ;;  %v562_v46 = vadd.f32 %v561_v45, %v542_v44 }
  0xc6   :  { %917 = vmatpush.msrb.mxu0 %v363_v13  ;;  %936 = vmatpush.msrb.mxu1 %v380_v14  ;;  %v581_v47 = vpop.f32.mrf.mxu3 }
  0xc7   :  { %957 = vmatpush.msrb.mxu2 %v395_v15  ;;  %976 = vmatpush.msrb.mxu3 %v412_v16  ;;  %v582_v48 = vadd.f32 %v581_v47, %v562_v46  ;;  %v1048_v47 = vld [vmem:[%s3412_s6 + $0x18] sm:$0xff] }
  0xc8   :  { %918 = vmatpush.msrb.mxu0 %v362_v17  ;;  %937 = vmatpush.msrb.mxu1 %v379_v18 }
  0xc9   :  { %958 = vmatpush.msrb.mxu2 %v394_v19  ;;  %977 = vmatpush.msrb.mxu3 %v411_v20  ;;  %v601_v49 = vpop.f32.mrf.mxu0 }
  0xca   :  { %919 = vmatpush.msrb.mxu0 %v361_v21  ;;  %938 = vmatpush.msrb.mxu1 %v378_v22  ;;  %v602_v50 = vadd.f32 %v601_v49, %v582_v48 }
  0xcb   :  { %959 = vmatpush.msrb.mxu2 %v393_v23  ;;  %978 = vmatpush.msrb.mxu3 %v410_v24 }
  0xcc   :  { %920 = vmatmul.f32.vlgmr.msrb.gmra.mxu0 %v471_v25  ;;  %960 = vmatmul.f32.vlgmr.msrb.gmra.mxu2 %v473_v26  ;;  %v621_v51 = vpop.f32.mrf.mxu1 }
  0xcd   :  { %992 = vmatpush.msra.mxu0 %v432_v28  ;;  %939 = vmatpush.msrb.mxu1 %v377_v29  ;;  %v622_v52 = vadd.f32 %v621_v51, %v602_v50  ;;  %v641_v53 = vpop.f32.mrf.mxu2 }
  0xce   :  { %979 = vmatpush.msrb.mxu3 %v409_v31  ;;  %940 = vmatmul.f32.vlgmr.msrb.gmra.mxu1 %v472_v27  ;;  %v1045_v27 = vld [vmem:[%s3412_s6] sm:$0xff] }
  0xcf   :  { %980 = vmatmul.f32.vlgmr.msrb.gmra.mxu3 %v474_v32  ;;  %993 = vmatpush.msra.mxu0 %v431_v30  ;;  %v642_v54 = vadd.f32 %v641_v53, %v622_v52  ;;  %1117 = vst [vmem:[#allocation1] ss:$4 sm:$0xff] %v1045_v27  ;;  %v1905_v32 = vld [vmem:[%s3410_s4] ss:$0 sm:$0xff] }
  0xd0   :  { %v661_v55 = vpop.f32.mrf.mxu3  ;;  %1029 = vmatpush.msra.mxu1 %v1006_v1  ;;  %v1049_v52 = vld [vmem:[%s3412_s6 + $0x20] sm:$0xff] }
  0xd1   :  { %994 = vmatpush.msra.mxu0 %v430_v33  ;;  %v662_v57 = vadd.f32 %v661_v55, %v642_v54 }
  0xd2   :  { %1030 = vmatpush.msra.mxu1 %v1005_v8 }
  0xd3   :  { %995 = vmatpush.msra.mxu0 %v429_v34 }
  0xd5   :  { %996 = vmatpush.msra.mxu0 %v428_v35 }
  0xd6   :  { %v1120_v30 = vld.sshfl [vmem:[#allocation1] sm:$0xff pattern:$0x73625140]  ;;  %v1122_v40 = vld.sshfl [vmem:[#allocation1 + $0x10] sm:$0xff pattern:$0x73625140] }
  0xd7   :  { %997 = vmatpush.msra.mxu0 %v427_v36  ;;  %1851 = vmatpush.msk.msra.mxu2 %vm1154_vm2, %v1120_v30  ;;  %v1123_v43 = vld.sshfl [vmem:[#allocation1 + $0x18] sm:$0xff pattern:$0x73625140] }
  0xd8   :  { %1855 = vmatpush.msk.msrb.mxu1 %vm1154_vm2, %v1122_v40 }
  0xd9   :  { %998 = vmatpush.msra.mxu0 %v426_v37  ;;  %1857 = vmatpush.msk.msrb.mxu2 %vm1154_vm2, %v1123_v43 }
  0xdb   :  { %999 = vmatpush.msra.mxu0 %v425_v38  ;;  %v1046_v38 = vld [vmem:[%s3412_s6 + $0x8] sm:$0xff] }
  0xdc   :  { %1849 = vmatmul.msk.f32.vlgmr.msra.gmra.mxu0 %vm501_vm0, %v476_v39  ;;  %1119 = vst [vmem:[#allocation1 + $0x20] ss:$4 sm:$0xff] %v1046_v38  ;;  %v1121_v39 = vld.sshfl [vmem:[#allocation1 + $0x8] sm:$0xff pattern:$0x73625140] }
  0xdd   :  { %1853 = vmatpush.msk.msra.mxu3 %vm1154_vm2, %v1121_v39  ;;  %1128 = vst [vmem:[#allocation1] ss:$4 sm:$0xff] %v1047_v42  ;;  %v1053_v39 = vld [vmem:[%s3413_s7 + $0x8] sm:$0xff] }
  0xe3   :  { %v681_v56 = vpop.f32.mrf.mxu0  ;;  %v1125_v41 = vld.sshfl [vmem:[#allocation1 + $0x28] sm:$0xff pattern:$0x73625140]  ;;  %v1124_v44 = vld.sshfl [vmem:[#allocation1 + $0x20] sm:$0xff pattern:$0x73625140] }
  0xe4   :  { %v682_v58 = vadd.f32 %v681_v56, %v662_v57  ;;  %1861 = vmatpush.msk.msrb.mxu0 %vm1154_vm2, %v1125_v41  ;;  %v1126_v45 = vld.sshfl [vmem:[#allocation1 + $0x30] sm:$0xff pattern:$0x73625140]  ;;  %1859 = vmatpush.msk.msrb.mxu3 %vm1154_vm2, %v1124_v44  ;;  %v1127_v46 = vld.sshfl [vmem:[#allocation1 + $0x38] sm:$0xff pattern:$0x73625140] }
  0xe5   :  { %v1131_v48 = vld.sshfl [vmem:[#allocation1 + $0x8] sm:$0xff pattern:$0x73625140]  ;;  %1129 = vst [vmem:[#allocation1 + $0x20] ss:$4 sm:$0xff] %v1048_v47  ;;  %v1069_v44 = vperm.slane %v1053_v39, 1 }
  0xe6   :  { %v701_v59 = vpop.f32.mrf.mxu1  ;;  %1869 = vmatpush.msk.msra.mxu0 %vm1154_vm2, %v1131_v48  ;;  %v1130_v49 = vld.sshfl [vmem:[#allocation1] sm:$0xff pattern:$0x73625140]  ;;  %v1132_v50 = vld.sshfl [vmem:[#allocation1 + $0x10] sm:$0xff pattern:$0x73625140] }
  0xe7   :  { %v702_v61 = vadd.f32 %v701_v59, %v682_v58  ;;  %v1133_v51 = vld.sshfl [vmem:[#allocation1 + $0x18] sm:$0xff pattern:$0x73625140]  ;;  %v1050_v57 = vld [vmem:[%s3412_s6 + $0x28] sm:$0xff]  ;;  %v1035_v58 = vld [vmem:[%s3411_s5] sm:$0x3] }
  0xe8   :  { %1138 = vst [vmem:[#allocation1] ss:$4 sm:$0xff] %v1049_v52 }
  0xe9   :  { %v721_v60 = vpop.f32.mrf.mxu2 }
  0xea   :  { %v722_v62 = vadd.f32 %v721_v60, %v702_v61 }
  0xec   :  { %v741_v63 = vpop.f32.mrf.mxu3  ;;  %v1134_v53 = vld.sshfl [vmem:[#allocation1 + $0x20] sm:$0xff pattern:$0x73625140]  ;;  %v1136_v54 = vld.sshfl [vmem:[#allocation1 + $0x30] sm:$0xff pattern:$0x73625140] }
  0xed   :  { %v742_v2 = vadd.f32 %v741_v63, %v722_v62  ;;  %v1135_v55 = vld.sshfl [vmem:[#allocation1 + $0x28] sm:$0xff pattern:$0x73625140]  ;;  %v1137_v56 = vld.sshfl [vmem:[#allocation1 + $0x38] sm:$0xff pattern:$0x73625140] }
  0xee   :  { %1139 = vst [vmem:[#allocation1 + $0x20] ss:$4 sm:$0xff] %v1050_v57 }
  0xef   :  { %v1143_v63 = vld.sshfl [vmem:[#allocation1 + $0x18] sm:$0xff pattern:$0x73625140]  ;;  %v1140_v1 = vld.sshfl [vmem:[#allocation1] sm:$0xff pattern:$0x73625140] }
 0x105   :  { %v761_v0 = vpop.f32.mrf.mxu0 }
 0x106   :  { %v762_v3 = vadd.f32 %v761_v0, %v742_v2  ;;  %v1141_v0 = vld.sshfl [vmem:[#allocation1 + $0x8] sm:$0xff pattern:$0x73625140]  ;;  %v1142_v2 = vld.sshfl [vmem:[#allocation1 + $0x10] sm:$0xff pattern:$0x73625140] }
 0x108   :  { %v781_v4 = vpop.f32.mrf.mxu1 }
 0x109   :  { %v782_v6 = vadd.f32 %v781_v4, %v762_v3  ;;  %v1051_v3 = vld [vmem:[%s3412_s6 + $0x30] sm:$0x3]  ;;  %v1145_v4 = vld.sshfl [vmem:[#allocation1 + $0x28] sm:$0xff pattern:$0x73625140]  ;;  %s1962_s6 = smov [#allocation2]  }
 0x10a   :  { %1148 = vst [vmem:[#allocation1] ss:$4 sm:$0xff] %v1051_v3  ;;  %s1820_s25 = sshll.u32 %s1962_s6, 4  ;;  %s1821_s25 = int_to_ptr.vmem [resolvable:$true] %s1820_s25 }
 0x10b   :  { %v801_v5 = vpop.f32.mrf.mxu2 }
 0x10c   :  { %v802_v7 = vadd.f32 %v801_v5, %v782_v6  ;;  %v1144_v5 = vld.sshfl [vmem:[#allocation1 + $0x20] sm:$0xff pattern:$0x73625140]  ;;  %v1146_v6 = vld.sshfl [vmem:[#allocation1 + $0x30] sm:$0xff pattern:$0x73625140] }
 0x10e   :  { %v821_v9 = vpop.f32.mrf.mxu3 }
 0x10f   :  { %v822_v11 = vadd.f32 %v821_v9, %v802_v7  ;;  %v1147_v7 = vld.sshfl [vmem:[#allocation1 + $0x38] sm:$0xff pattern:$0x73625140] }
 0x111   :  { %v1149_v8 = vld.sshfl [vmem:[#allocation1] sm:$0xff pattern:$0x73625140] }
 0x127   :  { %v841_v10 = vpop.f32.mrf.mxu0 }
 0x128   :  { %v842_v12 = vadd.f32 %v841_v10, %v822_v11  ;;  %v1052_v10 = vld [vmem:[%s3413_s7] sm:$0xff] }
 0x129   :  { %v1061_v11 = vperm.slane %v1052_v10, 1  ;;  %v1064_v30 = vperm.slane %v1052_v10, 4 }
 0x12a   :  { %v861_v13 = vpop.f32.mrf.mxu1 }
 0x12b   :  { %v862_v15 = vadd.f32 %v861_v13, %v842_v12 }
 0x12d   :  { %v881_v14 = vpop.f32.mrf.mxu2 }
 0x12e   :  { %v882_v16 = vadd.f32 %v881_v14, %v862_v15  ;;  %v1062_v14 = vperm.slane %v1052_v10, 2 }
 0x130   :  { %v901_v17 = vpop.f32.mrf.mxu3 }
 0x131   :  { %v902_v19 = vadd.f32 %v901_v17, %v882_v16 }
 0x149   :  { %v921_v18 = vpop.f32.mrf.mxu0 }
 0x14a   :  { %v922_v20 = vadd.f32 %v921_v18, %v902_v19  ;;  %v1060_v19 = vperm.slane %v1052_v10, 0 }
 0x14b   :  { %v941_v21 = vpop.f32.mrf.mxu1 }
 0x14c   :  { %v942_v23 = vadd.f32 %v941_v21, %v922_v20  ;;  %v1063_v20 = vperm.slane %v1052_v10, 3 }
 0x14f   :  { %v961_v22 = vpop.f32.mrf.mxu2 }
 0x150   :  { %v962_v24 = vadd.f32 %v961_v22, %v942_v23  ;;  %v1065_v22 = vperm.slane %v1052_v10, 5 }
 0x152   :  { %v981_v25 = vpop.f32.mrf.mxu3 }
 0x153   :  { %v982_v26 = vadd.f32 %v981_v25, %v962_v24 }
 0x159   :  { %v1001_v28 = vpop.f32.mrf.mxu0 }
 0x15a   :  { %v1002_v29 = vadd.f32 %v1001_v28, %v982_v26  ;;  %v1066_v28 = vperm.slane %v1052_v10, 6 }
 0x15c   :  { %v1004_v31 = vmax.f32 %v1002_v29, 0.0 }
 0x15e   :  { %1850 = vmatmul.msk.f32.vlgmr.msra.gmra.mxu1 %vm1011_vm1, %v1004_v31 }
 0x15f   :  { %1863 = vmatpush.msk.msra.mxu1 %vm1154_vm2, %v1126_v45 }
 0x1db   :  { %v1032_v33 = vpop.f32.mrf.mxu1 }
 0x1dc   :  { %v1033_v34 = vadd.f32 %v1905_v32, %v1032_v33 }
 0x1de   :  { %v1036_v35 = vmul.f32 0.5, %v1033_v34  ;;  %1807 = vst.msk [vmem:[#allocation2] sm:$0x3] %vm1806_vm3, %v1033_v34 }
 0x1df   :  { %1825 = dma.vmem_to_hbm [thread:$0]  %s1821_s25, 32, %s1823_s1, [#allocation3]  }
 0x1e0   :  { %v1037_v36 = vmul.f32 1.442695, %v1036_v35  ;;  %v1067_v35 = vperm.slane %v1052_v10, 7 }
 0x1e2   :  { %1907 = vpow2.f32 %v1037_v36 }
 0x1e8   :  { %v1908_v37 = vpop.eup %1907 }
 0x1e9   :  { %1040 = vrot.lane.b32.xlu0 %v1908_v37, %s1961_s13 }
 0x1f1   :  { %1809 = vrot.lane.b32.xlu0 %v1033_v34, %s1961_s13 }
 0x25b   :  { %v1041_v59 = vpop.permute.xlu0 %1040 }
 0x25c   :  { %v1043_v60 = vmul.f32 %v1041_v59, %v1035_v58 }
 0x25e   :  { %v1044_v61 = vadd.f32 %v1043_v60, %v1033_v34 }
 0x260   :  { %1852 = vmatmul.msk.f32.vlgmr.msra.gmra.mxu2 %vm1150_vm4, %v1044_v61  ;;  %1854 = vmatmul.msk.f32.vlgmr.msra.gmra.mxu3 %vm1150_vm4, %v1044_v61 }
 0x261   :  { %1856 = vmatmul.msk.f32.vlgmr.msrb.gmra.mxu1 %vm1150_vm4, %v1044_v61  ;;  %1862 = vmatmul.msk.f32.vlgmr.msrb.gmra.mxu0 %vm1150_vm4, %v1044_v61 }
 0x262   :  { %1865 = vmatpush.msk.msra.mxu2 %vm1154_vm2, %v1127_v46  ;;  %1867 = vmatpush.msk.msra.mxu3 %vm1154_vm2, %v1130_v49 }
 0x263   :  { %v1810_v62 = vpop.permute.xlu0 %1809  ;;  %1871 = vmatpush.msk.msrb.mxu1 %vm1154_vm2, %v1132_v50  ;;  %1877 = vmatpush.msk.msrb.mxu0 %vm1154_vm2, %v1135_v55  ;;  %v1070_v50 = vperm.slane %v1053_v39, 2 }
 0x264   :  { %1812 = vst.msk [vmem:[#allocation4] sm:$0x3] %vm1806_vm3, %v1810_v62 }
 0x265   :  { %1836 = dma.vmem_to_hbm [thread:$0]  %s1832_s28, 32, %s1834_s30, [#allocation5]  }
 0x268   :  { %1858 = vmatmul.msk.f32.vlgmr.msrb.gmra.mxu2 %vm1150_vm4, %v1044_v61  ;;  %1860 = vmatmul.msk.f32.vlgmr.msrb.gmra.mxu3 %vm1150_vm4, %v1044_v61 }
 0x269   :  { %1864 = vmatmul.msk.f32.vlgmr.msra.gmra.mxu1 %vm1150_vm4, %v1044_v61  ;;  %1870 = vmatmul.msk.f32.vlgmr.msra.gmra.mxu0 %vm1150_vm4, %v1044_v61 }
 0x26a   :  { %1873 = vmatpush.msk.msrb.mxu2 %vm1154_vm2, %v1133_v51  ;;  %1875 = vmatpush.msk.msrb.mxu3 %vm1154_vm2, %v1134_v53 }
 0x26b   :  { %1879 = vmatpush.msk.msra.mxu1 %vm1154_vm2, %v1136_v54  ;;  %1885 = vmatpush.msk.msra.mxu0 %vm1154_vm2, %v1141_v0  ;;  %v1068_v54 = vperm.slane %v1053_v39, 0 }
 0x270   :  { %1866 = vmatmul.msk.f32.vlgmr.msra.gmra.mxu2 %vm1150_vm4, %v1044_v61  ;;  %1868 = vmatmul.msk.f32.vlgmr.msra.gmra.mxu3 %vm1150_vm4, %v1044_v61 }
 0x271   :  { %1872 = vmatmul.msk.f32.vlgmr.msrb.gmra.mxu1 %vm1150_vm4, %v1044_v61  ;;  %1878 = vmatmul.msk.f32.vlgmr.msrb.gmra.mxu0 %vm1150_vm4, %v1044_v61 }
 0x272   :  { %1881 = vmatpush.msk.msra.mxu2 %vm1154_vm2, %v1137_v56  ;;  %1883 = vmatpush.msk.msra.mxu3 %vm1154_vm2, %v1140_v1  ;;  %v1071_v56 = vperm.slane %v1053_v39, 3 }
 0x273   :  { %1887 = vmatpush.msk.msrb.mxu1 %vm1154_vm2, %v1142_v2  ;;  %1893 = vmatpush.msk.msrb.mxu0 %vm1154_vm2, %v1145_v4 }
 0x278   :  { %1874 = vmatmul.msk.f32.vlgmr.msrb.gmra.mxu2 %vm1150_vm4, %v1044_v61  ;;  %1876 = vmatmul.msk.f32.vlgmr.msrb.gmra.mxu3 %vm1150_vm4, %v1044_v61 }
 0x279   :  { %1880 = vmatmul.msk.f32.vlgmr.msra.gmra.mxu1 %vm1150_vm4, %v1044_v61  ;;  %1886 = vmatmul.msk.f32.vlgmr.msra.gmra.mxu0 %vm1150_vm4, %v1044_v61 }
 0x27a   :  { %1889 = vmatpush.msk.msrb.mxu2 %vm1154_vm2, %v1143_v63  ;;  %1891 = vmatpush.msk.msrb.mxu3 %vm1154_vm2, %v1144_v5 }
 0x27b   :  { %1895 = vmatpush.msk.msra.mxu1 %vm1154_vm2, %v1146_v6 }
 0x280   :  { %1882 = vmatmul.msk.f32.vlgmr.msra.gmra.mxu2 %vm1150_vm4, %v1044_v61  ;;  %1884 = vmatmul.msk.f32.vlgmr.msra.gmra.mxu3 %vm1150_vm4, %v1044_v61 }
 0x281   :  { %1888 = vmatmul.msk.f32.vlgmr.msrb.gmra.mxu1 %vm1150_vm4, %v1044_v61  ;;  %1894 = vmatmul.msk.f32.vlgmr.msrb.gmra.mxu0 %vm1150_vm4, %v1044_v61 }
 0x282   :  { %1897 = vmatpush.msk.msra.mxu2 %vm1154_vm2, %v1147_v7  ;;  %1899 = vmatpush.msk.msra.mxu3 %vm1154_vm2, %v1149_v8  ;;  %v1073_v7 = vperm.slane %v1053_v39, 5  ;;  %v1074_v8 = vperm.slane %v1053_v39, 6 }
 0x288   :  { %1890 = vmatmul.msk.f32.vlgmr.msrb.gmra.mxu2 %vm1150_vm4, %v1044_v61  ;;  %1892 = vmatmul.msk.f32.vlgmr.msrb.gmra.mxu3 %vm1150_vm4, %v1044_v61 }
 0x289   :  { %1896 = vmatmul.msk.f32.vlgmr.msra.gmra.mxu1 %vm1150_vm4, %v1044_v61 }
 0x290   :  { %1898 = vmatmul.msk.f32.vlgmr.msra.gmra.mxu2 %vm1150_vm4, %v1044_v61  ;;  %1900 = vmatmul.msk.f32.vlgmr.msra.gmra.mxu3 %vm1150_vm4, %v1044_v61 }
 0x2de   :  { %v1262_v9 = vpop.f32.mrf.mxu1  ;;  %v1322_v15 = vpop.f32.mrf.mxu0 }
 0x2df   :  { %v1263_v18 = vadd.f32 %v1262_v9, %v1062_v14  ;;  %v1323_v34 = vadd.f32 %v1322_v15, %v1065_v22  ;;  %v1075_v14 = vperm.slane %v1053_v39, 7 }
 0x2e1   :  { %v1707_v25 = vmax.f32 %v1263_v18, 0.0  ;;  %v1710_v48 = vmax.f32 %v1323_v34, 0.0  ;;  %v1054_v18 = vld [vmem:[%s3413_s7 + $0x10] sm:$0xff] }
 0x2e3   :  { %v1222_v12 = vpop.f32.mrf.mxu2  ;;  %v1242_v13 = vpop.f32.mrf.mxu3  ;;  %v1755_v36 = vrot.slane %v1707_v25, 4  ;;  %v1757_v57 = vrot.slane %v1710_v48, 6  ;;  %v1077_v25 = vperm.slane %v1054_v18, 1 }
 0x2e4   :  { %v1243_v16 = vadd.f32 %v1242_v13, %v1061_v11  ;;  %v1223_v26 = vadd.f32 %v1222_v12, %v1060_v19  ;;  %v1072_v12 = vperm.slane %v1053_v39, 4 }
 0x2e6   :  { %v1342_v17 = vpop.f32.mrf.mxu1  ;;  %v1706_v21 = vmax.f32 %v1243_v16, 0.0  ;;  %v1402_v27 = vpop.f32.mrf.mxu0  ;;  %v1705_v37 = vmax.f32 %v1223_v26, 0.0 }
 0x2e7   :  { %v1343_v38 = vadd.f32 %v1342_v17, %v1066_v28  ;;  %v1403_v55 = vadd.f32 %v1402_v27, %v1069_v44 }
 0x2e8   :  { %v1754_v31 = vrot.slane %v1706_v21, 6 }
 0x2e9   :  { %v1711_v49 = vmax.f32 %v1343_v38, 0.0  ;;  %v1714_v2 = vmax.f32 %v1403_v55, 0.0 }
 0x2ea   :  { %v1772_v41 = vsel %vm1154_vm2, %v1705_v37, %v1754_v31  ;;  %v1079_v37 = vperm.slane %v1054_v18, 3 }
 0x2eb   :  { %v1282_v23 = vpop.f32.mrf.mxu2  ;;  %v1302_v24 = vpop.f32.mrf.mxu3  ;;  %v1758_v58 = vrot.slane %v1711_v49, 4  ;;  %v1760_v13 = vrot.slane %v1714_v2, 6 }
 0x2ec   :  { %v1283_v29 = vadd.f32 %v1282_v23, %v1063_v20  ;;  %v1303_v43 = vadd.f32 %v1302_v24, %v1064_v30 }
 0x2ee   :  { %v1708_v32 = vmax.f32 %v1283_v29, 0.0  ;;  %v1422_v33 = vpop.f32.mrf.mxu1  ;;  %v1709_v52 = vmax.f32 %v1303_v43, 0.0  ;;  %v1482_v60 = vpop.f32.mrf.mxu0 }
 0x2ef   :  { %v1423_v59 = vadd.f32 %v1422_v33, %v1070_v50  ;;  %v1483_v16 = vadd.f32 %v1482_v60, %v1073_v7  ;;  %v1081_v50 = vperm.slane %v1054_v18, 5 }
 0x2f0   :  { %v1756_v40 = vrot.slane %v1708_v32, 2  ;;  %v1777_v63 = vsel %vm1154_vm2, %v1709_v52, %v1757_v57  ;;  %v1078_v32 = vperm.slane %v1054_v18, 2  ;;  %v1080_v57 = vperm.slane %v1054_v18, 4 }
 0x2f1   :  { %v1715_v6 = vmax.f32 %v1423_v59, 0.0  ;;  %v1718_v31 = vmax.f32 %v1483_v16, 0.0  ;;  %v1083_v59 = vperm.slane %v1054_v18, 7 }
 0x2f2   :  { %v1774_v42 = vsel %vm1773_vm5, %v1755_v36, %v1756_v40 }
 0x2f3   :  { %v1776_v45 = vsel %vm1775_vm6, %v1772_v41, %v1774_v42  ;;  %v1362_v46 = vpop.f32.mrf.mxu2  ;;  %v1382_v47 = vpop.f32.mrf.mxu3  ;;  %v1761_v15 = vrot.slane %v1715_v6, 4  ;;  %v1763_v38 = vrot.slane %v1718_v31, 6 }
 0x2f4   :  { %1798 = vst [vmem:[%s3414_s8] sm:$0xff] %v1776_v45  ;;  %v1363_v51 = vadd.f32 %v1362_v46, %v1067_v35  ;;  %v1383_v1 = vadd.f32 %v1382_v47, %v1068_v54  ;;  %v1076_v35 = vperm.slane %v1054_v18, 0 }
 0x2f6   :  { %v1712_v53 = vmax.f32 %v1363_v51, 0.0  ;;  %v1502_v62 = vpop.f32.mrf.mxu1  ;;  %v1713_v10 = vmax.f32 %v1383_v1, 0.0  ;;  %v1562_v21 = vpop.f32.mrf.mxu0  ;;  %v1082_v51 = vperm.slane %v1054_v18, 6 }
 0x2f7   :  { %v1503_v17 = vadd.f32 %v1502_v62, %v1074_v8  ;;  %v1563_v36 = vadd.f32 %v1562_v21, %v1077_v25 }
 0x2f8   :  { %v1759_v61 = vrot.slane %v1712_v53, 2  ;;  %v1780_v20 = vsel %vm1154_vm2, %v1713_v10, %v1760_v13 }
 0x2f9   :  { %v1719_v27 = vmax.f32 %v1503_v17, 0.0  ;;  %v1722_v45 = vmax.f32 %v1563_v36, 0.0 }
 0x2fa   :  { %v1778_v0 = vsel %vm1773_vm5, %v1758_v58, %v1759_v61 }
 0x2fb   :  { %v1779_v3 = vsel %vm1775_vm6, %v1777_v63, %v1778_v0  ;;  %v1442_v4 = vpop.f32.mrf.mxu2  ;;  %v1462_v5 = vpop.f32.mrf.mxu3  ;;  %v1764_v39 = vrot.slane %v1719_v27, 4  ;;  %v1766_v58 = vrot.slane %v1722_v45, 6  ;;  %v1906_v0 = vld [vmem:[%s3413_s7 + $0x18] ss:$0 sm:$0xff] }
 0x2fc   :  { %1799 = vst [vmem:[%s3414_s8 + $0x8] sm:$0xff] %v1779_v3  ;;  %v1443_v9 = vadd.f32 %v1442_v4, %v1071_v56  ;;  %v1463_v23 = vadd.f32 %v1462_v5, %v1072_v12 }
 0x2fe   :  { %v1716_v11 = vmax.f32 %v1443_v9, 0.0  ;;  %v1582_v24 = vpop.f32.mrf.mxu1  ;;  %v1717_v33 = vmax.f32 %v1463_v23, 0.0  ;;  %v1642_v53 = vpop.f32.mrf.mxu0 }
 0x2ff   :  { %v1583_v40 = vadd.f32 %v1582_v24, %v1078_v32  ;;  %v1643_v61 = vadd.f32 %v1642_v53, %v1081_v50 }
 0x300   :  { %v1762_v19 = vrot.slane %v1716_v11, 2  ;;  %v1783_v42 = vsel %vm1154_vm2, %v1717_v33, %v1763_v38 }
 0x301   :  { %v1723_v49 = vmax.f32 %v1583_v40, 0.0  ;;  %v1726_v7 = vmax.f32 %v1643_v61, 0.0 }
 0x302   :  { %v1781_v22 = vsel %vm1773_vm5, %v1761_v15, %v1762_v19 }
 0x303   :  { %v1782_v26 = vsel %vm1775_vm6, %v1780_v20, %v1781_v22  ;;  %v1522_v28 = vpop.f32.mrf.mxu2  ;;  %v1542_v29 = vpop.f32.mrf.mxu3  ;;  %v1767_v60 = vrot.slane %v1723_v49, 4 }
 0x304   :  { %1800 = vst [vmem:[%s3414_s8 + $0x10] sm:$0xff] %v1782_v26  ;;  %v1523_v30 = vadd.f32 %v1522_v28, %v1075_v14  ;;  %v1543_v44 = vadd.f32 %v1542_v29, %v1076_v35  ;;  %v1769_v14 = vrot.slane %v1726_v7, 6 }
 0x306   :  { %v1720_v34 = vmax.f32 %v1523_v30, 0.0  ;;  %v1662_v54 = vpop.f32.mrf.mxu1  ;;  %v1721_v55 = vmax.f32 %v1543_v44, 0.0 }
 0x307   :  { %v1663_v62 = vadd.f32 %v1662_v54, %v1082_v51 }
 0x308   :  { %v1765_v41 = vrot.slane %v1720_v34, 2  ;;  %v1786_v1 = vsel %vm1154_vm2, %v1721_v55, %v1766_v58 }
 0x309   :  { %v1727_v8 = vmax.f32 %v1663_v62, 0.0 }
 0x30a   :  { %v1784_v43 = vsel %vm1773_vm5, %v1764_v39, %v1765_v41 }
 0x30b   :  { %v1785_v46 = vsel %vm1775_vm6, %v1783_v42, %v1784_v43  ;;  %v1602_v47 = vpop.f32.mrf.mxu2  ;;  %v1622_v48 = vpop.f32.mrf.mxu3  ;;  %v1770_v15 = vrot.slane %v1727_v8, 4 }
 0x30c   :  { %1801 = vst [vmem:[%s3414_s8 + $0x18] sm:$0xff] %v1785_v46  ;;  %v1603_v52 = vadd.f32 %v1602_v47, %v1079_v37  ;;  %v1623_v3 = vadd.f32 %v1622_v48, %v1080_v57 }
 0x30e   :  { %v1724_v56 = vmax.f32 %v1603_v52, 0.0  ;;  %v1725_v11 = vmax.f32 %v1623_v3, 0.0 }
 0x310   :  { %v1768_v63 = vrot.slane %v1724_v56, 2  ;;  %v1789_v17 = vsel %vm1154_vm2, %v1725_v11, %v1769_v14 }
 0x312   :  { %v1787_v2 = vsel %vm1773_vm5, %v1767_v60, %v1768_v63 }
 0x313   :  { %v1788_v4 = vsel %vm1775_vm6, %v1786_v1, %v1787_v2  ;;  %v1682_v5 = vpop.f32.mrf.mxu2  ;;  %v1702_v6 = vpop.f32.mrf.mxu3 }
 0x314   :  { %1802 = vst [vmem:[%s3414_s8 + $0x20] sm:$0xff] %v1788_v4  ;;  %v1683_v9 = vadd.f32 %v1682_v5, %v1083_v59  ;;  %v1703_v10 = vadd.f32 %v1906_v0, %v1702_v6 }
 0x316   :  { %v1728_v12 = vmax.f32 %v1683_v9, 0.0  ;;  %v1729_v13 = vmax.f32 %v1703_v10, 0.0 }
 0x318   :  { %v1771_v16 = vrot.slane %v1728_v12, 2  ;;  %1805 = vst.msk [vmem:[%s3414_s8 + $0x30] sm:$0x3] %vm1804_vm7, %v1729_v13 }
 0x31a   :  { %v1790_v18 = vsel %vm1773_vm5, %v1770_v15, %v1771_v16 }
 0x31b   :  { %v1791_v19 = vsel %vm1775_vm6, %v1789_v17, %v1790_v18 }
 0x31c   :  { %1803 = vst [vmem:[%s3414_s8 + $0x28] sm:$0xff] %v1791_v19 }
 0x31d   :  { %1957 = dma.done.wait [#allocation3], 32  }
 0x31e   :  { %1958 = vsyncadd [#allocation3], 4294967264 }
 0x31f   :  { %1959 = dma.done.wait [#allocation5], 32  }
 0x320   :  { %1960 = vsyncadd [#allocation5], 4294967264 }
 0x321   :  { %1847 = vsyncpa [#allocation3], 1 }
 0x322   :  { %1848 = vsyncpa [#allocation5], 1 }

// kernel: vae_forward.8
= control target key start
LH: loop header
LB: loop body
LE: loop exit
PB: predicated region body
PF: predicated region fallthrough
CT: control target
= control target key end

     0   :  { %s729_s1 = inlined_call_operand.vmem [shape: bf16[256,128], index: 1, kind: input, shape index: {}]   ;;  %s730_s2 = inlined_call_operand.vmem [shape: f32[1,128], index: 2, kind: input, shape index: {}]   ;;  %s731_s0 = inlined_call_operand.vmem [shape: bf16[98,256], index: 0, kind: input, shape index: {}]   ;;  %s732_s3 = inlined_call_operand.vmem [shape: bf16[98,128], index: 3, kind: output, shape index: {}]  }
   0x1   :  { %v486_v0 = vld [vmem:[%s729_s1 + $0x38] sm:$0xff]  ;;  %v485_v2 = vld [vmem:[%s729_s1 + $0x30] sm:$0xff]  ;;  %v484_v4 = vld [vmem:[%s729_s1 + $0x28] sm:$0xff] }
   0x2   :  { %v494_v1 = vld [vmem:[%s729_s1 + $0x78] sm:$0xff]  ;;  %226 = vmatpush.bf16.msra.mxu0 %v486_v0  ;;  %530 = vmatpush.bf16.msra.mxu2 %v486_v0  ;;  %v493_v3 = vld [vmem:[%s729_s1 + $0x70] sm:$0xff]  ;;  %v492_v5 = vld [vmem:[%s729_s1 + $0x68] sm:$0xff] }
   0x3   :  { %269 = vmatpush.bf16.msra.mxu1 %v494_v1  ;;  %538 = vmatpush.bf16.msra.mxu3 %v494_v1  ;;  %v483_v6 = vld [vmem:[%s729_s1 + $0x20] sm:$0xff]  ;;  %v482_v8 = vld [vmem:[%s729_s1 + $0x18] sm:$0xff]  ;;  %v481_v10 = vld [vmem:[%s729_s1 + $0x10] sm:$0xff] }
   0x4   :  { %v491_v7 = vld [vmem:[%s729_s1 + $0x60] sm:$0xff]  ;;  %v490_v9 = vld [vmem:[%s729_s1 + $0x58] sm:$0xff]  ;;  %v489_v11 = vld [vmem:[%s729_s1 + $0x50] sm:$0xff] }
   0x5   :  { %v480_v12 = vld [vmem:[%s729_s1 + $0x8] sm:$0xff]  ;;  %v479_v14 = vld [vmem:[%s729_s1] sm:$0xff]  ;;  %v381_v18 = vld [vmem:[%s731_s0 + $0x30] sm:$0xf] }
   0x6   :  { %227 = vmatpush.bf16.msra.mxu0 %v485_v2  ;;  %531 = vmatpush.bf16.msra.mxu2 %v485_v2  ;;  %v488_v13 = vld [vmem:[%s729_s1 + $0x48] sm:$0xff]  ;;  %v487_v15 = vld [vmem:[%s729_s1 + $0x40] sm:$0xff]  ;;  %v474_v19 = vld [vmem:[%s731_s0 + $0x34] sm:$0xf0] }
   0x7   :  { %270 = vmatpush.bf16.msra.mxu1 %v493_v3  ;;  %539 = vmatpush.bf16.msra.mxu3 %v493_v3  ;;  %v357_v16 = vld [vmem:[%s731_s0] sm:$0xf]  ;;  %v468_v17 = vld [vmem:[%s731_s0 + $0x4] sm:$0xf0]  ;;  %v467_v20 = vld [vmem:[%s731_s0 + $0x4] sm:$0xf]  ;;  %v382_v25 = vor.u32 %v474_v19, %v381_v18 }
   0x8   :  { %v359_v21 = vld [vmem:[%s731_s0 + $0x8] sm:$0xf0]  ;;  %v475_v22 = vld [vmem:[%s731_s0 + $0x44] sm:$0xf]  ;;  %v358_v24 = vor.u32 %v468_v17, %v357_v16  ;;  %v365_v28 = vld [vmem:[%s731_s0 + $0x10] sm:$0xf] }
   0x9   :  { %v391_v23 = vld [vmem:[%s731_s0 + $0x48] sm:$0xf0]  ;;  %v362_v26 = vor.u32 %v467_v20, %v359_v21  ;;  %v470_v29 = vld [vmem:[%s731_s0 + $0x14] sm:$0xf0]  ;;  %v389_v30 = vld [vmem:[%s731_s0 + $0x40] sm:$0xf] }
   0xa   :  { %228 = vmatpush.bf16.msra.mxu0 %v484_v4  ;;  %532 = vmatpush.bf16.msra.mxu2 %v484_v4  ;;  %v394_v27 = vor.u32 %v475_v22, %v391_v23  ;;  %v476_v31 = vld [vmem:[%s731_s0 + $0x44] sm:$0xf0]  ;;  %v469_v32 = vld [vmem:[%s731_s0 + $0x14] sm:$0xf]  ;;  %v367_v33 = vld [vmem:[%s731_s0 + $0x18] sm:$0xf0]  ;;  %v366_v36 = vor.u32 %v470_v29, %v365_v28 }
   0xb   :  { %271 = vmatpush.bf16.msra.mxu1 %v492_v5  ;;  %540 = vmatpush.bf16.msra.mxu3 %v492_v5  ;;  %v477_v34 = vld [vmem:[%s731_s0 + $0x54] sm:$0xf]  ;;  %v399_v35 = vld [vmem:[%s731_s0 + $0x58] sm:$0xf0]  ;;  %v390_v37 = vor.u32 %v476_v31, %v389_v30  ;;  %v370_v38 = vor.u32 %v469_v32, %v367_v33  ;;  %v26_v40 = vld [vmem:[%s731_s0 + $0x60] sm:$0x11] }
   0xc   :  { %v402_v39 = vor.u32 %v477_v34, %v399_v35  ;;  %v373_v41 = vld [vmem:[%s731_s0 + $0x20] sm:$0xf]  ;;  %v472_v42 = vld [vmem:[%s731_s0 + $0x24] sm:$0xf0]  ;;  %v397_v43 = vld [vmem:[%s731_s0 + $0x50] sm:$0xf]  ;;  %v101_v45 = vunpack.c.h.b16 %v26_v40  ;;  %v100_v52 = vunpack.c.l.b16 %v26_v40 }
   0xd   :  { %v478_v44 = vld [vmem:[%s731_s0 + $0x54] sm:$0xf0]  ;;  %v471_v46 = vld [vmem:[%s731_s0 + $0x24] sm:$0xf]  ;;  %v375_v47 = vld [vmem:[%s731_s0 + $0x28] sm:$0xf0]  ;;  %v374_v48 = vor.u32 %v472_v42, %v373_v41 }
   0xe   :  { %229 = vmatpush.bf16.msra.mxu0 %v483_v6  ;;  %533 = vmatpush.bf16.msra.mxu2 %v483_v6  ;;  %v398_v49 = vor.u32 %v478_v44, %v397_v43  ;;  %v378_v50 = vor.u32 %v471_v46, %v375_v47  ;;  %v115_v51 = vpack.c.b16 %v101_v45, %v101_v45  ;;  %v473_v53 = vld [vmem:[%s731_s0 + $0x34] sm:$0xf]  ;;  %v383_v54 = vld [vmem:[%s731_s0 + $0x38] sm:$0xf0]  ;;  %v693_v58 = vld [vmem:[%s730_s2] ss:$0 sm:$0xff] }
   0xf   :  { %272 = vmatpush.bf16.msra.mxu1 %v491_v7  ;;  %541 = vmatpush.bf16.msra.mxu3 %v491_v7  ;;  %v114_v55 = vpack.c.b16 %v100_v52, %v100_v52  ;;  %v386_v56 = vor.u32 %v473_v53, %v383_v54 }
  0x12   :  { %230 = vmatpush.bf16.msra.mxu0 %v482_v8  ;;  %534 = vmatpush.bf16.msra.mxu2 %v482_v8 }
  0x13   :  { %273 = vmatpush.bf16.msra.mxu1 %v490_v9  ;;  %542 = vmatpush.bf16.msra.mxu3 %v490_v9 }
  0x16   :  { %231 = vmatpush.bf16.msra.mxu0 %v481_v10  ;;  %535 = vmatpush.bf16.msra.mxu2 %v481_v10 }
  0x17   :  { %274 = vmatpush.bf16.msra.mxu1 %v489_v11  ;;  %543 = vmatpush.bf16.msra.mxu3 %v489_v11 }
  0x1a   :  { %232 = vmatpush.bf16.msra.mxu0 %v480_v12  ;;  %536 = vmatpush.bf16.msra.mxu2 %v480_v12 }
  0x1b   :  { %275 = vmatpush.bf16.msra.mxu1 %v488_v13  ;;  %544 = vmatpush.bf16.msra.mxu3 %v488_v13 }
  0x1e   :  { %233 = vmatpush.bf16.msra.mxu0 %v479_v14  ;;  %537 = vmatpush.bf16.msra.mxu2 %v479_v14 }
  0x1f   :  { %276 = vmatpush.bf16.msra.mxu1 %v487_v15  ;;  %545 = vmatpush.bf16.msra.mxu3 %v487_v15 }
  0x21   :  { %234 = vmatmul.bf16.vlgmr.msra.gmra.mxu0 %v358_v24  ;;  %249 = vmatmul.bf16.vlgmr.msra.gmra.mxu2 %v382_v25 }
  0x22   :  { %277 = vmatmul.bf16.vlgmr.msra.gmra.mxu1 %v362_v26  ;;  %297 = vmatmul.bf16.vlgmr.msra.gmra.mxu3 %v394_v27 }
  0x31   :  { %239 = vmatmul.bf16.gmra.mxu0 %v366_v36  ;;  %254 = vmatmul.bf16.gmra.mxu2 %v390_v37 }
  0x32   :  { %282 = vmatmul.bf16.gmra.mxu1 %v370_v38  ;;  %302 = vmatmul.bf16.gmra.mxu3 %v402_v39 }
  0x41   :  { %244 = vmatmul.bf16.gmra.mxu0 %v374_v48  ;;  %259 = vmatmul.bf16.gmra.mxu2 %v398_v49 }
  0x42   :  { %287 = vmatmul.bf16.gmra.mxu1 %v378_v50  ;;  %307 = vmatmul.bf16.gmra.mxu3 %v115_v51 }
  0x51   :  { %264 = vmatmul.bf16.gmra.mxu2 %v114_v55 }
  0x52   :  { %292 = vmatmul.bf16.gmra.mxu1 %v386_v56 }
  0x9e   :  { %v235_v57 = vpop.f32.mrf.mxu0 }
  0x9f   :  { %v278_v59 = vpop.f32.mrf.mxu1  ;;  %v236_v60 = vadd.f32 %v693_v58, %v235_v57 }
  0xa1   :  { %v279_v0 = vadd.f32 %v278_v59, %v236_v60 }
  0xa3   :  { %v312_v4 = vmax.f32 %v279_v0, 0.0 }
  0xa4   :  { %v250_v61 = vpop.f32.mrf.mxu2 }
  0xa5   :  { %v298_v62 = vpop.f32.mrf.mxu3  ;;  %v251_v54 = vadd.f32 %v693_v58, %v250_v61 }
  0xa6   :  { %v237_v63 = vpop.f32.mrf.mxu0 }
  0xa7   :  { %v238_v1 = vadd.f32 %v693_v58, %v237_v63  ;;  %v280_v2 = vpop.f32.mrf.mxu1 }
  0xa9   :  { %v281_v3 = vadd.f32 %v280_v2, %v238_v1 }
  0xab   :  { %v313_v5 = vmax.f32 %v281_v3, 0.0 }
  0xac   :  { %v252_v6 = vpop.f32.mrf.mxu2 }
  0xad   :  { %v498_v7 = vpack.c.bf16 %v313_v5, %v312_v4  ;;  %v300_v8 = vpop.f32.mrf.mxu3  ;;  %v253_v57 = vadd.f32 %v693_v58, %v252_v6 }
  0xae   :  { %v240_v9 = vpop.f32.mrf.mxu0 }
  0xaf   :  { %499 = vst [vmem:[%s732_s3] sm:$0xff] %v498_v7   ;;  %v283_v10 = vpop.f32.mrf.mxu1  ;;  %v241_v11 = vadd.f32 %v693_v58, %v240_v9 }
  0xb1   :  { %v284_v15 = vadd.f32 %v283_v10, %v241_v11 }
  0xb3   :  { %v314_v20 = vmax.f32 %v284_v15, 0.0 }
  0xb4   :  { %v255_v12 = vpop.f32.mrf.mxu2 }
  0xb5   :  { %v303_v13 = vpop.f32.mrf.mxu3  ;;  %v256_v18 = vadd.f32 %v693_v58, %v255_v12 }
  0xb6   :  { %v242_v14 = vpop.f32.mrf.mxu0 }
  0xb7   :  { %v243_v16 = vadd.f32 %v693_v58, %v242_v14  ;;  %v285_v17 = vpop.f32.mrf.mxu1  ;;  %v299_v23 = vadd.f32 %v298_v62, %v256_v18 }
  0xb9   :  { %v286_v19 = vadd.f32 %v285_v17, %v243_v16  ;;  %v320_v30 = vmax.f32 %v299_v23, 0.0 }
  0xbb   :  { %v315_v21 = vmax.f32 %v286_v19, 0.0 }
  0xbc   :  { %v257_v22 = vpop.f32.mrf.mxu2 }
  0xbd   :  { %v503_v24 = vpack.c.bf16 %v315_v21, %v314_v20  ;;  %v258_v25 = vadd.f32 %v693_v58, %v257_v22  ;;  %v305_v26 = vpop.f32.mrf.mxu3 }
  0xbe   :  { %v245_v27 = vpop.f32.mrf.mxu0 }
  0xbf   :  { %525 = vst [vmem:[%s732_s3 + $0x8] sm:$0xff] %v503_v24   ;;  %v301_v28 = vadd.f32 %v300_v8, %v258_v25  ;;  %v288_v29 = vpop.f32.mrf.mxu1  ;;  %v246_v33 = vadd.f32 %v693_v58, %v245_v27 }
  0xc1   :  { %v321_v31 = vmax.f32 %v301_v28, 0.0  ;;  %v289_v37 = vadd.f32 %v288_v29, %v246_v33 }
  0xc3   :  { %v518_v32 = vpack.c.bf16 %v321_v31, %v320_v30  ;;  %v316_v42 = vmax.f32 %v289_v37, 0.0 }
  0xc4   :  { %v260_v34 = vpop.f32.mrf.mxu2 }
  0xc5   :  { %528 = vst [vmem:[%s732_s3 + $0x20] sm:$0xff] %v518_v32   ;;  %v308_v35 = vpop.f32.mrf.mxu3  ;;  %v261_v40 = vadd.f32 %v693_v58, %v260_v34 }
  0xc6   :  { %v247_v36 = vpop.f32.mrf.mxu0 }
  0xc7   :  { %v248_v38 = vadd.f32 %v693_v58, %v247_v36  ;;  %v290_v39 = vpop.f32.mrf.mxu1  ;;  %v304_v45 = vadd.f32 %v303_v13, %v261_v40 }
  0xc9   :  { %v291_v41 = vadd.f32 %v290_v39, %v248_v38  ;;  %v322_v51 = vmax.f32 %v304_v45, 0.0 }
  0xcb   :  { %v317_v43 = vmax.f32 %v291_v41, 0.0 }
  0xcc   :  { %v262_v44 = vpop.f32.mrf.mxu2 }
  0xcd   :  { %v508_v46 = vpack.c.bf16 %v317_v43, %v316_v42  ;;  %v263_v47 = vadd.f32 %v693_v58, %v262_v44  ;;  %v310_v48 = vpop.f32.mrf.mxu3 }
  0xcf   :  { %526 = vst [vmem:[%s732_s3 + $0x10] sm:$0xff] %v508_v46   ;;  %v306_v49 = vadd.f32 %v305_v26, %v263_v47  ;;  %v293_v50 = vpop.f32.mrf.mxu1 }
  0xd0   :  { %v294_v59 = vadd.f32 %v293_v50, %v251_v54 }
  0xd1   :  { %v323_v52 = vmax.f32 %v306_v49, 0.0 }
  0xd2   :  { %v318_v1 = vmax.f32 %v294_v59, 0.0 }
  0xd3   :  { %v523_v53 = vpack.c.bf16 %v323_v52, %v322_v51 }
  0xd4   :  { %v265_v55 = vpop.f32.mrf.mxu2 }
  0xd5   :  { %529 = vst [vmem:[%s732_s3 + $0x28] sm:$0xff] %v523_v53   ;;  %v266_v56 = vadd.f32 %v693_v58, %v265_v55 }
  0xd7   :  { %v309_v60 = vadd.f32 %v308_v35, %v266_v56  ;;  %v295_v62 = vpop.f32.mrf.mxu1 }
  0xd8   :  { %v296_v63 = vadd.f32 %v295_v62, %v253_v57 }
  0xd9   :  { %v324_v0 = vmax.f32 %v309_v60, 0.0 }
  0xda   :  { %v319_v2 = vmax.f32 %v296_v63, 0.0 }
  0xdb   :  { %v337_v3 = vpack.c.bf16 %v324_v0, %v324_v0 }
  0xdc   :  { %v513_v4 = vpack.c.bf16 %v319_v2, %v318_v1  ;;  %v267_v5 = vpop.f32.mrf.mxu2 }
  0xdd   :  { %350 = vst [vmem:[%s732_s3 + $0x30] sm:$0x1] %v337_v3 }
  0xde   :  { %527 = vst [vmem:[%s732_s3 + $0x18] sm:$0xff] %v513_v4  }

// kernel: vae_forward.9
= control target key start
LH: loop header
LB: loop body
LE: loop exit
PB: predicated region body
PF: predicated region fallthrough
CT: control target
= control target key end

     0   :  { %vm1343_vm4 = vcmask 31744   ;;  %s3128_s1 = inlined_call_operand.vmem [shape: bf16[128,4], index: 1, kind: input, shape index: {}]   ;;  %s3129_s2 = inlined_call_operand.vmem [shape: f32[1,4], index: 2, kind: input, shape index: {}]   ;;  %s3130_s0 = inlined_call_operand.vmem [shape: bf16[392,128], index: 0, kind: input, shape index: {}]   ;;  %s3131_s3 = inlined_call_operand.vmem [shape: f32[392,4], index: 3, kind: output, shape index: {}]  }
   0x1   :  { %v1605_v0 = vld [vmem:[%s3128_s1 + $0x38] sm:$0xff]  ;;  %v1604_v1 = vld [vmem:[%s3128_s1 + $0x30] sm:$0xff]  ;;  %v1603_v2 = vld [vmem:[%s3128_s1 + $0x28] sm:$0xff] }
   0x2   :  { %1607 = vmatpush.bf16.msra.mxu2 %v1605_v0  ;;  %279 = vmatpush.bf16.msra.mxu0 %v1605_v0  ;;  %v1602_v3 = vld [vmem:[%s3128_s1 + $0x20] sm:$0xff]  ;;  %v1601_v4 = vld [vmem:[%s3128_s1 + $0x18] sm:$0xff]  ;;  %v1600_v5 = vld [vmem:[%s3128_s1 + $0x10] sm:$0xff] }
   0x3   :  { %1606 = vmatpush.bf16.msra.mxu1 %v1605_v0  ;;  %1608 = vmatpush.bf16.msra.mxu3 %v1605_v0  ;;  %v1599_v6 = vld [vmem:[%s3128_s1 + $0x8] sm:$0xff]  ;;  %v1598_v7 = vld [vmem:[%s3128_s1] sm:$0xff]  ;;  %v1580_v10 = vld [vmem:[%s3130_s0 + $0x30] sm:$0xff] }
   0x4   :  { %v1586_v8 = vld [vmem:[%s3130_s0 + $0x60] sm:$0xff]  ;;  %v1593_v11 = vld [vmem:[%s3130_s0 + $0x98] sm:$0xff]  ;;  %v1587_v12 = vld [vmem:[%s3130_s0 + $0x68] sm:$0xff] }
   0x5   :  { %v1574_v9 = vld [vmem:[%s3130_s0] sm:$0xff]  ;;  %v1575_v13 = vld [vmem:[%s3130_s0 + $0x8] sm:$0xff]  ;;  %v1581_v14 = vld [vmem:[%s3130_s0 + $0x38] sm:$0xff] }
   0x6   :  { %1610 = vmatpush.bf16.msra.mxu2 %v1604_v1  ;;  %280 = vmatpush.bf16.msra.mxu0 %v1604_v1  ;;  %v1594_v15 = vld [vmem:[%s3130_s0 + $0xa0] sm:$0xff]  ;;  %v1588_v16 = vld [vmem:[%s3130_s0 + $0x70] sm:$0xff]  ;;  %v1595_v19 = vld [vmem:[%s3130_s0 + $0xa8] sm:$0xff] }
   0x7   :  { %1609 = vmatpush.bf16.msra.mxu1 %v1604_v1  ;;  %1611 = vmatpush.bf16.msra.mxu3 %v1604_v1  ;;  %v1576_v17 = vld [vmem:[%s3130_s0 + $0x10] sm:$0xff]  ;;  %v1582_v18 = vld [vmem:[%s3130_s0 + $0x40] sm:$0xff]  ;;  %v1589_v20 = vld [vmem:[%s3130_s0 + $0x78] sm:$0xff] }
   0x8   :  { %v1577_v21 = vld [vmem:[%s3130_s0 + $0x18] sm:$0xff]  ;;  %v1583_v22 = vld [vmem:[%s3130_s0 + $0x48] sm:$0xff]  ;;  %v1596_v23 = vld [vmem:[%s3130_s0 + $0xb0] sm:$0xff] }
   0x9   :  { %v1590_v24 = vld [vmem:[%s3130_s0 + $0x80] sm:$0xff]  ;;  %v1584_v26 = vld [vmem:[%s3130_s0 + $0x50] sm:$0xff]  ;;  %v1597_v27 = vld [vmem:[%s3130_s0 + $0xb8] sm:$0xff] }
   0xa   :  { %1613 = vmatpush.bf16.msra.mxu2 %v1603_v2  ;;  %281 = vmatpush.bf16.msra.mxu0 %v1603_v2  ;;  %v1578_v25 = vld [vmem:[%s3130_s0 + $0x20] sm:$0xff]  ;;  %v1591_v30 = vld [vmem:[%s3130_s0 + $0x88] sm:$0xff]  ;;  %v1585_v32 = vld [vmem:[%s3130_s0 + $0x58] sm:$0xff] }
   0xb   :  { %1612 = vmatpush.bf16.msra.mxu1 %v1603_v2  ;;  %1614 = vmatpush.bf16.msra.mxu3 %v1603_v2  ;;  %v62_v28 = vld [vmem:[%s3130_s0 + $0xc0] sm:$0xf]  ;;  %v1579_v31 = vld [vmem:[%s3130_s0 + $0x28] sm:$0xff]  ;;  %v1592_v34 = vld [vmem:[%s3130_s0 + $0x90] sm:$0xff] }
   0xc   :  { %v180_v29 = vunpack.c.l.b16 %v62_v28  ;;  %v1950_v35 = vld [vmem:[%s3129_s2] ss:$0 sm:$0xff] }
   0xe   :  { %1616 = vmatpush.bf16.msra.mxu2 %v1602_v3  ;;  %282 = vmatpush.bf16.msra.mxu0 %v1602_v3  ;;  %v205_v33 = vpack.c.b16 %v180_v29, %v180_v29 }
   0xf   :  { %1615 = vmatpush.bf16.msra.mxu1 %v1602_v3  ;;  %1617 = vmatpush.bf16.msra.mxu3 %v1602_v3 }
  0x12   :  { %1619 = vmatpush.bf16.msra.mxu2 %v1601_v4  ;;  %283 = vmatpush.bf16.msra.mxu0 %v1601_v4 }
  0x13   :  { %1618 = vmatpush.bf16.msra.mxu1 %v1601_v4  ;;  %1620 = vmatpush.bf16.msra.mxu3 %v1601_v4 }
  0x16   :  { %1622 = vmatpush.bf16.msra.mxu2 %v1600_v5  ;;  %284 = vmatpush.bf16.msra.mxu0 %v1600_v5 }
  0x17   :  { %1621 = vmatpush.bf16.msra.mxu1 %v1600_v5  ;;  %1623 = vmatpush.bf16.msra.mxu3 %v1600_v5 }
  0x1a   :  { %1625 = vmatpush.bf16.msra.mxu2 %v1599_v6  ;;  %285 = vmatpush.bf16.msra.mxu0 %v1599_v6 }
  0x1b   :  { %1624 = vmatpush.bf16.msra.mxu1 %v1599_v6  ;;  %1626 = vmatpush.bf16.msra.mxu3 %v1599_v6 }
  0x1e   :  { %1628 = vmatpush.bf16.msra.mxu2 %v1598_v7  ;;  %286 = vmatpush.bf16.msra.mxu0 %v1598_v7 }
  0x1f   :  { %1627 = vmatpush.bf16.msra.mxu1 %v1598_v7  ;;  %1629 = vmatpush.bf16.msra.mxu3 %v1598_v7 }
  0x21   :  { %347 = vmatmul.bf16.vlgmr.msra.gmra.mxu2 %v1586_v8  ;;  %287 = vmatmul.bf16.vlgmr.msra.gmra.mxu0 %v1574_v9 }
  0x22   :  { %317 = vmatmul.bf16.vlgmr.msra.gmra.mxu1 %v1580_v10  ;;  %382 = vmatmul.bf16.vlgmr.msra.gmra.mxu3 %v1593_v11 }
  0x31   :  { %352 = vmatmul.bf16.gmra.mxu2 %v1587_v12  ;;  %292 = vmatmul.bf16.gmra.mxu0 %v1575_v13 }
  0x32   :  { %322 = vmatmul.bf16.gmra.mxu1 %v1581_v14  ;;  %387 = vmatmul.bf16.gmra.mxu3 %v1594_v15 }
  0x41   :  { %357 = vmatmul.bf16.gmra.mxu2 %v1588_v16  ;;  %297 = vmatmul.bf16.gmra.mxu0 %v1576_v17 }
  0x42   :  { %327 = vmatmul.bf16.gmra.mxu1 %v1582_v18  ;;  %392 = vmatmul.bf16.gmra.mxu3 %v1595_v19 }
  0x51   :  { %362 = vmatmul.bf16.gmra.mxu2 %v1589_v20  ;;  %302 = vmatmul.bf16.gmra.mxu0 %v1577_v21 }
  0x52   :  { %332 = vmatmul.bf16.gmra.mxu1 %v1583_v22  ;;  %397 = vmatmul.bf16.gmra.mxu3 %v1596_v23 }
  0x61   :  { %367 = vmatmul.bf16.gmra.mxu2 %v1590_v24  ;;  %307 = vmatmul.bf16.gmra.mxu0 %v1578_v25 }
  0x62   :  { %337 = vmatmul.bf16.gmra.mxu1 %v1584_v26  ;;  %402 = vmatmul.bf16.gmra.mxu3 %v1597_v27 }
  0x71   :  { %372 = vmatmul.bf16.gmra.mxu2 %v1591_v30  ;;  %312 = vmatmul.bf16.gmra.mxu0 %v1579_v31 }
  0x72   :  { %342 = vmatmul.bf16.gmra.mxu1 %v1585_v32  ;;  %407 = vmatmul.bf16.gmra.mxu3 %v205_v33 }
  0x81   :  { %377 = vmatmul.bf16.gmra.mxu2 %v1592_v34 }
  0x9e   :  { %v288_v36 = vpop.f32.mrf.mxu0 }
  0x9f   :  { %v289_v37 = vadd.f32 %v1950_v35, %v288_v36  ;;  %v318_v38 = vpop.f32.mrf.mxu1 }
  0xa0   :  { %v319_v39 = vadd.f32 %v1950_v35, %v318_v38 }
  0xa1   :  { %v1525_v40 = vmul.f32 -1.442695, %v289_v37 }
  0xa2   :  { %v1537_v41 = vmul.f32 -1.442695, %v319_v39 }
  0xa3   :  { %1631 = vpow2.f32 %v1525_v40 }
  0xa4   :  { %1633 = vpow2.f32 %v1537_v41  ;;  %v348_v42 = vpop.f32.mrf.mxu2 }
  0xa5   :  { %v349_v43 = vadd.f32 %v1950_v35, %v348_v42  ;;  %v383_v44 = vpop.f32.mrf.mxu3 }
  0xa6   :  { %v290_v45 = vpop.f32.mrf.mxu0  ;;  %v384_v46 = vadd.f32 %v1950_v35, %v383_v44 }
  0xa7   :  { %v1549_v47 = vmul.f32 -1.442695, %v349_v43  ;;  %v291_v48 = vadd.f32 %v1950_v35, %v290_v45  ;;  %v320_v49 = vpop.f32.mrf.mxu1 }
  0xa8   :  { %v321_v50 = vadd.f32 %v1950_v35, %v320_v49  ;;  %v1563_v51 = vmul.f32 -1.442695, %v384_v46 }
  0xa9   :  { %v1632_v52 = vpop.eup %1631  ;;  %1635 = vpow2.f32 %v1549_v47  ;;  %v1526_v53 = vmul.f32 -1.442695, %v291_v48 }
  0xaa   :  { %v1634_v54 = vpop.eup %1633  ;;  %v559_v55 = vadd.f32 1.0, %v1632_v52  ;;  %v1538_v56 = vmul.f32 -1.442695, %v321_v50  ;;  %1637 = vpow2.f32 %v1563_v51 }
  0xab   :  { %v1958_v57 = vadd.f32 1.0, %v1634_v54  ;;  %1639 = vpow2.f32 %v1526_v53 }
  0xac   :  { %1641 = vrcp.f32 %v559_v55  ;;  %v350_v58 = vpop.f32.mrf.mxu2  ;;  %v617_v59 = vand.u32 2147483647, %v559_v55  ;;  %v619_v60 = vand.u32 2147483648, %v559_v55  ;;  %vm613_vm0 = vweird.f32 %v559_v55 }
  0xad   :  { %1643 = vrcp.f32 %v1958_v57  ;;  %v385_v61 = vpop.f32.mrf.mxu3  ;;  %v797_v62 = vand.u32 2147483647, %v1958_v57  ;;  %v799_v63 = vand.u32 2147483648, %v1958_v57  ;;  %v351_v0 = vadd.f32 %v1950_v35, %v350_v58 }
  0xae   :  { %1645 = vpow2.f32 %v1538_v56  ;;  %v293_v2 = vpop.f32.mrf.mxu0  ;;  %v386_v6 = vadd.f32 %v1950_v35, %v385_v61  ;;  %vm1968_vm1 = vcmp.eq.f32.partialorder %v617_v59, 8.507059e+37  ;;  %v620_v9 = vor.u32 1.1754944e-38, %v619_v60 }
  0xaf   :  { %v1636_v1 = vpop.eup %1635  ;;  %v294_v5 = vadd.f32 %v1950_v35, %v293_v2  ;;  %vm793_vm2 = vweird.f32 %v1958_v57  ;;  %v323_v11 = vpop.f32.mrf.mxu1  ;;  %vm1975_vm3 = vcmp.eq.f32.partialorder %v797_v62, 8.507059e+37  ;;  %v800_v14 = vor.u32 1.1754944e-38, %v799_v63 }
  0xb0   :  { %v1638_v3 = vpop.eup %1637  ;;  %v1964_v4 = vadd.f32 1.0, %v1636_v1  ;;  %v1980_v15 = vmul.f32 -1.442695, %v351_v0  ;;  %v1983_v16 = vadd.f32 %v1950_v35, %v323_v11  ;;  %v1993_v25 = vmul.f32 -1.442695, %v386_v6 }
  0xb1   :  { %v1640_v7 = vpop.eup %1639  ;;  %v1973_v10 = vadd.f32 1.0, %v1638_v3  ;;  %v1991_v24 = vmul.f32 -1.442695, %v294_v5 }
  0xb2   :  { %v1642_v12 = vpop.eup %1641  ;;  %1647 = vrcp.f32 %v1964_v4  ;;  %v979_v19 = vand.u32 2147483648, %v1964_v4  ;;  %v1986_v20 = vadd.f32 1.0, %v1640_v7  ;;  %v977_v23 = vand.u32 2147483647, %v1964_v4 }
  0xb3   :  { %v1644_v17 = vpop.eup %1643  ;;  %v609_v18 = vmul.f32 %v1642_v12, %v559_v55  ;;  %1649 = vrcp.f32 %v1973_v10  ;;  %vm614_vm5 = vweird.f32 %v1642_v12  ;;  %vm973_vm7 = vweird.f32 %v1964_v4 }
  0xb4   :  { %v1646_v21 = vpop.eup %1645  ;;  %v789_v22 = vmul.f32 %v1644_v17, %v1958_v57  ;;  %vm794_vm6 = vweird.f32 %v1644_v17  ;;  %1651 = vrcp.f32 %v1986_v20  ;;  %v632_v28 = vand.u32 2147483647, %v1986_v20  ;;  %vm2004_vm10 = vmor %vm613_vm0, %vm614_vm5  ;;  %v353_v53 = vpop.f32.mrf.mxu2 }
  0xb5   :  { %v610_v26 = vsub.f32 1.0, %v609_v18  ;;  %v634_v29 = vand.u32 2147483648, %v1986_v20  ;;  %v1999_v30 = vadd.f32 1.0, %v1646_v21  ;;  %v980_v32 = vor.u32 1.1754944e-38, %v979_v19  ;;  %vm2016_vm11 = vmor %vm793_vm2, %vm794_vm6  ;;  %v388_v2 = vpop.f32.mrf.mxu3 }
  0xb6   :  { %v790_v27 = vsub.f32 1.0, %v789_v22  ;;  %vm628_vm8 = vweird.f32 %v1986_v20  ;;  %vm1183_vm9 = vweird.f32 %v1973_v10  ;;  %v1187_v37 = vand.u32 2147483647, %v1973_v10  ;;  %v295_v61 = vpop.f32.mrf.mxu0 }
  0xb7   :  { %v611_v31 = vmul.f32 %v1642_v12, %v610_v26  ;;  %1653 = vrcp.f32 %v1999_v30  ;;  %v1189_v38 = vand.u32 2147483648, %v1973_v10  ;;  %vm2021_vm12 = vcmp.eq.f32.partialorder %v977_v23, 8.507059e+37 }
  0xb8   :  { %v1648_v33 = vpop.eup %1647  ;;  %v791_v36 = vmul.f32 %v1644_v17, %v790_v27  ;;  %v2025_v44 = vor.u32 1.1754944e-38, %v634_v29  ;;  %vm808_vm13 = vweird.f32 %v1999_v30  ;;  %vm2028_vm15 = vcmp.eq.f32.partialorder %v632_v28, 8.507059e+37 }
  0xb9   :  { %v2011_v39 = vpop.eup %1649  ;;  %v612_v40 = vadd.f32 %v1642_v12, %v611_v31  ;;  %v969_v42 = vmul.f32 %v1648_v33, %v1964_v4  ;;  %vm974_vm14 = vweird.f32 %v1648_v33  ;;  %v812_v47 = vand.u32 2147483647, %v1999_v30 }
  0xba   :  { %v792_v45 = vadd.f32 %v1644_v17, %v791_v36  ;;  %v1179_v48 = vmul.f32 %v2011_v39, %v1973_v10  ;;  %v1652_v49 = vpop.eup %1651  ;;  %v814_v52 = vand.u32 2147483648, %v1999_v30  ;;  %vm1184_vm0 = vweird.f32 %v2011_v39 }
  0xbb   :  { %v616_v50 = vsel %vm2004_vm10, %v1642_v12, %v612_v40  ;;  %v970_v51 = vsub.f32 1.0, %v969_v42  ;;  %v624_v56 = vmul.f32 %v1652_v49, %v1986_v20  ;;  %vm2044_vm2 = vcmp.eq.f32.partialorder %v1187_v37, 8.507059e+37  ;;  %vm2073_vm6 = vmor %vm1183_vm9, %vm1184_vm0  ;;  %v325_v12 = vpop.f32.mrf.mxu1 }
  0xbc   :  { %v621_v54 = vsel %vm1968_vm1, %v620_v9, %v616_v50  ;;  %v796_v55 = vsel %vm2016_vm11, %v1644_v17, %v792_v45  ;;  %vm629_vm5 = vweird.f32 %v1652_v49  ;;  %v1180_v60 = vsub.f32 1.0, %v1179_v48  ;;  %vm2063_vm1 = vmor %vm973_vm7, %vm974_vm14 }
  0xbd   :  { %1344 = vst.msk [vmem:[%s3131_s3] sm:$0xff] %vm1343_vm4, %v621_v54  ;;  %v801_v58 = vsel %vm1975_vm3, %v800_v14, %v796_v55  ;;  %v971_v59 = vmul.f32 %v1648_v33, %v970_v51  ;;  %v1654_v62 = vpop.eup %1653  ;;  %v625_v63 = vsub.f32 1.0, %v624_v56  ;;  %v1190_v0 = vor.u32 1.1754944e-38, %v1189_v38  ;;  %vm2085_vm7 = vmor %vm628_vm8, %vm629_vm5 }
  0xbe   :  { %1356 = vst.msk [vmem:[%s3131_s3 + $0x60] sm:$0xff] %vm1343_vm4, %v801_v58  ;;  %1655 = vpow2.f32 %v1980_v15  ;;  %v1539_v1 = vmul.f32 -1.442695, %v1983_v16  ;;  %v804_v6 = vmul.f32 %v1654_v62, %v1999_v30  ;;  %vm809_vm3 = vweird.f32 %v1654_v62 }
  0xbf   :  { %v972_v3 = vadd.f32 %v1648_v33, %v971_v59  ;;  %v1181_v7 = vmul.f32 %v2011_v39, %v1180_v60  ;;  %v626_v8 = vmul.f32 %v1652_v49, %v625_v63  ;;  %1657 = vpow2.f32 %v1991_v24  ;;  %vm2106_vm8 = vmor %vm808_vm13, %vm809_vm3 }
  0xc0   :  { %v354_v4 = vadd.f32 %v1950_v35, %v353_v53  ;;  %v296_v11 = vadd.f32 %v1950_v35, %v295_v61  ;;  %v805_v10 = vsub.f32 1.0, %v804_v6  ;;  %1659 = vpow2.f32 %v1539_v1 }
  0xc1   :  { %v976_v13 = vsel %vm2063_vm1, %v1648_v33, %v972_v3  ;;  %v1182_v15 = vadd.f32 %v2011_v39, %v1181_v7  ;;  %v627_v17 = vadd.f32 %v1652_v49, %v626_v8  ;;  %1661 = vpow2.f32 %v1993_v25 }
  0xc2   :  { %v981_v16 = vsel %vm2021_vm12, %v980_v32, %v976_v13  ;;  %v1551_v18 = vmul.f32 -1.442695, %v354_v4  ;;  %v806_v19 = vmul.f32 %v1654_v62, %v805_v10  ;;  %v1528_v21 = vmul.f32 -1.442695, %v296_v11  ;;  %v355_v32 = vpop.f32.mrf.mxu2 }
  0xc3   :  { %1368 = vst.msk [vmem:[%s3131_s3 + $0xc0] sm:$0xff] %vm1343_vm4, %v981_v16  ;;  %v1186_v20 = vsel %vm2073_vm6, %v2011_v39, %v1182_v15  ;;  %v326_v22 = vadd.f32 %v1950_v35, %v325_v12  ;;  %v631_v24 = vsel %vm2085_vm7, %v1652_v49, %v627_v17  ;;  %vm2110_vm9 = vcmp.eq.f32.partialorder %v812_v47, 8.507059e+37 }
  0xc4   :  { %v1656_v23 = vpop.eup %1655  ;;  %v815_v27 = vor.u32 1.1754944e-38, %v814_v52  ;;  %v1191_v28 = vsel %vm2044_vm2, %v1190_v0, %v1186_v20  ;;  %v636_v29 = vsel %vm2028_vm15, %v2025_v44, %v631_v24  ;;  %v807_v31 = vadd.f32 %v1654_v62, %v806_v19  ;;  %v390_v44 = vpop.f32.mrf.mxu3 }
  0xc5   :  { %1382 = vst.msk [vmem:[%s3131_s3 + $0x130] sm:$0xff] %vm1343_vm4, %v1191_v28  ;;  %v2123_v30 = vadd.f32 1.0, %v1656_v23  ;;  %1663 = vpow2.f32 %v1551_v18  ;;  %v1658_v33 = vpop.eup %1657  ;;  %v1540_v34 = vmul.f32 -1.442695, %v326_v22  ;;  %v389_v38 = vadd.f32 %v1950_v35, %v388_v2  ;;  %v298_v24 = vpop.f32.mrf.mxu0 }
  0xc6   :  { %1345 = vst.msk [vmem:[%s3131_s3 + $0x8] sm:$0xff] %vm1343_vm4, %v636_v29  ;;  %1665 = vpow2.f32 %v1528_v21  ;;  %v1660_v36 = vpop.eup %1659  ;;  %v811_v37 = vsel %vm2106_vm8, %v1654_v62, %v807_v31  ;;  %v2135_v41 = vadd.f32 1.0, %v1658_v33  ;;  %v356_v43 = vadd.f32 %v1950_v35, %v355_v32 }
  0xc7   :  { %1667 = vrcp.f32 %v2123_v30  ;;  %v1662_v39 = vpop.eup %1661  ;;  %v816_v40 = vsel %vm2110_vm9, %v815_v27, %v811_v37  ;;  %v2137_v42 = vadd.f32 1.0, %v1660_v36  ;;  %v994_v45 = vand.u32 2147483648, %v2123_v30 }
  0xc8   :  { %1357 = vst.msk [vmem:[%s3131_s3 + $0x68] sm:$0xff] %vm1343_vm4, %v816_v40  ;;  %v2145_v46 = vadd.f32 1.0, %v1662_v39  ;;  %1669 = vpow2.f32 %v1540_v34  ;;  %v992_v47 = vand.u32 2147483647, %v2123_v30  ;;  %v647_v49 = vand.u32 2147483647, %v2135_v41 }
  0xc9   :  { %1671 = vrcp.f32 %v2135_v41  ;;  %v1565_v50 = vmul.f32 -1.442695, %v389_v38  ;;  %v2152_v51 = vadd.f32 %v1950_v35, %v390_v44  ;;  %vm988_vm10 = vweird.f32 %v2123_v30 }
  0xca   :  { %1673 = vrcp.f32 %v2137_v42  ;;  %v649_v53 = vand.u32 2147483648, %v2135_v41  ;;  %v827_v54 = vand.u32 2147483647, %v2137_v42  ;;  %v2158_v55 = vmul.f32 -1.442695, %v356_v43 }
  0xcb   :  { %v1664_v48 = vpop.eup %1663  ;;  %1675 = vrcp.f32 %v2145_v46  ;;  %v995_v57 = vor.u32 1.1754944e-38, %v994_v45  ;;  %vm643_vm11 = vweird.f32 %v2135_v41  ;;  %vm823_vm12 = vweird.f32 %v2137_v42 }
  0xcc   :  { %v1666_v52 = vpop.eup %1665  ;;  %v829_v58 = vand.u32 2147483648, %v2137_v42  ;;  %vm2164_vm13 = vcmp.eq.f32.partialorder %v992_v47, 8.507059e+37  ;;  %v1202_v61 = vand.u32 2147483647, %v2145_v46  ;;  %v1204_v62 = vand.u32 2147483648, %v2145_v46 }
  0xcd   :  { %v1668_v56 = vpop.eup %1667  ;;  %v2170_v63 = vadd.f32 1.0, %v1664_v48  ;;  %vm2172_vm14 = vcmp.eq.f32.partialorder %v647_v49, 8.507059e+37  ;;  %vm1198_vm15 = vweird.f32 %v2145_v46  ;;  %v2177_v2 = vadd.f32 1.0, %v1666_v52 }
  0xce   :  { %v984_v59 = vmul.f32 %v1668_v56, %v2123_v30  ;;  %v1670_v0 = vpop.eup %1669  ;;  %1677 = vpow2.f32 %v1565_v50  ;;  %v650_v6 = vor.u32 1.1754944e-38, %v649_v53  ;;  %vm2179_vm0 = vcmp.eq.f32.partialorder %v827_v54, 8.507059e+37  ;;  %v328_v30 = vpop.f32.mrf.mxu1 }
  0xcf   :  { %v1672_v3 = vpop.eup %1671  ;;  %1679 = vrcp.f32 %v2170_v63  ;;  %vm989_vm2 = vweird.f32 %v1668_v56  ;;  %v830_v4 = vor.u32 1.1754944e-38, %v829_v58  ;;  %vm2187_vm5 = vcmp.eq.f32.partialorder %v1202_v61, 8.507059e+37  ;;  %v358_v58 = vpop.f32.mrf.mxu2 }
  0xd0   :  { %v985_v5 = vsub.f32 1.0, %v984_v59  ;;  %v1674_v8 = vpop.eup %1673  ;;  %v639_v9 = vmul.f32 %v1672_v3, %v2135_v41  ;;  %1681 = vrcp.f32 %v2177_v2  ;;  %v1205_v10 = vor.u32 1.1754944e-38, %v1204_v62  ;;  %vm990_vm6 = vmor %vm988_vm10, %vm989_vm2 }
  0xd1   :  { %v1676_v11 = vpop.eup %1675  ;;  %v819_v13 = vmul.f32 %v1674_v8, %v2137_v42  ;;  %vm644_vm1 = vweird.f32 %v1672_v3  ;;  %v1007_v17 = vand.u32 2147483647, %v2170_v63  ;;  %vm824_vm3 = vweird.f32 %v1674_v8 }
  0xd2   :  { %v986_v12 = vmul.f32 %v1668_v56, %v985_v5  ;;  %v640_v15 = vsub.f32 1.0, %v639_v9  ;;  %v1194_v16 = vmul.f32 %v1676_v11, %v2145_v46  ;;  %v1009_v20 = vand.u32 2147483648, %v2170_v63  ;;  %vm2201_vm9 = vmor %vm643_vm11, %vm644_vm1  ;;  %v300_v5 = vpop.f32.mrf.mxu0 }
  0xd3   :  { %v820_v19 = vsub.f32 1.0, %v819_v13  ;;  %vm1199_vm7 = vweird.f32 %v1676_v11  ;;  %vm658_vm8 = vweird.f32 %v2177_v2  ;;  %v662_v29 = vand.u32 2147483647, %v2177_v2  ;;  %vm2213_vm10 = vmor %vm823_vm12, %vm824_vm3 }
  0xd4   :  { %v987_v18 = vadd.f32 %v1668_v56, %v986_v12  ;;  %v1678_v21 = vpop.eup %1677  ;;  %v641_v22 = vmul.f32 %v1672_v3, %v640_v15  ;;  %v1195_v23 = vsub.f32 1.0, %v1194_v16  ;;  %v2206_v31 = vadd.f32 1.0, %v1670_v0  ;;  %vm2225_vm11 = vmor %vm1198_vm15, %vm1199_vm7 }
  0xd5   :  { %v1680_v25 = vpop.eup %1679  ;;  %v821_v28 = vmul.f32 %v1674_v8, %v820_v19  ;;  %v664_v42 = vand.u32 2147483648, %v2177_v2  ;;  %v2231_v43 = vadd.f32 1.0, %v1678_v21  ;;  %vm2255_vm15 = vcmp.eq.f32.partialorder %v1007_v17, 8.507059e+37 }
  0xd6   :  { %v991_v26 = vsel %vm990_vm6, %v1668_v56, %v987_v18  ;;  %v1682_v32 = vpop.eup %1681  ;;  %v642_v34 = vadd.f32 %v1672_v3, %v641_v22  ;;  %v1196_v37 = vmul.f32 %v1676_v11, %v1195_v23  ;;  %v999_v38 = vmul.f32 %v1680_v25, %v2170_v63 }
  0xd7   :  { %v996_v33 = vsel %vm2164_vm13, %v995_v57, %v991_v26  ;;  %v822_v39 = vadd.f32 %v1674_v8, %v821_v28  ;;  %v654_v41 = vmul.f32 %v1682_v32, %v2177_v2  ;;  %vm659_vm12 = vweird.f32 %v1682_v32 }
  0xd8   :  { %1369 = vst.msk [vmem:[%s3131_s3 + $0xc8] sm:$0xff] %vm1343_vm4, %v996_v33  ;;  %v646_v44 = vsel %vm2201_vm9, %v1672_v3, %v642_v34  ;;  %v1197_v45 = vadd.f32 %v1676_v11, %v1196_v37  ;;  %v1000_v47 = vsub.f32 1.0, %v999_v38  ;;  %1683 = vrcp.f32 %v2206_v31 }
  0xd9   :  { %v651_v48 = vsel %vm2172_vm14, %v650_v6, %v646_v44  ;;  %v826_v46 = vsel %vm2213_vm10, %v1674_v8, %v822_v39  ;;  %v655_v49 = vsub.f32 1.0, %v654_v41  ;;  %vm1004_vm13 = vweird.f32 %v1680_v25 }
  0xda   :  { %1346 = vst.msk [vmem:[%s3131_s3 + $0x10] sm:$0xff] %vm1343_vm4, %v651_v48  ;;  %v831_v50 = vsel %vm2179_vm0, %v830_v4, %v826_v46  ;;  %v1201_v52 = vsel %vm2225_vm11, %v1676_v11, %v1197_v45  ;;  %v1001_v53 = vmul.f32 %v1680_v25, %v1000_v47  ;;  %vm1003_vm14 = vweird.f32 %v2170_v63  ;;  %vm2266_vm0 = vmor %vm658_vm8, %vm659_vm12  ;;  %v330_v4 = vpop.f32.mrf.mxu1 }
  0xdb   :  { %1358 = vst.msk [vmem:[%s3131_s3 + $0x70] sm:$0xff] %vm1343_vm4, %v831_v50  ;;  %v1206_v54 = vsel %vm2187_vm5, %v1205_v10, %v1201_v52  ;;  %v656_v57 = vmul.f32 %v1682_v32, %v655_v49  ;;  %v1010_v60 = vor.u32 1.1754944e-38, %v1009_v20  ;;  %v665_v62 = vor.u32 1.1754944e-38, %v664_v42  ;;  %vm1005_vm2 = vmor %vm1003_vm14, %vm1004_vm13  ;;  %v303_v52 = vpop.f32.mrf.mxu0 }
  0xdc   :  { %1383 = vst.msk [vmem:[%s3131_s3 + $0x138] sm:$0xff] %vm1343_vm4, %v1206_v54  ;;  %v1002_v59 = vadd.f32 %v1680_v25, %v1001_v53  ;;  %1685 = vrcp.f32 %v2231_v43  ;;  %vm663_vm5 = vcmp.eq.f32.partialorder %v662_v29, 8.507059e+37  ;;  %vm838_vm1 = vweird.f32 %v2206_v31  ;;  %v393_v29 = vpop.f32.mrf.mxu3 }
  0xdd   :  { %v657_v63 = vadd.f32 %v1682_v32, %v656_v57  ;;  %v842_v0 = vand.u32 2147483647, %v2206_v31  ;;  %v844_v3 = vand.u32 2147483648, %v2206_v31  ;;  %1687 = vpow2.f32 %v2158_v55 }
  0xde   :  { %v1006_v1 = vsel %vm1005_vm2, %v1680_v25, %v1002_v59  ;;  %v299_v2 = vadd.f32 %v1950_v35, %v298_v24  ;;  %v1684_v6 = vpop.eup %1683  ;;  %vm1213_vm3 = vweird.f32 %v2231_v43  ;;  %v329_v9 = vadd.f32 %v1950_v35, %v328_v30  ;;  %v360_v30 = vpop.f32.mrf.mxu2 }
  0xdf   :  { %v1011_v7 = vsel %vm2255_vm15, %v1010_v60, %v1006_v1  ;;  %v661_v8 = vsel %vm2266_vm0, %v1682_v32, %v657_v63  ;;  %v834_v11 = vmul.f32 %v1684_v6, %v2206_v31  ;;  %v1217_v12 = vand.u32 2147483647, %v2231_v43 }
  0xe0   :  { %1370 = vst.msk [vmem:[%s3131_s3 + $0xd0] sm:$0xff] %vm1343_vm4, %v1011_v7  ;;  %v666_v55 = vsel %vm663_vm5, %v665_v62, %v661_v8  ;;  %v1529_v13 = vmul.f32 -1.442695, %v299_v2  ;;  %v1541_v14 = vmul.f32 -1.442695, %v329_v9  ;;  %v359_v15 = vadd.f32 %v1950_v35, %v358_v58 }
  0xe1   :  { %1347 = vst.msk [vmem:[%s3131_s3 + $0x18] sm:$0xff] %vm1343_vm4, %v666_v55  ;;  %v1566_v10 = vmul.f32 -1.442695, %v2152_v51  ;;  %v301_v16 = vadd.f32 %v1950_v35, %v300_v5  ;;  %v835_v18 = vsub.f32 1.0, %v834_v11  ;;  %vm839_vm6 = vweird.f32 %v1684_v6 }
  0xe2   :  { %v1686_v17 = vpop.eup %1685  ;;  %1689 = vpow2.f32 %v1529_v13  ;;  %v331_v19 = vadd.f32 %v1950_v35, %v330_v4  ;;  %v845_v20 = vor.u32 1.1754944e-38, %v844_v3  ;;  %v1553_v22 = vmul.f32 -1.442695, %v359_v15  ;;  %vm2300_vm7 = vmor %vm838_vm1, %vm839_vm6 }
  0xe3   :  { %v1209_v21 = vmul.f32 %v1686_v17, %v2231_v43  ;;  %1691 = vpow2.f32 %v1541_v14  ;;  %v1688_v23 = vpop.eup %1687  ;;  %v836_v24 = vmul.f32 %v1684_v6, %v835_v18  ;;  %v1219_v25 = vand.u32 2147483648, %v2231_v43 }
  0xe4   :  { %1693 = vpow2.f32 %v1566_v10  ;;  %v1530_v51 = vmul.f32 -1.442695, %v301_v16  ;;  %vm1214_vm8 = vweird.f32 %v1686_v17  ;;  %v2304_v28 = vadd.f32 1.0, %v1688_v23 }
  0xe5   :  { %v1210_v27 = vsub.f32 1.0, %v1209_v21  ;;  %1695 = vpow2.f32 %v1553_v22  ;;  %v837_v32 = vadd.f32 %v1684_v6, %v836_v24  ;;  %vm843_vm9 = vcmp.eq.f32.partialorder %v842_v0, 8.507059e+37  ;;  %vm2316_vm11 = vmor %vm1213_vm3, %vm1214_vm8 }
  0xe6   :  { %v1542_v33 = vmul.f32 -1.442695, %v331_v19  ;;  %v394_v34 = vadd.f32 %v1950_v35, %v393_v29  ;;  %vm2307_vm10 = vcmp.eq.f32.partialorder %v1217_v12, 8.507059e+37  ;;  %1697 = vrcp.f32 %v2304_v28 }
  0xe7   :  { %v1211_v36 = vmul.f32 %v1686_v17, %v1210_v27  ;;  %v841_v38 = vsel %vm2300_vm7, %v1684_v6, %v837_v32  ;;  %v1220_v40 = vor.u32 1.1754944e-38, %v1219_v25  ;;  %1699 = vpow2.f32 %v1530_v51 }
  0xe8   :  { %v1690_v31 = vpop.eup %1689  ;;  %v361_v41 = vadd.f32 %v1950_v35, %v360_v30  ;;  %v846_v44 = vsel %vm843_vm9, %v845_v20, %v841_v38  ;;  %v1024_v47 = vand.u32 2147483648, %v2304_v28  ;;  %v1022_v43 = vand.u32 2147483647, %v2304_v28 }
  0xe9   :  { %v1692_v42 = vpop.eup %1691  ;;  %v1212_v45 = vadd.f32 %v1686_v17, %v1211_v36  ;;  %v2322_v48 = vadd.f32 1.0, %v1690_v31  ;;  %1359 = vst.msk [vmem:[%s3131_s3 + $0x78] sm:$0xff] %vm1343_vm4, %v846_v44  ;;  %1701 = vpow2.f32 %v1542_v33  ;;  %v1567_v50 = vmul.f32 -1.442695, %v394_v34 }
  0xea   :  { %v1694_v46 = vpop.eup %1693  ;;  %v2329_v49 = vadd.f32 1.0, %v1692_v42  ;;  %v304_v56 = vadd.f32 %v1950_v35, %v303_v52  ;;  %vm1018_vm12 = vweird.f32 %v2304_v28  ;;  %v1025_v60 = vor.u32 1.1754944e-38, %v1024_v47 }
  0xeb   :  { %v1696_v53 = vpop.eup %1695  ;;  %v1216_v54 = vsel %vm2316_vm11, %v1686_v17, %v1212_v45  ;;  %1703 = vrcp.f32 %v2322_v48  ;;  %v677_v58 = vand.u32 2147483647, %v2322_v48  ;;  %v679_v61 = vand.u32 2147483648, %v2322_v48 }
  0xec   :  { %v1221_v57 = vsel %vm2307_vm10, %v1220_v40, %v1216_v54  ;;  %1705 = vrcp.f32 %v2329_v49  ;;  %v1698_v59 = vpop.eup %1697  ;;  %v2345_v62 = vadd.f32 1.0, %v1694_v46  ;;  %v2347_v63 = vmul.f32 -1.442695, %v361_v41  ;;  %v333_v54 = vpop.f32.mrf.mxu1 }
  0xed   :  { %1384 = vst.msk [vmem:[%s3131_s3 + $0x140] sm:$0xff] %vm1343_vm4, %v1221_v57  ;;  %v1700_v0 = vpop.eup %1699  ;;  %v1014_v1 = vmul.f32 %v1698_v59, %v2304_v28  ;;  %vm2350_vm13 = vcmp.eq.f32.partialorder %v1022_v43, 8.507059e+37  ;;  %v857_v2 = vand.u32 2147483647, %v2329_v49  ;;  %v2355_v5 = vadd.f32 1.0, %v1696_v53 }
  0xee   :  { %1707 = vpow2.f32 %v1567_v50  ;;  %vm673_vm14 = vweird.f32 %v2322_v48  ;;  %v859_v6 = vand.u32 2147483648, %v2329_v49  ;;  %v2360_v7 = vmul.f32 -1.442695, %v304_v56 }
  0xef   :  { %1709 = vrcp.f32 %v2345_v62  ;;  %v1702_v8 = vpop.eup %1701  ;;  %v1015_v9 = vsub.f32 1.0, %v1014_v1  ;;  %vm2362_vm15 = vcmp.eq.f32.partialorder %v677_v58, 8.507059e+37  ;;  %vm853_vm0 = vweird.f32 %v2329_v49 }
  0xf0   :  { %1711 = vrcp.f32 %v2355_v5  ;;  %vm1019_vm2 = vweird.f32 %v1698_v59  ;;  %v680_v11 = vor.u32 1.1754944e-38, %v679_v61  ;;  %v1232_v12 = vand.u32 2147483647, %v2345_v62 }
  0xf1   :  { %v1704_v55 = vpop.eup %1703  ;;  %v2369_v13 = vadd.f32 1.0, %v1700_v0  ;;  %v1016_v10 = vmul.f32 %v1698_v59, %v1015_v9  ;;  %vm2372_vm5 = vcmp.eq.f32.partialorder %v857_v2, 8.507059e+37  ;;  %v1234_v17 = vand.u32 2147483648, %v2345_v62  ;;  %vm1020_vm6 = vmor %vm1018_vm12, %vm1019_vm2  ;;  %v395_v2 = vpop.f32.mrf.mxu3 }
  0xf2   :  { %v1706_v14 = vpop.eup %1705  ;;  %v669_v15 = vmul.f32 %v1704_v55, %v2322_v48  ;;  %v860_v19 = vor.u32 1.1754944e-38, %v859_v6  ;;  %vm1228_vm1 = vweird.f32 %v2345_v62  ;;  %v1037_v20 = vand.u32 2147483647, %v2355_v5  ;;  %v363_v6 = vpop.f32.mrf.mxu2 }
  0xf3   :  { %v849_v18 = vmul.f32 %v1706_v14, %v2329_v49  ;;  %v1017_v22 = vadd.f32 %v1698_v59, %v1016_v10  ;;  %vm674_vm3 = vweird.f32 %v1704_v55  ;;  %1713 = vrcp.f32 %v2369_v13 }
  0xf4   :  { %v1708_v21 = vpop.eup %1707  ;;  %v670_v23 = vsub.f32 1.0, %v669_v15  ;;  %vm854_vm7 = vweird.f32 %v1706_v14  ;;  %vm2384_vm8 = vcmp.eq.f32.partialorder %v1232_v12, 8.507059e+37  ;;  %vm1033_vm9 = vweird.f32 %v2355_v5  ;;  %vm2396_vm10 = vmor %vm673_vm14, %vm674_vm3  ;;  %v335_v51 = vpop.f32.mrf.mxu1 }
  0xf5   :  { %v1710_v24 = vpop.eup %1709  ;;  %v850_v25 = vsub.f32 1.0, %v849_v18  ;;  %v1039_v26 = vand.u32 2147483648, %v2355_v5  ;;  %v1021_v29 = vsel %vm1020_vm6, %v1698_v59, %v1017_v22  ;;  %v1235_v33 = vor.u32 1.1754944e-38, %v1234_v17  ;;  %vm2409_vm12 = vmor %vm853_vm0, %vm854_vm7 }
  0xf6   :  { %v1712_v27 = vpop.eup %1711  ;;  %v671_v30 = vmul.f32 %v1704_v55, %v670_v23  ;;  %v1224_v32 = vmul.f32 %v1710_v24, %v2345_v62  ;;  %v1026_v28 = vsel %vm2350_vm13, %v1025_v60, %v1021_v29  ;;  %vm688_vm11 = vweird.f32 %v2369_v13  ;;  %v305_v23 = vpop.f32.mrf.mxu0 }
  0xf7   :  { %v851_v36 = vmul.f32 %v1706_v14, %v850_v25  ;;  %v1029_v37 = vmul.f32 %v1712_v27, %v2355_v5  ;;  %1371 = vst.msk [vmem:[%s3131_s3 + $0xd8] sm:$0xff] %vm1343_vm4, %v1026_v28  ;;  %vm1229_vm13 = vweird.f32 %v1710_v24  ;;  %v692_v40 = vand.u32 2147483647, %v2369_v13 }
  0xf8   :  { %v672_v31 = vadd.f32 %v1704_v55, %v671_v30  ;;  %v1225_v39 = vsub.f32 1.0, %v1224_v32  ;;  %vm1034_vm14 = vweird.f32 %v1712_v27  ;;  %v2414_v44 = vadd.f32 1.0, %v1702_v8  ;;  %vm2427_vm0 = vmor %vm1228_vm1, %vm1229_vm13 }
  0xf9   :  { %v852_v41 = vadd.f32 %v1706_v14, %v851_v36  ;;  %v1030_v42 = vsub.f32 1.0, %v1029_v37  ;;  %v1714_v45 = vpop.eup %1713  ;;  %v2418_v46 = vadd.f32 1.0, %v1708_v21  ;;  %1715 = vpow2.f32 %v2347_v63  ;;  %vm1035_vm2 = vmor %vm1033_vm9, %vm1034_vm14 }
  0xfa   :  { %v676_v47 = vsel %vm2396_vm10, %v1704_v55, %v672_v31  ;;  %v1226_v48 = vmul.f32 %v1710_v24, %v1225_v39  ;;  %v684_v53 = vmul.f32 %v1714_v45, %v2369_v13  ;;  %v694_v58 = vand.u32 2147483648, %v2369_v13 }
  0xfb   :  { %v681_v43 = vsel %vm2362_vm15, %v680_v11, %v676_v47  ;;  %v856_v49 = vsel %vm2409_vm12, %v1706_v14, %v852_v41  ;;  %v1031_v52 = vmul.f32 %v1712_v27, %v1030_v42  ;;  %1717 = vrcp.f32 %v2414_v44 }
  0xfc   :  { %1348 = vst.msk [vmem:[%s3131_s3 + $0x20] sm:$0xff] %vm1343_vm4, %v681_v43  ;;  %v861_v56 = vsel %vm2372_vm5, %v860_v19, %v856_v49  ;;  %v1227_v57 = vadd.f32 %v1710_v24, %v1226_v48  ;;  %v685_v60 = vsub.f32 1.0, %v684_v53  ;;  %vm689_vm15 = vweird.f32 %v1714_v45 }
  0xfd   :  { %1360 = vst.msk [vmem:[%s3131_s3 + $0x80] sm:$0xff] %vm1343_vm4, %v861_v56  ;;  %v1032_v59 = vadd.f32 %v1712_v27, %v1031_v52  ;;  %v334_v61 = vadd.f32 %v1950_v35, %v333_v54  ;;  %v1040_v63 = vor.u32 1.1754944e-38, %v1039_v26  ;;  %1719 = vrcp.f32 %v2418_v46  ;;  %vm2460_vm1 = vmor %vm688_vm11, %vm689_vm15  ;;  %v398_v56 = vpop.f32.mrf.mxu3 }
  0xfe   :  { %v1231_v62 = vsel %vm2427_vm0, %v1710_v24, %v1227_v57  ;;  %vm1038_vm5 = vcmp.eq.f32.partialorder %v1037_v20, 8.507059e+37  ;;  %v686_v3 = vmul.f32 %v1714_v45, %v685_v60  ;;  %vm2464_vm3 = vcmp.eq.f32.partialorder %v692_v40, 8.507059e+37  ;;  %v365_v57 = vpop.f32.mrf.mxu2  ;;  %v2542_v60 = vld [vmem:[%s3129_s2] ss:$0 sm:$0xff] }
  0xff   :  { %v1236_v0 = vsel %vm2384_vm8, %v1235_v33, %v1231_v62  ;;  %v1036_v1 = vsel %vm1035_vm2, %v1712_v27, %v1032_v59  ;;  %v1716_v8 = vpop.eup %1715  ;;  %v695_v55 = vor.u32 1.1754944e-38, %v694_v58  ;;  %v872_v11 = vand.u32 2147483647, %v2414_v44 }
 0x100   :  { %1385 = vst.msk [vmem:[%s3131_s3 + $0x148] sm:$0xff] %vm1343_vm4, %v1236_v0  ;;  %v1041_v9 = vsel %vm1038_vm5, %v1040_v63, %v1036_v1  ;;  %v687_v12 = vadd.f32 %v1714_v45, %v686_v3  ;;  %v2473_v14 = vadd.f32 1.0, %v1716_v8  ;;  %1721 = vpow2.f32 %v2360_v7 }
 0x101   :  { %1372 = vst.msk [vmem:[%s3131_s3 + $0xe0] sm:$0xff] %vm1343_vm4, %v1041_v9  ;;  %v1543_v13 = vmul.f32 -1.442695, %v334_v61  ;;  %v1718_v10 = vpop.eup %1717  ;;  %v874_v15 = vand.u32 2147483648, %v2414_v44  ;;  %v396_v16 = vadd.f32 %v1950_v35, %v395_v2  ;;  %v364_v17 = vadd.f32 %v1950_v35, %v363_v6 }
 0x102   :  { %v691_v18 = vsel %vm2460_vm1, %v1714_v45, %v687_v12  ;;  %v864_v19 = vmul.f32 %v1718_v10, %v2414_v44  ;;  %vm868_vm6 = vweird.f32 %v2414_v44  ;;  %1723 = vrcp.f32 %v2473_v14 }
 0x103   :  { %v1720_v20 = vpop.eup %1719  ;;  %v696_v7 = vsel %vm2464_vm3, %v695_v55, %v691_v18  ;;  %vm2486_vm7 = vcmp.eq.f32.partialorder %v872_v11, 8.507059e+37  ;;  %vm1243_vm8 = vweird.f32 %v2418_v46  ;;  %v1247_v22 = vand.u32 2147483647, %v2418_v46 }
 0x104   :  { %1349 = vst.msk [vmem:[%s3131_s3 + $0x28] sm:$0xff] %vm1343_vm4, %v696_v7  ;;  %v865_v24 = vsub.f32 1.0, %v864_v19  ;;  %vm869_vm9 = vweird.f32 %v1718_v10  ;;  %v1239_v25 = vmul.f32 %v1720_v20, %v2418_v46  ;;  %1725 = vpow2.f32 %v1543_v13 }
 0x105   :  { %v875_v26 = vor.u32 1.1754944e-38, %v874_v15  ;;  %v1249_v27 = vand.u32 2147483648, %v2418_v46  ;;  %v1568_v29 = vmul.f32 -1.442695, %v396_v16  ;;  %v1555_v30 = vmul.f32 -1.442695, %v364_v17  ;;  %vm2501_vm11 = vmor %vm868_vm6, %vm869_vm9 }
 0x106   :  { %v1722_v32 = vpop.eup %1721  ;;  %v866_v33 = vmul.f32 %v1718_v10, %v865_v24  ;;  %v1240_v28 = vsub.f32 1.0, %v1239_v25  ;;  %vm1244_vm10 = vweird.f32 %v1720_v20  ;;  %v306_v34 = vadd.f32 %v1950_v35, %v305_v23 }
 0x107   :  { %v1052_v37 = vand.u32 2147483647, %v2473_v14  ;;  %v2506_v31 = vadd.f32 1.0, %v1722_v32  ;;  %1727 = vpow2.f32 %v1568_v29  ;;  %v336_v38 = vadd.f32 %v1950_v35, %v335_v51  ;;  %vm2511_vm12 = vmor %vm1243_vm8, %vm1244_vm10 }
 0x108   :  { %v1724_v39 = vpop.eup %1723  ;;  %v867_v40 = vadd.f32 %v1718_v10, %v866_v33  ;;  %v1241_v41 = vmul.f32 %v1720_v20, %v1240_v28  ;;  %1729 = vpow2.f32 %v1555_v30  ;;  %v1532_v42 = vmul.f32 -1.442695, %v306_v34 }
 0x109   :  { %vm2515_vm13 = vcmp.eq.f32.partialorder %v1247_v22, 8.507059e+37  ;;  %v1250_v47 = vor.u32 1.1754944e-38, %v1249_v27  ;;  %v1044_v48 = vmul.f32 %v1724_v39, %v2473_v14  ;;  %1731 = vrcp.f32 %v2506_v31 }
 0x10a   :  { %v1726_v35 = vpop.eup %1725  ;;  %v871_v43 = vsel %vm2501_vm11, %v1718_v10, %v867_v40  ;;  %v1242_v49 = vadd.f32 %v1720_v20, %v1241_v41  ;;  %vm1048_vm14 = vweird.f32 %v2473_v14  ;;  %v1054_v46 = vand.u32 2147483648, %v2473_v14 }
 0x10b   :  { %v876_v50 = vsel %vm2486_vm7, %v875_v26, %v871_v43  ;;  %v1045_v52 = vsub.f32 1.0, %v1044_v48  ;;  %vm2527_vm0 = vcmp.eq.f32.partialorder %v1052_v37, 8.507059e+37  ;;  %v2531_v54 = vadd.f32 1.0, %v1726_v35 }
 0x10c   :  { %1361 = vst.msk [vmem:[%s3131_s3 + $0x88] sm:$0xff] %vm1343_vm4, %v876_v50  ;;  %v1246_v58 = vsel %vm2511_vm12, %v1720_v20, %v1242_v49  ;;  %1733 = vpow2.f32 %v1532_v42  ;;  %v1544_v59 = vmul.f32 -1.442695, %v336_v38  ;;  %v399_v61 = vadd.f32 %v2542_v60, %v398_v56  ;;  %v368_v20 = vpop.f32.mrf.mxu2 }
 0x10d   :  { %v1728_v62 = vpop.eup %1727  ;;  %v1251_v63 = vsel %vm2515_vm13, %v1250_v47, %v1246_v58  ;;  %v1046_v0 = vmul.f32 %v1724_v39, %v1045_v52  ;;  %vm1049_vm15 = vweird.f32 %v1724_v39  ;;  %1735 = vrcp.f32 %v2531_v54 }
 0x10e   :  { %v1730_v1 = vpop.eup %1729  ;;  %1386 = vst.msk [vmem:[%s3131_s3 + $0x150] sm:$0xff] %vm1343_vm4, %v1251_v63  ;;  %v1055_v3 = vor.u32 1.1754944e-38, %v1054_v46  ;;  %v2552_v2 = vadd.f32 1.0, %v1728_v62  ;;  %1737 = vpow2.f32 %v1544_v59  ;;  %v366_v6 = vadd.f32 %v2542_v60, %v365_v57  ;;  %vm1050_vm2 = vmor %vm1048_vm14, %vm1049_vm15 }
 0x10f   :  { %v1732_v8 = vpop.eup %1731  ;;  %v1047_v9 = vadd.f32 %v1724_v39, %v1046_v0  ;;  %v707_v5 = vand.u32 2147483647, %v2506_v31  ;;  %v709_v4 = vand.u32 2147483648, %v2506_v31  ;;  %v2557_v55 = vadd.f32 1.0, %v1730_v1 }
 0x110   :  { %v699_v11 = vmul.f32 %v1732_v8, %v2506_v31  ;;  %vm703_vm5 = vweird.f32 %v2506_v31  ;;  %v887_v12 = vand.u32 2147483647, %v2531_v54  ;;  %v889_v13 = vand.u32 2147483648, %v2531_v54  ;;  %v308_v31 = vpop.f32.mrf.mxu0 }
 0x111   :  { %v1051_v10 = vsel %vm1050_vm2, %v1724_v39, %v1047_v9  ;;  %vm704_vm1 = vweird.f32 %v1732_v8  ;;  %1739 = vrcp.f32 %v2552_v2  ;;  %v1569_v15 = vmul.f32 -1.442695, %v399_v61 }
 0x112   :  { %v1734_v16 = vpop.eup %1733  ;;  %v1056_v17 = vsel %vm2527_vm0, %v1055_v3, %v1051_v10  ;;  %v700_v18 = vsub.f32 1.0, %v699_v11  ;;  %v1262_v14 = vand.u32 2147483647, %v2552_v2  ;;  %1741 = vrcp.f32 %v2557_v55  ;;  %vm2587_vm8 = vmor %vm703_vm5, %vm704_vm1 }
 0x113   :  { %v1736_v19 = vpop.eup %1735  ;;  %1373 = vst.msk [vmem:[%s3131_s3 + $0xe8] sm:$0xff] %vm1343_vm4, %v1056_v17  ;;  %vm2574_vm3 = vcmp.eq.f32.partialorder %v707_v5, 8.507059e+37  ;;  %v710_v7 = vor.u32 1.1754944e-38, %v709_v4  ;;  %vm883_vm6 = vweird.f32 %v2531_v54  ;;  %v1556_v21 = vmul.f32 -1.442695, %v366_v6  ;;  %v400_v4 = vpop.f32.mrf.mxu3 }
 0x114   :  { %v1738_v22 = vpop.eup %1737  ;;  %v701_v23 = vmul.f32 %v1732_v8, %v700_v18  ;;  %v879_v24 = vmul.f32 %v1736_v19, %v2531_v54  ;;  %vm2580_vm7 = vcmp.eq.f32.partialorder %v887_v12, 8.507059e+37  ;;  %v890_v51 = vor.u32 1.1754944e-38, %v889_v13  ;;  %v370_v61 = vpop.f32.mrf.mxu2 }
 0x115   :  { %vm884_vm9 = vweird.f32 %v1736_v19  ;;  %vm1258_vm10 = vweird.f32 %v2552_v2  ;;  %v1264_v27 = vand.u32 2147483648, %v2552_v2  ;;  %v2593_v29 = vadd.f32 1.0, %v1734_v16 }
 0x116   :  { %v702_v30 = vadd.f32 %v1732_v8, %v701_v23  ;;  %v880_v32 = vsub.f32 1.0, %v879_v24  ;;  %vm2595_vm11 = vcmp.eq.f32.partialorder %v1262_v14, 8.507059e+37  ;;  %v2599_v28 = vadd.f32 1.0, %v1738_v22  ;;  %vm2614_vm13 = vmor %vm883_vm6, %vm884_vm9 }
 0x117   :  { %1743 = vpow2.f32 %v1569_v15  ;;  %v1740_v34 = vpop.eup %1739  ;;  %vm1063_vm12 = vweird.f32 %v2557_v55  ;;  %v1067_v36 = vand.u32 2147483647, %v2557_v55  ;;  %v1069_v37 = vand.u32 2147483648, %v2557_v55 }
 0x118   :  { %1745 = vrcp.f32 %v2593_v29  ;;  %v1742_v38 = vpop.eup %1741  ;;  %v706_v39 = vsel %vm2587_vm8, %v1732_v8, %v702_v30  ;;  %v881_v40 = vmul.f32 %v1736_v19, %v880_v32  ;;  %v1254_v41 = vmul.f32 %v1740_v34, %v2552_v2  ;;  %v338_v2 = vpop.f32.mrf.mxu1 }
 0x119   :  { %v309_v42 = vadd.f32 %v2542_v60, %v308_v31  ;;  %v711_v44 = vsel %vm2574_vm3, %v710_v7, %v706_v39  ;;  %v1265_v47 = vor.u32 1.1754944e-38, %v1264_v27  ;;  %v1059_v48 = vmul.f32 %v1742_v38, %v2557_v55 }
 0x11a   :  { %v724_v35 = vand.u32 2147483648, %v2593_v29  ;;  %1350 = vst.msk [vmem:[%s3131_s3 + $0x30] sm:$0xff] %vm1343_vm4, %v711_v44  ;;  %v882_v43 = vadd.f32 %v1736_v19, %v881_v40  ;;  %v1255_v49 = vsub.f32 1.0, %v1254_v41  ;;  %vm1259_vm14 = vweird.f32 %v1740_v34  ;;  %v310_v40 = vpop.f32.mrf.mxu0 }
 0x11b   :  { %1747 = vrcp.f32 %v2599_v28  ;;  %v1060_v46 = vsub.f32 1.0, %v1059_v48  ;;  %vm2625_vm0 = vcmp.eq.f32.partialorder %v1067_v36, 8.507059e+37  ;;  %v1070_v52 = vor.u32 1.1754944e-38, %v1069_v37  ;;  %vm2636_vm2 = vmor %vm1258_vm10, %vm1259_vm14  ;;  %v403_v48 = vpop.f32.mrf.mxu3 }
 0x11c   :  { %vm718_vm15 = vweird.f32 %v2593_v29  ;;  %v886_v54 = vsel %vm2614_vm13, %v1736_v19, %v882_v43  ;;  %v1256_v56 = vmul.f32 %v1740_v34, %v1255_v49  ;;  %1749 = vpow2.f32 %v1556_v21 }
 0x11d   :  { %v1744_v53 = vpop.eup %1743  ;;  %v1533_v57 = vmul.f32 -1.442695, %v309_v42  ;;  %v891_v59 = vsel %vm2580_vm7, %v890_v51, %v886_v54  ;;  %v1061_v62 = vmul.f32 %v1742_v38, %v1060_v46  ;;  %vm1064_vm5 = vweird.f32 %v1742_v38 }
 0x11e   :  { %v1746_v58 = vpop.eup %1745  ;;  %v722_v63 = vand.u32 2147483647, %v2593_v29  ;;  %1362 = vst.msk [vmem:[%s3131_s3 + $0x90] sm:$0xff] %vm1343_vm4, %v891_v59  ;;  %v1257_v0 = vadd.f32 %v1740_v34, %v1256_v56  ;;  %v725_v3 = vor.u32 1.1754944e-38, %v724_v35  ;;  %v2646_v6 = vadd.f32 1.0, %v1744_v53  ;;  %vm1065_vm1 = vmor %vm1063_vm12, %vm1064_vm5 }
 0x11f   :  { %v714_v1 = vmul.f32 %v1746_v58, %v2593_v29  ;;  %v1062_v8 = vadd.f32 %v1742_v38, %v1061_v62  ;;  %v904_v9 = vand.u32 2147483648, %v2599_v28  ;;  %1751 = vpow2.f32 %v1533_v57 }
 0x120   :  { %v339_v5 = vadd.f32 %v2542_v60, %v338_v2  ;;  %v1261_v12 = vsel %vm2636_vm2, %v1740_v34, %v1257_v0  ;;  %vm719_vm3 = vweird.f32 %v1746_v58  ;;  %1753 = vrcp.f32 %v2646_v6  ;;  %v340_v42 = vpop.f32.mrf.mxu1 }
 0x121   :  { %v1748_v11 = vpop.eup %1747  ;;  %v715_v13 = vsub.f32 1.0, %v714_v1  ;;  %v1266_v10 = vsel %vm2595_vm11, %v1265_v47, %v1261_v12  ;;  %v1066_v15 = vsel %vm1065_vm1, %v1742_v38, %v1062_v8  ;;  %vm898_vm6 = vweird.f32 %v2599_v28  ;;  %vm2674_vm7 = vmor %vm718_vm15, %vm719_vm3 }
 0x122   :  { %v894_v16 = vmul.f32 %v1748_v11, %v2599_v28  ;;  %v1750_v17 = vpop.eup %1749  ;;  %1387 = vst.msk [vmem:[%s3131_s3 + $0x158] sm:$0xff] %vm1343_vm4, %v1266_v10  ;;  %v1071_v55 = vsel %vm2625_vm0, %v1070_v52, %v1066_v15  ;;  %v902_v14 = vand.u32 2147483647, %v2599_v28  ;;  %v401_v19 = vadd.f32 %v2542_v60, %v400_v4 }
 0x123   :  { %v716_v18 = vmul.f32 %v1746_v58, %v715_v13  ;;  %1374 = vst.msk [vmem:[%s3131_s3 + $0xf0] sm:$0xff] %vm1343_vm4, %v1071_v55  ;;  %vm899_vm8 = vweird.f32 %v1748_v11  ;;  %v2678_v22 = vadd.f32 1.0, %v1750_v17  ;;  %v1545_v23 = vmul.f32 -1.442695, %v339_v5 }
 0x124   :  { %v895_v21 = vsub.f32 1.0, %v894_v16  ;;  %vm723_vm9 = vcmp.eq.f32.partialorder %v722_v63, 8.507059e+37  ;;  %v905_v25 = vor.u32 1.1754944e-38, %v904_v9  ;;  %v1277_v51 = vand.u32 2147483647, %v2646_v6  ;;  %vm2688_vm10 = vmor %vm898_vm6, %vm899_vm8 }
 0x125   :  { %v717_v24 = vadd.f32 %v1746_v58, %v716_v18  ;;  %v1752_v26 = vpop.eup %1751  ;;  %v1279_v30 = vand.u32 2147483648, %v2646_v6  ;;  %1755 = vrcp.f32 %v2678_v22  ;;  %v369_v29 = vadd.f32 %v2542_v60, %v368_v20 }
 0x126   :  { %v896_v27 = vmul.f32 %v1748_v11, %v895_v21  ;;  %v1754_v32 = vpop.eup %1753  ;;  %v2692_v36 = vadd.f32 1.0, %v1752_v26  ;;  %1757 = vpow2.f32 %v1545_v23  ;;  %v1570_v37 = vmul.f32 -1.442695, %v401_v19  ;;  %v2754_v21 = vpop.f32.mrf.mxu3 }
 0x127   :  { %v721_v33 = vsel %vm2674_vm7, %v1746_v58, %v717_v24  ;;  %vm903_vm11 = vcmp.eq.f32.partialorder %v902_v14, 8.507059e+37  ;;  %v1269_v39 = vmul.f32 %v1754_v32, %v2646_v6  ;;  %vm1273_vm12 = vweird.f32 %v2646_v6 }
 0x128   :  { %v726_v31 = vsel %vm723_vm9, %v725_v3, %v721_v33  ;;  %v897_v38 = vadd.f32 %v1748_v11, %v896_v27  ;;  %vm2700_vm13 = vcmp.eq.f32.partialorder %v1277_v51, 8.507059e+37  ;;  %v1082_v41 = vand.u32 2147483647, %v2678_v22  ;;  %v313_v33 = vpop.f32.mrf.mxu0 }
 0x129   :  { %1351 = vst.msk [vmem:[%s3131_s3 + $0x38] sm:$0xff] %vm1343_vm4, %v726_v31  ;;  %1759 = vrcp.f32 %v2692_v36  ;;  %v1270_v45 = vsub.f32 1.0, %v1269_v39  ;;  %vm1274_vm14 = vweird.f32 %v1754_v32  ;;  %v1280_v47 = vor.u32 1.1754944e-38, %v1279_v30  ;;  %v2779_v31 = vpop.f32.mrf.mxu2 }
 0x12a   :  { %v901_v44 = vsel %vm2688_vm10, %v1748_v11, %v897_v38  ;;  %1761 = vpow2.f32 %v1570_v37  ;;  %v1557_v43 = vmul.f32 -1.442695, %v369_v29  ;;  %v311_v49 = vadd.f32 %v2542_v60, %v310_v40  ;;  %vm2718_vm15 = vmor %vm1273_vm12, %vm1274_vm14 }
 0x12b   :  { %v906_v35 = vsel %vm903_vm11, %v905_v25, %v901_v44  ;;  %v1756_v46 = vpop.eup %1755  ;;  %v1271_v50 = vmul.f32 %v1754_v32, %v1270_v45  ;;  %vm1078_vm0 = vweird.f32 %v2678_v22  ;;  %v1084_v52 = vand.u32 2147483648, %v2678_v22 }
 0x12c   :  { %1363 = vst.msk [vmem:[%s3131_s3 + $0x98] sm:$0xff] %vm1343_vm4, %v906_v35  ;;  %v341_v53 = vadd.f32 %v2542_v60, %v340_v42  ;;  %v1758_v54 = vpop.eup %1757  ;;  %v1074_v57 = vmul.f32 %v1756_v46, %v2678_v22  ;;  %vm2723_vm2 = vcmp.eq.f32.partialorder %v1082_v41, 8.507059e+37  ;;  %1763 = vpow2.f32 %v1557_v43 }
 0x12d   :  { %v1534_v59 = vmul.f32 -1.442695, %v311_v49  ;;  %v1272_v62 = vadd.f32 %v1754_v32, %v1271_v50  ;;  %v737_v63 = vand.u32 2147483647, %v2692_v36  ;;  %v739_v0 = vand.u32 2147483648, %v2692_v36 }
 0x12e   :  { %v2729_v1 = vadd.f32 1.0, %v1758_v54  ;;  %v1075_v6 = vsub.f32 1.0, %v1074_v57  ;;  %v1546_v2 = vmul.f32 -1.442695, %v341_v53  ;;  %v404_v8 = vadd.f32 %v2542_v60, %v403_v48  ;;  %v2813_v57 = vpop.f32.mrf.mxu3 }
 0x12f   :  { %v1760_v3 = vpop.eup %1759  ;;  %1765 = vpow2.f32 %v1534_v59  ;;  %v1276_v9 = vsel %vm2718_vm15, %v1754_v32, %v1272_v62  ;;  %v1085_v5 = vor.u32 1.1754944e-38, %v1084_v52  ;;  %vm1079_vm5 = vweird.f32 %v1756_v46 }
 0x130   :  { %v729_v4 = vmul.f32 %v1760_v3, %v2692_v36  ;;  %1767 = vrcp.f32 %v2729_v1  ;;  %v1762_v11 = vpop.eup %1761  ;;  %v1281_v12 = vsel %vm2700_vm13, %v1280_v47, %v1276_v9  ;;  %v1076_v13 = vmul.f32 %v1756_v46, %v1075_v6  ;;  %vm1080_vm7 = vmor %vm1078_vm0, %vm1079_vm5  ;;  %v343_v9 = vpop.f32.mrf.mxu1 }
 0x131   :  { %vm733_vm1 = vweird.f32 %v2692_v36  ;;  %1388 = vst.msk [vmem:[%s3131_s3 + $0x160] sm:$0xff] %vm1343_vm4, %v1281_v12  ;;  %vm734_vm3 = vweird.f32 %v1760_v3  ;;  %vm2743_vm6 = vcmp.eq.f32.partialorder %v737_v63, 8.507059e+37  ;;  %v2747_v16 = vadd.f32 1.0, %v1762_v11 }
 0x132   :  { %v730_v10 = vsub.f32 1.0, %v729_v4  ;;  %v1764_v17 = vpop.eup %1763  ;;  %v1077_v55 = vadd.f32 %v1756_v46, %v1076_v13  ;;  %v740_v18 = vor.u32 1.1754944e-38, %v739_v0  ;;  %1769 = vpow2.f32 %v1546_v2  ;;  %vm2759_vm8 = vmor %vm733_vm1, %vm734_vm3 }
 0x133   :  { %v1571_v14 = vmul.f32 -1.442695, %v404_v8  ;;  %v917_v20 = vand.u32 2147483647, %v2729_v1  ;;  %1771 = vrcp.f32 %v2747_v16  ;;  %v371_v7 = vadd.f32 %v2542_v60, %v370_v61 }
 0x134   :  { %v731_v19 = vmul.f32 %v1760_v3, %v730_v10  ;;  %v1081_v24 = vsel %vm1080_vm7, %v1756_v46, %v1077_v55  ;;  %v919_v22 = vand.u32 2147483648, %v2729_v1  ;;  %v1292_v51 = vand.u32 2147483647, %v2747_v16 }
 0x135   :  { %v1766_v23 = vpop.eup %1765  ;;  %v2765_v26 = vadd.f32 1.0, %v1764_v17  ;;  %v1086_v30 = vsel %vm2723_vm2, %v1085_v5, %v1081_v24  ;;  %1773 = vpow2.f32 %v1571_v14  ;;  %vm913_vm9 = vweird.f32 %v2729_v1  ;;  %v2847_v17 = vpop.f32.mrf.mxu2 }
 0x136   :  { %v1768_v27 = vpop.eup %1767  ;;  %v732_v29 = vadd.f32 %v1760_v3, %v731_v19  ;;  %v2769_v32 = vadd.f32 1.0, %v1766_v23  ;;  %1375 = vst.msk [vmem:[%s3131_s3 + $0xf8] sm:$0xff] %vm1343_vm4, %v1086_v30  ;;  %v1294_v36 = vand.u32 2147483648, %v2747_v16  ;;  %v314_v37 = vadd.f32 %v2542_v60, %v313_v33 }
 0x137   :  { %v909_v34 = vmul.f32 %v1768_v27, %v2729_v1  ;;  %vm2783_vm10 = vcmp.eq.f32.partialorder %v917_v20, 8.507059e+37  ;;  %1775 = vrcp.f32 %v2765_v26  ;;  %v1558_v40 = vmul.f32 -1.442695, %v371_v7 }
 0x138   :  { %v736_v38 = vsel %vm2759_vm8, %v1760_v3, %v732_v29  ;;  %v1770_v28 = vpop.eup %1769  ;;  %vm914_vm11 = vweird.f32 %v1768_v27  ;;  %1777 = vrcp.f32 %v2769_v32  ;;  %v920_v45 = vor.u32 1.1754944e-38, %v919_v22 }
 0x139   :  { %v741_v41 = vsel %vm2743_vm6, %v740_v18, %v736_v38  ;;  %v910_v42 = vsub.f32 1.0, %v909_v34  ;;  %v1772_v44 = vpop.eup %1771  ;;  %vm1288_vm12 = vweird.f32 %v2747_v16  ;;  %vm2796_vm13 = vcmp.eq.f32.partialorder %v1292_v51, 8.507059e+37  ;;  %vm2805_vm14 = vmor %vm913_vm9, %vm914_vm11  ;;  %v410_v51 = vpop.f32.mrf.mxu3 }
 0x13a   :  { %1352 = vst.msk [vmem:[%s3131_s3 + $0x40] sm:$0xff] %vm1343_vm4, %v741_v41  ;;  %v1099_v48 = vand.u32 2147483648, %v2765_v26  ;;  %v1284_v43 = vmul.f32 %v1772_v44, %v2747_v16  ;;  %v1295_v49 = vor.u32 1.1754944e-38, %v1294_v36  ;;  %v1097_v46 = vand.u32 2147483647, %v2765_v26 }
 0x13b   :  { %v911_v35 = vmul.f32 %v1768_v27, %v910_v42  ;;  %v1774_v50 = vpop.eup %1773  ;;  %v752_v53 = vand.u32 2147483647, %v2769_v32  ;;  %v754_v54 = vand.u32 2147483648, %v2769_v32  ;;  %v2811_v56 = vadd.f32 1.0, %v1770_v28 }
 0x13c   :  { %1779 = vpow2.f32 %v1558_v40  ;;  %v1285_v59 = vsub.f32 1.0, %v1284_v43  ;;  %vm1289_vm0 = vweird.f32 %v1772_v44  ;;  %v2815_v61 = vadd.f32 1.0, %v1774_v50  ;;  %v345_v43 = vpop.f32.mrf.mxu1 }
 0x13d   :  { %v912_v58 = vadd.f32 %v1768_v27, %v911_v35  ;;  %v1776_v62 = vpop.eup %1775  ;;  %vm1093_vm15 = vweird.f32 %v2765_v26  ;;  %v1100_v63 = vor.u32 1.1754944e-38, %v1099_v48  ;;  %vm748_vm2 = vweird.f32 %v2769_v32  ;;  %vm2832_vm1 = vmor %vm1288_vm12, %vm1289_vm0 }
 0x13e   :  { %1781 = vrcp.f32 %v2811_v56  ;;  %v1778_v0 = vpop.eup %1777  ;;  %v1286_v3 = vmul.f32 %v1772_v44, %v1285_v59  ;;  %v1089_v6 = vmul.f32 %v1776_v62, %v2765_v26  ;;  %vm2823_vm5 = vcmp.eq.f32.partialorder %v1097_v46, 8.507059e+37 }
 0x13f   :  { %v916_v1 = vsel %vm2805_vm14, %v1768_v27, %v912_v58  ;;  %v1535_v8 = vmul.f32 -1.442695, %v314_v37  ;;  %v744_v11 = vmul.f32 %v1778_v0, %v2769_v32  ;;  %vm2837_vm3 = vcmp.eq.f32.partialorder %v752_v53, 8.507059e+37 }
 0x140   :  { %v921_v5 = vsel %vm2783_vm10, %v920_v45, %v916_v1  ;;  %v932_v13 = vand.u32 2147483647, %v2811_v56  ;;  %v1287_v10 = vadd.f32 %v1772_v44, %v1286_v3  ;;  %v1090_v15 = vsub.f32 1.0, %v1089_v6 }
 0x141   :  { %1364 = vst.msk [vmem:[%s3131_s3 + $0xa0] sm:$0xff] %vm1343_vm4, %v921_v5  ;;  %v755_v16 = vor.u32 1.1754944e-38, %v754_v54  ;;  %1783 = vrcp.f32 %v2815_v61  ;;  %vm1094_vm6 = vweird.f32 %v1776_v62  ;;  %v745_v18 = vsub.f32 1.0, %v744_v11 }
 0x142   :  { %v1780_v55 = vpop.eup %1779  ;;  %vm749_vm7 = vweird.f32 %v1778_v0  ;;  %v934_v14 = vand.u32 2147483648, %v2811_v56  ;;  %v1291_v19 = vsel %vm2832_vm1, %v1772_v44, %v1287_v10  ;;  %v1091_v20 = vmul.f32 %v1776_v62, %v1090_v15  ;;  %vm1095_vm11 = vmor %vm1093_vm15, %vm1094_vm6  ;;  %v315_v44 = vpop.f32.mrf.mxu0 }
 0x143   :  { %v2852_v7 = vadd.f32 1.0, %v1780_v55  ;;  %1785 = vpow2.f32 %v1535_v8  ;;  %v1296_v24 = vsel %vm2796_vm13, %v1295_v49, %v1291_v19  ;;  %v746_v25 = vmul.f32 %v1778_v0, %v745_v18  ;;  %vm2867_vm10 = vmor %vm748_vm2, %vm749_vm7 }
 0x144   :  { %v1782_v23 = vpop.eup %1781  ;;  %vm928_vm8 = vweird.f32 %v2811_v56  ;;  %vm2857_vm9 = vcmp.eq.f32.partialorder %v932_v13, 8.507059e+37  ;;  %1389 = vst.msk [vmem:[%s3131_s3 + $0x168] sm:$0xff] %vm1343_vm4, %v1296_v24  ;;  %v1092_v27 = vadd.f32 %v1776_v62, %v1091_v20  ;;  %v1307_v33 = vand.u32 2147483647, %v2815_v61 }
 0x145   :  { %v924_v29 = vmul.f32 %v1782_v23, %v2811_v56  ;;  %1787 = vrcp.f32 %v2852_v7  ;;  %v747_v34 = vadd.f32 %v1778_v0, %v746_v25  ;;  %vm929_vm12 = vweird.f32 %v1782_v23 }
 0x146   :  { %v935_v36 = vor.u32 1.1754944e-38, %v934_v14  ;;  %vm1303_vm13 = vweird.f32 %v2815_v61  ;;  %v1096_v37 = vsel %vm1095_vm11, %v1776_v62, %v1092_v27  ;;  %v344_v39 = vadd.f32 %v2542_v60, %v343_v9  ;;  %vm2905_vm0 = vmor %vm928_vm8, %vm929_vm12 }
 0x147   :  { %v1784_v32 = vpop.eup %1783  ;;  %v925_v38 = vsub.f32 1.0, %v924_v29  ;;  %v406_v40 = vadd.f32 %v2542_v60, %v2754_v21  ;;  %v1101_v28 = vsel %vm2823_vm5, %v1100_v63, %v1096_v37  ;;  %v751_v26 = vsel %vm2867_vm10, %v1778_v0, %v747_v34  ;;  %v378_v63 = vpop.f32.mrf.mxu2 }
 0x148   :  { %v1299_v41 = vmul.f32 %v1784_v32, %v2815_v61  ;;  %v1309_v42 = vand.u32 2147483648, %v2815_v61  ;;  %1376 = vst.msk [vmem:[%s3131_s3 + $0x100] sm:$0xff] %vm1343_vm4, %v1101_v28  ;;  %v756_v21 = vsel %vm2837_vm3, %v755_v16, %v751_v26  ;;  %vm2893_vm14 = vcmp.eq.f32.partialorder %v1307_v33, 8.507059e+37 }
 0x149   :  { %v1786_v45 = vpop.eup %1785  ;;  %v926_v47 = vmul.f32 %v1782_v23, %v925_v38  ;;  %v1112_v35 = vand.u32 2147483647, %v2852_v7  ;;  %1353 = vst.msk [vmem:[%s3131_s3 + $0x48] sm:$0xff] %vm1343_vm4, %v756_v21  ;;  %vm1304_vm15 = vweird.f32 %v1784_v32  ;;  %v1547_v52 = vmul.f32 -1.442695, %v344_v39 }
 0x14a   :  { %v1300_v46 = vsub.f32 1.0, %v1299_v41  ;;  %v2909_v50 = vadd.f32 1.0, %v1786_v45  ;;  %v1572_v58 = vmul.f32 -1.442695, %v406_v40  ;;  %v374_v59 = vadd.f32 %v2542_v60, %v2779_v31  ;;  %vm2921_vm2 = vmor %vm1303_vm13, %vm1304_vm15 }
 0x14b   :  { %v1788_v53 = vpop.eup %1787  ;;  %v927_v54 = vadd.f32 %v1782_v23, %v926_v47  ;;  %v316_v62 = vadd.f32 %v2542_v60, %v315_v44  ;;  %v346_v1 = vadd.f32 %v2542_v60, %v345_v43  ;;  %v1310_v31 = vor.u32 1.1754944e-38, %v1309_v42 }
 0x14c   :  { %v1301_v0 = vmul.f32 %v1784_v32, %v1300_v46  ;;  %v1104_v56 = vmul.f32 %v1788_v53, %v2852_v7  ;;  %1789 = vrcp.f32 %v2909_v50  ;;  %vm1108_vm5 = vweird.f32 %v2852_v7 }
 0x14d   :  { %v931_v3 = vsel %vm2905_vm0, %v1782_v23, %v927_v54  ;;  %v1114_v2 = vand.u32 2147483648, %v2852_v7  ;;  %1791 = vpow2.f32 %v1547_v52  ;;  %vm1109_vm1 = vweird.f32 %v1788_v53 }
 0x14e   :  { %v936_v8 = vsel %vm2857_vm9, %v935_v36, %v931_v3  ;;  %v1302_v9 = vadd.f32 %v1784_v32, %v1301_v0  ;;  %v1105_v5 = vsub.f32 1.0, %v1104_v56  ;;  %vm2933_vm3 = vcmp.eq.f32.partialorder %v1112_v35, 8.507059e+37  ;;  %vm1110_vm7 = vmor %vm1108_vm5, %vm1109_vm1 }
 0x14f   :  { %1365 = vst.msk [vmem:[%s3131_s3 + $0xa8] sm:$0xff] %vm1343_vm4, %v936_v8  ;;  %1793 = vpow2.f32 %v1572_v58  ;;  %v1559_v4 = vmul.f32 -1.442695, %v374_v59  ;;  %v1536_v13 = vmul.f32 -1.442695, %v316_v62  ;;  %v376_v16 = vadd.f32 %v2542_v60, %v2847_v17  ;;  %v380_v7 = vpop.f32.mrf.mxu2 }
 0x150   :  { %v1306_v11 = vsel %vm2921_vm2, %v1784_v32, %v1302_v9  ;;  %v1106_v12 = vmul.f32 %v1788_v53, %v1105_v5  ;;  %v1548_v10 = vmul.f32 -1.442695, %v346_v1  ;;  %v409_v55 = vadd.f32 %v2542_v60, %v2813_v57 }
 0x151   :  { %v1311_v15 = vsel %vm2893_vm14, %v1310_v31, %v1306_v11  ;;  %1795 = vpow2.f32 %v1559_v4  ;;  %v1115_v19 = vor.u32 1.1754944e-38, %v1114_v2  ;;  %vm763_vm6 = vweird.f32 %v2909_v50 }
 0x152   :  { %v1790_v18 = vpop.eup %1789  ;;  %1390 = vst.msk [vmem:[%s3131_s3 + $0x170] sm:$0xff] %vm1343_vm4, %v1311_v15  ;;  %v1107_v14 = vadd.f32 %v1788_v53, %v1106_v12  ;;  %1797 = vpow2.f32 %v1536_v13  ;;  %v767_v20 = vand.u32 2147483647, %v2909_v50  ;;  %v1560_v57 = vmul.f32 -1.442695, %v376_v16 }
 0x153   :  { %v759_v17 = vmul.f32 %v1790_v18, %v2909_v50  ;;  %1799 = vpow2.f32 %v1548_v10  ;;  %v1792_v23 = vpop.eup %1791  ;;  %vm764_vm8 = vweird.f32 %v1790_v18  ;;  %v769_v25 = vand.u32 2147483648, %v2909_v50 }
 0x154   :  { %v1111_v24 = vsel %vm1110_vm7, %v1788_v53, %v1107_v14  ;;  %v1573_v22 = vmul.f32 -1.442695, %v409_v55  ;;  %v2958_v29 = vadd.f32 1.0, %v1792_v23  ;;  %1801 = vpow2.f32 %v1560_v57  ;;  %vm2971_vm9 = vmor %vm763_vm6, %vm764_vm8 }
 0x155   :  { %v1794_v51 = vpop.eup %1793  ;;  %v1116_v27 = vsel %vm2933_vm3, %v1115_v19, %v1111_v24  ;;  %v760_v30 = vsub.f32 1.0, %v759_v17  ;;  %v379_v32 = vadd.f32 %v2542_v60, %v378_v63  ;;  %vm2975_vm10 = vcmp.eq.f32.partialorder %v767_v20, 8.507059e+37 }
 0x156   :  { %1377 = vst.msk [vmem:[%s3131_s3 + $0x108] sm:$0xff] %vm1343_vm4, %v1116_v27  ;;  %v2964_v33 = vadd.f32 1.0, %v1794_v51  ;;  %1803 = vpow2.f32 %v1573_v22  ;;  %v770_v40 = vor.u32 1.1754944e-38, %v769_v25  ;;  %v381_v28 = vadd.f32 %v2542_v60, %v380_v7 }
 0x157   :  { %v1796_v34 = vpop.eup %1795  ;;  %v761_v36 = vmul.f32 %v1790_v18, %v760_v30  ;;  %1805 = vrcp.f32 %v2958_v29  ;;  %v947_v42 = vand.u32 2147483647, %v2958_v29  ;;  %v949_v44 = vand.u32 2147483648, %v2958_v29 }
 0x158   :  { %v1798_v37 = vpop.eup %1797  ;;  %1807 = vrcp.f32 %v2964_v33  ;;  %v2983_v45 = vadd.f32 1.0, %v1796_v34  ;;  %v1322_v21 = vand.u32 2147483647, %v2964_v33  ;;  %v1324_v47 = vand.u32 2147483648, %v2964_v33 }
 0x159   :  { %v1800_v26 = vpop.eup %1799  ;;  %v762_v41 = vadd.f32 %v1790_v18, %v761_v36  ;;  %v2987_v48 = vadd.f32 1.0, %v1798_v37  ;;  %v1561_v49 = vmul.f32 -1.442695, %v379_v32  ;;  %vm943_vm11 = vweird.f32 %v2958_v29 }
 0x15a   :  { %v2989_v35 = vadd.f32 1.0, %v1800_v26  ;;  %v1802_v43 = vpop.eup %1801  ;;  %1809 = vrcp.f32 %v2983_v45  ;;  %v2998_v52 = vmul.f32 -1.442695, %v381_v28  ;;  %vm3004_vm12 = vcmp.eq.f32.partialorder %v947_v42, 8.507059e+37 }
 0x15b   :  { %v766_v60 = vsel %vm2971_vm9, %v1790_v18, %v762_v41  ;;  %1811 = vrcp.f32 %v2987_v48  ;;  %v950_v58 = vor.u32 1.1754944e-38, %v949_v44  ;;  %vm1318_vm13 = vweird.f32 %v2964_v33 }
 0x15c   :  { %v1804_v46 = vpop.eup %1803  ;;  %v771_v50 = vsel %vm2975_vm10, %v770_v40, %v766_v60  ;;  %1813 = vrcp.f32 %v2989_v35  ;;  %vm3011_vm14 = vcmp.eq.f32.partialorder %v1322_v21, 8.507059e+37  ;;  %v1325_v0 = vor.u32 1.1754944e-38, %v1324_v47 }
 0x15d   :  { %v1806_v53 = vpop.eup %1805  ;;  %1354 = vst.msk [vmem:[%s3131_s3 + $0x50] sm:$0xff] %vm1343_vm4, %v771_v50  ;;  %vm1123_vm0 = vweird.f32 %v2983_v45  ;;  %v1127_v1 = vand.u32 2147483647, %v2983_v45  ;;  %v1129_v3 = vand.u32 2147483648, %v2983_v45  ;;  %vm778_vm15 = vweird.f32 %v2987_v48 }
 0x15e   :  { %v1808_v59 = vpop.eup %1807  ;;  %v939_v62 = vmul.f32 %v1806_v53, %v2958_v29  ;;  %vm944_vm2 = vweird.f32 %v1806_v53  ;;  %v782_v31 = vand.u32 2147483647, %v2987_v48  ;;  %v784_v2 = vand.u32 2147483648, %v2987_v48 }
 0x15f   :  { %v1314_v56 = vmul.f32 %v1808_v59, %v2964_v33  ;;  %vm1319_vm5 = vweird.f32 %v1808_v59  ;;  %vm958_vm1 = vweird.f32 %v2989_v35  ;;  %v3023_v5 = vadd.f32 1.0, %v1802_v43  ;;  %vm3029_vm3 = vmor %vm943_vm11, %vm944_vm2 }
 0x160   :  { %v940_v6 = vsub.f32 1.0, %v939_v62  ;;  %v1810_v8 = vpop.eup %1809  ;;  %v962_v12 = vand.u32 2147483647, %v2989_v35  ;;  %1815 = vpow2.f32 %v1561_v49  ;;  %v964_v55 = vand.u32 2147483648, %v2989_v35  ;;  %vm3040_vm6 = vmor %vm1318_vm13, %vm1319_vm5 }
 0x161   :  { %v1315_v9 = vsub.f32 1.0, %v1314_v56  ;;  %v1812_v61 = vpop.eup %1811  ;;  %v1119_v11 = vmul.f32 %v1810_v8, %v2983_v45  ;;  %v3035_v18 = vadd.f32 1.0, %v1804_v46  ;;  %vm1124_vm7 = vweird.f32 %v1810_v8 }
 0x162   :  { %v941_v4 = vmul.f32 %v1806_v53, %v940_v6  ;;  %v1814_v13 = vpop.eup %1813  ;;  %v774_v16 = vmul.f32 %v1812_v61, %v2987_v48  ;;  %vm779_vm8 = vweird.f32 %v1812_v61  ;;  %1817 = vrcp.f32 %v3023_v5  ;;  %vm3054_vm10 = vmor %vm1123_vm0, %vm1124_vm7 }
 0x163   :  { %v1316_v15 = vmul.f32 %v1808_v59, %v1315_v9  ;;  %v1120_v17 = vsub.f32 1.0, %v1119_v11  ;;  %v954_v20 = vmul.f32 %v1814_v13, %v2989_v35  ;;  %vm959_vm9 = vweird.f32 %v1814_v13  ;;  %vm3067_vm11 = vmor %vm778_vm15, %vm779_vm8 }
 0x164   :  { %v942_v14 = vadd.f32 %v1806_v53, %v941_v4  ;;  %v775_v23 = vsub.f32 1.0, %v774_v16  ;;  %v1130_v29 = vor.u32 1.1754944e-38, %v1129_v3  ;;  %v785_v37 = vor.u32 1.1754944e-38, %v784_v2  ;;  %vm3078_vm13 = vmor %vm958_vm1, %vm959_vm9 }
 0x165   :  { %v1317_v57 = vadd.f32 %v1808_v59, %v1316_v15  ;;  %v1121_v25 = vmul.f32 %v1810_v8, %v1120_v17  ;;  %v955_v22 = vsub.f32 1.0, %v954_v20  ;;  %v965_v28 = vor.u32 1.1754944e-38, %v964_v55 }
 0x166   :  { %v946_v24 = vsel %vm3029_vm3, %v1806_v53, %v942_v14  ;;  %v776_v7 = vmul.f32 %v1812_v61, %v775_v23  ;;  %v1816_v33 = vpop.eup %1815  ;;  %1819 = vrcp.f32 %v3035_v18  ;;  %vm963_vm0 = vcmp.eq.f32.partialorder %v962_v12, 8.507059e+37 }
 0x167   :  { %v951_v51 = vsel %vm3004_vm12, %v950_v58, %v946_v24  ;;  %v1321_v27 = vsel %vm3040_vm6, %v1808_v59, %v1317_v57  ;;  %v1122_v36 = vadd.f32 %v1810_v8, %v1121_v25  ;;  %v956_v38 = vmul.f32 %v1814_v13, %v955_v22 }
 0x168   :  { %1366 = vst.msk [vmem:[%s3131_s3 + $0xb0] sm:$0xff] %vm1343_vm4, %v951_v51  ;;  %v1326_v34 = vsel %vm3011_vm14, %v1325_v0, %v1321_v27  ;;  %v777_v39 = vadd.f32 %v1812_v61, %v776_v7  ;;  %vm783_vm12 = vcmp.eq.f32.partialorder %v782_v31, 8.507059e+37  ;;  %vm1128_vm14 = vcmp.eq.f32.partialorder %v1127_v1, 8.507059e+37  ;;  %v1818_v42 = vpop.eup %1817 }
 0x169   :  { %1391 = vst.msk [vmem:[%s3131_s3 + $0x178] sm:$0xff] %vm1343_vm4, %v1326_v34  ;;  %v1126_v26 = vsel %vm3054_vm10, %v1810_v8, %v1122_v36  ;;  %v957_v41 = vadd.f32 %v1814_v13, %v956_v38  ;;  %v595_v21 = vadd.f32 1.0, %v1816_v33  ;;  %1821 = vpow2.f32 %v2998_v52 }
 0x16a   :  { %v1131_v44 = vsel %vm1128_vm14, %v1130_v29, %v1126_v26  ;;  %v781_v45 = vsel %vm3067_vm11, %v1812_v61, %v777_v39  ;;  %v1134_v35 = vmul.f32 %v1818_v42, %v3023_v5  ;;  %v1144_v46 = vand.u32 2147483648, %v3023_v5 }
 0x16b   :  { %1378 = vst.msk [vmem:[%s3131_s3 + $0x110] sm:$0xff] %vm1343_vm4, %v1131_v44  ;;  %v786_v47 = vsel %vm783_vm12, %v785_v37, %v781_v45  ;;  %v961_v48 = vsel %vm3078_vm13, %v1814_v13, %v957_v41  ;;  %1823 = vrcp.f32 %v595_v21  ;;  %vm1139_vm15 = vweird.f32 %v1818_v42 }
 0x16c   :  { %1355 = vst.msk [vmem:[%s3131_s3 + $0x58] sm:$0xff] %vm1343_vm4, %v786_v47  ;;  %v966_v43 = vsel %vm963_vm0, %v965_v28, %v961_v48  ;;  %v1135_v60 = vsub.f32 1.0, %v1134_v35  ;;  %v1820_v49 = vpop.eup %1819  ;;  %v1142_v52 = vand.u32 2147483647, %v3023_v5  ;;  %vm1138_vm2 = vweird.f32 %v3023_v5 }
 0x16d   :  { %1367 = vst.msk [vmem:[%s3131_s3 + $0xb8] sm:$0xff] %vm1343_vm4, %v966_v43  ;;  %v1329_v53 = vmul.f32 %v1820_v49, %v3035_v18  ;;  %vm1333_vm5 = vweird.f32 %v3035_v18  ;;  %v1337_v58 = vand.u32 2147483647, %v3035_v18  ;;  %v1339_v59 = vand.u32 2147483648, %v3035_v18  ;;  %vm1140_vm3 = vmor %vm1138_vm2, %vm1139_vm15 }
 0x16e   :  { %v1136_v50 = vmul.f32 %v1818_v42, %v1135_v60  ;;  %vm1334_vm1 = vweird.f32 %v1820_v49  ;;  %v1145_v1 = vor.u32 1.1754944e-38, %v1144_v46  ;;  %vm1143_vm6 = vcmp.eq.f32.partialorder %v1142_v52, 8.507059e+37 }
 0x16f   :  { %v1822_v54 = vpop.eup %1821  ;;  %v1330_v63 = vsub.f32 1.0, %v1329_v53  ;;  %vm1335_vm7 = vmor %vm1333_vm5, %vm1334_vm1  ;;  %v1340_v8 = vor.u32 1.1754944e-38, %v1339_v59  ;;  %vm1338_vm8 = vcmp.eq.f32.partialorder %v1337_v58, 8.507059e+37  ;;  %v1159_v61 = vand.u32 2147483648, %v595_v21 }
 0x170   :  { %v1137_v62 = vadd.f32 %v1818_v42, %v1136_v50  ;;  %v596_v0 = vadd.f32 1.0, %v1822_v54  ;;  %v1157_v12 = vand.u32 2147483647, %v595_v21  ;;  %vm1153_vm10 = vweird.f32 %v595_v21 }
 0x171   :  { %v1824_v56 = vpop.eup %1823  ;;  %v1331_v6 = vmul.f32 %v1820_v49, %v1330_v63  ;;  %v1160_v16 = vor.u32 1.1754944e-38, %v1159_v61 }
 0x172   :  { %v1141_v3 = vsel %vm1140_vm3, %v1818_v42, %v1137_v62  ;;  %v1149_v31 = vmul.f32 %v1824_v56, %v595_v21  ;;  %1825 = vrcp.f32 %v596_v0  ;;  %vm1154_vm9 = vweird.f32 %v1824_v56 }
 0x173   :  { %v1146_v2 = vsel %vm1143_vm6, %v1145_v1, %v1141_v3  ;;  %v1332_v9 = vadd.f32 %v1820_v49, %v1331_v6  ;;  %vm1155_vm11 = vmor %vm1153_vm10, %vm1154_vm9  ;;  %vm1158_vm12 = vcmp.eq.f32.partialorder %v1157_v12, 8.507059e+37  ;;  %v1174_v17 = vand.u32 2147483648, %v596_v0 }
 0x174   :  { %1379 = vst.msk [vmem:[%s3131_s3 + $0x118] sm:$0xff] %vm1343_vm4, %v1146_v2  ;;  %v1150_v5 = vsub.f32 1.0, %v1149_v31  ;;  %v1172_v57 = vand.u32 2147483647, %v596_v0  ;;  %vm1168_vm14 = vweird.f32 %v596_v0 }
 0x175   :  { %v1336_v4 = vsel %vm1335_vm7, %v1820_v49, %v1332_v9  ;;  %v1175_v24 = vor.u32 1.1754944e-38, %v1174_v17 }
 0x176   :  { %v1151_v11 = vmul.f32 %v1824_v56, %v1150_v5  ;;  %v1341_v13 = vsel %vm1338_vm8, %v1340_v8, %v1336_v4  ;;  %vm1173_vm15 = vcmp.eq.f32.partialorder %v1172_v57, 8.507059e+37 }
 0x177   :  { %1392 = vst.msk [vmem:[%s3131_s3 + $0x180] sm:$0xff] %vm1343_vm4, %v1341_v13 }
 0x178   :  { %v1152_v10 = vadd.f32 %v1824_v56, %v1151_v11  ;;  %v1826_v15 = vpop.eup %1825 }
 0x179   :  { %v1164_v18 = vmul.f32 %v1826_v15, %v596_v0  ;;  %vm1169_vm13 = vweird.f32 %v1826_v15 }
 0x17a   :  { %v1156_v55 = vsel %vm1155_vm11, %v1824_v56, %v1152_v10  ;;  %vm1170_vm0 = vmor %vm1168_vm14, %vm1169_vm13 }
 0x17b   :  { %v1161_v14 = vsel %vm1158_vm12, %v1160_v16, %v1156_v55  ;;  %v1165_v19 = vsub.f32 1.0, %v1164_v18 }
 0x17c   :  { %1380 = vst.msk [vmem:[%s3131_s3 + $0x120] sm:$0xff] %vm1343_vm4, %v1161_v14 }
 0x17d   :  { %v1166_v20 = vmul.f32 %v1826_v15, %v1165_v19 }
 0x17f   :  { %v1167_v23 = vadd.f32 %v1826_v15, %v1166_v20 }
 0x181   :  { %v1171_v25 = vsel %vm1170_vm0, %v1826_v15, %v1167_v23 }
 0x182   :  { %v1176_v22 = vsel %vm1173_vm15, %v1175_v24, %v1171_v25 }
 0x183   :  { %1381 = vst.msk [vmem:[%s3131_s3 + $0x128] sm:$0xff] %vm1343_vm4, %v1176_v22 }

</bundles_post_ra>
